<compile_context>
chip_gen: v7x
topology: tpu7x:2x2x1
jax: 0.10.0
libtpu: 0.0.40
codegen_flags: <defaults>
</compile_context>

<pallas_src>
import functools

import numpy as np
import jax
import jax.numpy as jnp
from jax.experimental import pallas as pl
from jax.experimental.pallas import tpu as pltpu

# ---------------- configuration (small, consistent with the module) ----------
B = 2            # batch
C = 16           # in_channels of the flow (first-stage VAE latent dim), even
HALF = C // 2
COND = 16        # conditioning_dim (condition-stage latent dim)
EMB = 16         # embedding_dim
HE = 32          # embedder hidden dim (conditioning_hidden_dim)
HC = 32          # coupling-net hidden dim
NFLOWS = 4       # number of flow blocks
NEG_SLOPE = 0.01 # PyTorch nn.LeakyReLU default

K = NFLOWS * 2           # total sub-couplings
FW = 2 * HC              # fused (s | t) hidden width = 64
CONDW = K * FW           # width of the precomputed condition contributions = 512
CROWS = HALF + 3 * FW    # rows per fused-coupling weight slab = 200


def _lrelu(x):
    return jnp.where(x >= 0, x, NEG_SLOPE * x)


# ------------------------------- Pallas kernel -------------------------------
def _flow_kernel(x_ref, c_ref, emb_ref, condf_ref, cw_ref, cb_ref, ap_ref, out_ref):
    f32 = jnp.float32
    dot = functools.partial(jnp.dot, preferred_element_type=f32)

    x = x_ref[...]                       # (B, C)
    cnd = c_ref[...]                     # (B, COND)

    # ---- condition path, fully hoisted out of the flow loop -----------------
    # embedder layers 0..2 (LeakyReLU), then one folded matmul producing the
    # first-layer condition contribution + bias of every (flow, sub-coupling,
    # {s,t}) net at once: (B, HE) @ (HE, CONDW) -> (B, CONDW)
    h = _lrelu(dot(cnd, emb_ref[0, 0:COND, :]) + emb_ref[0, HE:HE + 1, :])
    h = _lrelu(dot(h, emb_ref[1, 0:HE, :]) + emb_ref[1, HE:HE + 1, :])
    h = _lrelu(dot(h, emb_ref[2, 0:HE, :]) + emb_ref[2, HE:HE + 1, :])
    cond_pre = dot(h, condf_ref[0:HE, :]) + condf_ref[HE:HE + 1, :]   # (B, CONDW)

    # ---- hoisted ActNorm logdet constant (eval-mode scales are constants) ---
    ld = jnp.zeros((B, 1), f32) + ap_ref[0, C + 2:C + 3, 0:1]

    def fused_coupling(xin, k):
        # layer0: x-side matmul + precomputed condition chunk (bias folded in)
        z = _lrelu(dot(xin, cw_ref[k, 0:HALF, :]) + cond_pre[:, k * FW:(k + 1) * FW])
        # layers 1/2: block-diagonal (s | t) streams in one 64-wide matmul each
        z = _lrelu(dot(z, cw_ref[k, HALF:HALF + FW, :]) + cb_ref[k, :, 0:FW])
        z = _lrelu(dot(z, cw_ref[k, HALF + FW:HALF + 2 * FW, :]) + cb_ref[k, :, FW:2 * FW])
        # layer3: block-diagonal (2*HC, C): cols [0,HALF) = s, [HALF,C) = t
        z = dot(z, cw_ref[k, HALF + 2 * FW:CROWS, 0:C]) + cb_ref[k, :, 2 * FW:2 * FW + C]
        return jnp.tanh(z[:, :HALF]), z[:, HALF:]          # s (tanh), t

    hcur = x
    for f in range(NFLOWS):
        # ---- ActNorm (eval):  h = scale * (h + loc) -------------------------
        loc = ap_ref[f, C:C + 1, :]          # (1, C)
        scale = ap_ref[f, C + 1:C + 2, :]    # (1, C)
        hcur = scale * (hcur + loc)

        # ---- double coupling, halves kept as separate values ----------------
        a = hcur[:, :HALF]
        b = hcur[:, HALF:]
        s0, t0 = fused_coupling(a, 2 * f)                  # sub-coupling 0
        b = b * jnp.exp(s0) + t0
        ld = ld + jnp.sum(s0, axis=1, keepdims=True)
        s1, t1 = fused_coupling(b, 2 * f + 1)              # sub-coupling 1 (swap = rename)
        a = a * jnp.exp(s1) + t1
        ld = ld + jnp.sum(s1, axis=1, keepdims=True)

        # ---- Shuffle: fixed channel permutation (tiny one-hot matmul) -------
        hcur = dot(jnp.concatenate([b, a], axis=1), ap_ref[f, 0:C, :])

    out_ref[...] = jnp.concatenate([hcur, ld], axis=1)     # (B, C+1): [zz | logdet]


# ------------------------------ wrapper (glue) --------------------------------
@jax.jit
def flow_forward(x, c, packed):
    """x: (B, C, 1, 1) NCHW latent; c: (B, COND, 1, 1). Returns (zz, logdet)."""
    x2 = x.reshape(x.shape[0], -1).astype(jnp.float32)
    c2 = c.reshape(c.shape[0], -1).astype(jnp.float32)

    out = pl.pallas_call(
        _flow_kernel,
        out_shape=jax.ShapeDtypeStruct((B, C + 1), jnp.float32),
        in_specs=[pl.BlockSpec(memory_space=pltpu.MemorySpace.VMEM)] * 7,
        out_specs=pl.BlockSpec(memory_space=pltpu.MemorySpace.VMEM),
    )(x2, c2, packed['emb'], packed['cond_fold'], packed['cw'], packed['cb'], packed['ap'])

    zz = out[:, :C].reshape(x.shape)     # (B, C, 1, 1) like the PyTorch flow
    logdet = out[:, C]                   # (B,)
    return zz, logdet


# --------------------------- deterministic params -----------------------------
def init_params(key):
    keys = jax.random.split(key, 64)
    it = iter(keys)

    def nrm(shape, scl=0.2):
        return (scl * jax.random.normal(next(it), shape)).astype(jnp.float32)

    P = {}
    # embedder (BasicFullyConnectedNet, depth=2, no tanh)
    P['ew0'] = nrm((COND, HE)); P['eb0'] = nrm((1, HE), 0.05)
    P['ew1'] = nrm((HE, HE));   P['eb1'] = nrm((1, HE), 0.05)
    P['ew2'] = nrm((HE, HE));   P['eb2'] = nrm((1, HE), 0.05)
    P['ew3'] = nrm((HE, EMB));  P['eb3'] = nrm((1, EMB), 0.05)
    # ActNorm per flow block
    P['an_loc'] = nrm((NFLOWS, 1, C), 0.1)
    P['an_scale'] = jnp.exp(nrm((NFLOWS, 1, C), 0.1))
    # Shuffle permutation matrices: out[:, j] = h[:, idx[j]]  =>  h @ P
    mats = []
    for _ in range(NFLOWS):
        idx = jax.random.permutation(next(it), C)
        mats.append(jnp.zeros((C, C), jnp.float32).at[idx, jnp.arange(C)].set(1.0))
    P['perm'] = jnp.stack(mats)
    # coupling nets s (tanh) and t, stacked over (flow, sub-coupling)
    for pre in ('s', 't'):
        P[pre + 'w0'] = nrm((NFLOWS, 2, HALF + EMB, HC)); P[pre + 'b0'] = nrm((NFLOWS, 2, 1, HC), 0.05)
        P[pre + 'w1'] = nrm((NFLOWS, 2, HC, HC));         P[pre + 'b1'] = nrm((NFLOWS, 2, 1, HC), 0.05)
        P[pre + 'w2'] = nrm((NFLOWS, 2, HC, HC));         P[pre + 'b2'] = nrm((NFLOWS, 2, 1, HC), 0.05)
        P[pre + 'w3'] = nrm((NFLOWS, 2, HC, HALF));       P[pre + 'b3'] = nrm((NFLOWS, 2, 1, HALF), 0.05)
    return P


def pack_params(P):
    """Repack the logical module parameters into 5 dense f32 buffers."""
    cw = np.zeros((K, CROWS, FW), np.float32)
    cb = np.zeros((K, 1, 2 * FW + C), np.float32)
    w0c_all = np.zeros((EMB, CONDW), np.float32)
    b0_all = np.zeros((1, CONDW), np.float32)

    for f in range(NFLOWS):
        for i in range(2):
            k = 2 * f + i
            sw0 = np.asarray(P['sw0'][f, i]); tw0 = np.asarray(P['tw0'][f, i])
            # layer0 x-side (rows 0..HALF) packed side-by-side [s | t]
            cw[k, 0:HALF, 0:HC] = sw0[:HALF]
            cw[k, 0:HALF, HC:FW] = tw0[:HALF]
            # layer0 cond-side + biases -> global condition matrix (folded later)
            w0c_all[:, k * FW:k * FW + HC] = sw0[HALF:]
            w0c_all[:, k * FW + HC:(k + 1) * FW] = tw0[HALF:]
            b0_all[:, k * FW:k * FW + HC] = np.asarray(P['sb0'][f, i])
            b0_all[:, k * FW + HC:(k + 1) * FW] = np.asarray(P['tb0'][f, i])
            # layers 1/2 block-diagonal
            r1 = HALF
            cw[k, r1:r1 + HC, 0:HC] = np.asarray(P['sw1'][f, i])
            cw[k, r1 + HC:r1 + FW, HC:FW] = np.asarray(P['tw1'][f, i])
            r2 = HALF + FW
            cw[k, r2:r2 + HC, 0:HC] = np.asarray(P['sw2'][f, i])
            cw[k, r2 + HC:r2 + FW, HC:FW] = np.asarray(P['tw2'][f, i])
            # layer3 block-diagonal into C output columns: [s(HALF) | t(HALF)]
            r3 = HALF + 2 * FW
            cw[k, r3:r3 + HC, 0:HALF] = np.asarray(P['sw3'][f, i])
            cw[k, r3 + HC:r3 + FW, HALF:C] = np.asarray(P['tw3'][f, i])
            # biases for layers 1/2/3
            cb[k, 0, 0:HC] = np.asarray(P['sb1'][f, i])[0]
            cb[k, 0, HC:FW] = np.asarray(P['tb1'][f, i])[0]
            cb[k, 0, FW:FW + HC] = np.asarray(P['sb2'][f, i])[0]
            cb[k, 0, FW + HC:2 * FW] = np.asarray(P['tb2'][f, i])[0]
            cb[k, 0, 2 * FW:2 * FW + HALF] = np.asarray(P['sb3'][f, i])[0]
            cb[k, 0, 2 * FW + HALF:2 * FW + C] = np.asarray(P['tb3'][f, i])[0]

    # fold the embedder's last (linear) layer into the condition matrix:
    #   hc @ Wc + b0  =  he2 @ (ew3 @ Wc) + (eb3 @ Wc + b0)
    ew3 = np.asarray(P['ew3']); eb3 = np.asarray(P['eb3'])
    wc_fold = ew3 @ w0c_all                       # (HE, CONDW)
    bc_fold = eb3 @ w0c_all + b0_all              # (1, CONDW)
    cond_fold = np.concatenate([wc_fold, bc_fold], axis=0)     # (HE+1, CONDW)

    # embedder layers 0..2: rows 0..HE-1 weight (layer0 uses rows 0..COND-1), row HE bias
    emb = np.zeros((3, HE + 1, HE), np.float32)
    emb[0, 0:COND, :] = np.asarray(P['ew0']); emb[0, HE, :] = np.asarray(P['eb0'])[0]
    emb[1, 0:HE, :] = np.asarray(P['ew1']);   emb[1, HE, :] = np.asarray(P['eb1'])[0]
    emb[2, 0:HE, :] = np.asarray(P['ew2']);   emb[2, HE, :] = np.asarray(P['eb2'])[0]

    # per-flow pack: rows 0..C-1 permutation matrix, row C loc, row C+1 scale,
    # row C+2 holds the hoisted total ActNorm logdet constant at [0, C+2, 0]
    ap = np.zeros((NFLOWS, C + 3, C), np.float32)
    an_loc = np.asarray(P['an_loc']); an_scale = np.asarray(P['an_scale'])
    for f in range(NFLOWS):
        ap[f, 0:C, :] = np.asarray(P['perm'][f])
        ap[f, C, :] = an_loc[f, 0]
        ap[f, C + 1, :] = an_scale[f, 0]
    ap[0, C + 2, 0] = float(np.sum(np.log(np.abs(an_scale))))

    return {'emb': jnp.asarray(emb), 'cond_fold': jnp.asarray(cond_fold),
            'cw': jnp.asarray(cw), 'cb': jnp.asarray(cb), 'ap': jnp.asarray(ap)}


# ----------------------------- pure-JAX reference -----------------------------
def ref_forward(x, c, P):
    x2 = x.reshape(x.shape[0], -1).astype(jnp.float32)
    c2 = c.reshape(c.shape[0], -1).astype(jnp.float32)

    hc = _lrelu(c2 @ P['ew0'] + P['eb0'])
    hc = _lrelu(hc @ P['ew1'] + P['eb1'])
    hc = _lrelu(hc @ P['ew2'] + P['eb2'])
    hc = hc @ P['ew3'] + P['eb3']

    def mlp(x0, f, i, pre):
        z = jnp.concatenate([x0, hc], axis=1)
        z = _lrelu(z @ P[pre + 'w0'][f, i] + P[pre + 'b0'][f, i])
        z = _lrelu(z @ P[pre + 'w1'][f, i] + P[pre + 'b1'][f, i])
        z = _lrelu(z @ P[pre + 'w2'][f, i] + P[pre + 'b2'][f, i])
        z = z @ P[pre + 'w3'][f, i] + P[pre + 'b3'][f, i]
        return jnp.tanh(z) if pre == 's' else z

    h = x2
    ld = jnp.zeros((x2.shape[0],), jnp.float32)
    for f in range(NFLOWS):
        scale, loc = P['an_scale'][f], P['an_loc'][f]
        h = scale * (h + loc)
        ld = ld + jnp.sum(jnp.log(jnp.abs(scale)))
        for i in range(2):
            if i % 2 != 0:
                h = jnp.concatenate([h[:, HALF:], h[:, :HALF]], axis=1)
            x0, x1 = h[:, :HALF], h[:, HALF:]
            s = mlp(x0, f, i, 's')
            t = mlp(x0, f, i, 't')
            x1 = x1 * jnp.exp(s) + t
            h = jnp.concatenate([x0, x1], axis=1)
            ld = ld + jnp.sum(s, axis=1)
        h = h @ P['perm'][f]
    return h.reshape(x.shape), ld


# ------------------------------------ main ------------------------------------
if __name__ == "__main__":
    key = jax.random.PRNGKey(0)
    kx, kc, kp = jax.random.split(key, 3)

    # first-stage latent x: (B, C, 1, 1) NCHW; condition latent c: (B, COND, 1, 1)
    x = jax.random.normal(kx, (B, C, 1, 1), jnp.float32)
    c = jax.random.normal(kc, (B, COND, 1, 1), jnp.float32)
    params = init_params(kp)
    packed = pack_params(params)

    zz, logdet = flow_forward(x, c, packed)
    jax.block_until_ready((zz, logdet))

    zz_ref, ld_ref = ref_forward(x, c, params)
    assert zz.shape == (B, C, 1, 1) and logdet.shape == (B,)
    assert jnp.allclose(zz, zz_ref, atol=2e-3, rtol=2e-3), "zz mismatch vs reference"
    assert jnp.allclose(logdet, ld_ref, atol=2e-3, rtol=2e-3), "logdet mismatch vs reference"

    print("KERNEL_OK")
</pallas_src>

<mosaic_0001>
module attributes {stable_mosaic.version = 11 : i64} {
  func.func @_flow_kernel(%arg0: memref<2x16xf32, #tpu.memory_space<vmem>>, %arg1: memref<2x16xf32, #tpu.memory_space<vmem>>, %arg2: memref<3x33x32xf32, #tpu.memory_space<vmem>>, %arg3: memref<33x512xf32, #tpu.memory_space<vmem>>, %arg4: memref<8x200x64xf32, #tpu.memory_space<vmem>>, %arg5: memref<8x1x144xf32, #tpu.memory_space<vmem>>, %arg6: memref<4x19x16xf32, #tpu.memory_space<vmem>>, %arg7: memref<2x17xf32, #tpu.memory_space<vmem>>) attributes {dimension_semantics = [], scalar_prefetch = 0 : i64, scratch_operands = 0 : i64, tpu.core_type = #tpu.core_type<tc>} {
    %c0 = arith.constant 0 : index
    %c0_0 = arith.constant 0 : index
    %0 = vector.load %arg0[%c0, %c0_0] : memref<2x16xf32, #tpu.memory_space<vmem>>, vector<2x16xf32>
    %c0_1 = arith.constant 0 : index
    %c0_2 = arith.constant 0 : index
    %1 = vector.load %arg1[%c0_1, %c0_2] : memref<2x16xf32, #tpu.memory_space<vmem>>, vector<2x16xf32>
    %c0_3 = arith.constant 0 : index
    %c0_4 = arith.constant 0 : index
    %c0_5 = arith.constant 0 : index
    %2 = vector.load %arg2[%c0_3, %c0_4, %c0_5] : memref<3x33x32xf32, #tpu.memory_space<vmem>>, vector<1x16x32xf32>
    %3 = vector.shape_cast %2 : vector<1x16x32xf32> to vector<16x32xf32>
    %cst = arith.constant dense<0.000000e+00> : vector<2x32xf32>
    %4 = tpu.matmul %1, %3, %cst {dimension_numbers = #tpu.dot_dimension_numbers<[1], [0], [0], [1], [0, 0, 1, 1], [], []>} : vector<2x16xf32>, vector<16x32xf32>, vector<2x32xf32> -> vector<2x32xf32>
    %c0_6 = arith.constant 0 : index
    %c32 = arith.constant 32 : index
    %c0_7 = arith.constant 0 : index
    %5 = vector.load %arg2[%c0_6, %c32, %c0_7] : memref<3x33x32xf32, #tpu.memory_space<vmem>>, vector<1x1x32xf32>
    %6 = vector.shape_cast %5 : vector<1x1x32xf32> to vector<1x32xf32>
    %7 = vector.broadcast %6 : vector<1x32xf32> to vector<2x32xf32>
    %8 = arith.addf %4, %7 : vector<2x32xf32>
    %cst_8 = arith.constant 0.000000e+00 : f32
    %9 = vector.broadcast %cst_8 : f32 to vector<2x32xf32>
    %10 = arith.cmpf oge, %8, %9 : vector<2x32xf32>
    %cst_9 = arith.constant 0.00999999977 : f32
    %11 = vector.broadcast %cst_9 : f32 to vector<2x32xf32>
    %12 = arith.mulf %11, %8 : vector<2x32xf32>
    %13 = arith.select %10, %8, %12 : vector<2x32xi1>, vector<2x32xf32>
    %c1 = arith.constant 1 : index
    %c0_10 = arith.constant 0 : index
    %c0_11 = arith.constant 0 : index
    %14 = vector.load %arg2[%c1, %c0_10, %c0_11] : memref<3x33x32xf32, #tpu.memory_space<vmem>>, vector<1x32x32xf32>
    %15 = vector.shape_cast %14 : vector<1x32x32xf32> to vector<32x32xf32>
    %cst_12 = arith.constant dense<0.000000e+00> : vector<2x32xf32>
    %16 = tpu.matmul %13, %15, %cst_12 {dimension_numbers = #tpu.dot_dimension_numbers<[1], [0], [0], [1], [0, 0, 1, 1], [], []>} : vector<2x32xf32>, vector<32x32xf32>, vector<2x32xf32> -> vector<2x32xf32>
    %c1_13 = arith.constant 1 : index
    %c32_14 = arith.constant 32 : index
    %c0_15 = arith.constant 0 : index
    %17 = vector.load %arg2[%c1_13, %c32_14, %c0_15] : memref<3x33x32xf32, #tpu.memory_space<vmem>>, vector<1x1x32xf32>
    %18 = vector.shape_cast %17 : vector<1x1x32xf32> to vector<1x32xf32>
    %19 = vector.broadcast %18 : vector<1x32xf32> to vector<2x32xf32>
    %20 = arith.addf %16, %19 : vector<2x32xf32>
    %cst_16 = arith.constant 0.000000e+00 : f32
    %21 = vector.broadcast %cst_16 : f32 to vector<2x32xf32>
    %22 = arith.cmpf oge, %20, %21 : vector<2x32xf32>
    %cst_17 = arith.constant 0.00999999977 : f32
    %23 = vector.broadcast %cst_17 : f32 to vector<2x32xf32>
    %24 = arith.mulf %23, %20 : vector<2x32xf32>
    %25 = arith.select %22, %20, %24 : vector<2x32xi1>, vector<2x32xf32>
    %c2 = arith.constant 2 : index
    %c0_18 = arith.constant 0 : index
    %c0_19 = arith.constant 0 : index
    %26 = vector.load %arg2[%c2, %c0_18, %c0_19] : memref<3x33x32xf32, #tpu.memory_space<vmem>>, vector<1x32x32xf32>
    %27 = vector.shape_cast %26 : vector<1x32x32xf32> to vector<32x32xf32>
    %cst_20 = arith.constant dense<0.000000e+00> : vector<2x32xf32>
    %28 = tpu.matmul %25, %27, %cst_20 {dimension_numbers = #tpu.dot_dimension_numbers<[1], [0], [0], [1], [0, 0, 1, 1], [], []>} : vector<2x32xf32>, vector<32x32xf32>, vector<2x32xf32> -> vector<2x32xf32>
    %c2_21 = arith.constant 2 : index
    %c32_22 = arith.constant 32 : index
    %c0_23 = arith.constant 0 : index
    %29 = vector.load %arg2[%c2_21, %c32_22, %c0_23] : memref<3x33x32xf32, #tpu.memory_space<vmem>>, vector<1x1x32xf32>
    %30 = vector.shape_cast %29 : vector<1x1x32xf32> to vector<1x32xf32>
    %31 = vector.broadcast %30 : vector<1x32xf32> to vector<2x32xf32>
    %32 = arith.addf %28, %31 : vector<2x32xf32>
    %cst_24 = arith.constant 0.000000e+00 : f32
    %33 = vector.broadcast %cst_24 : f32 to vector<2x32xf32>
    %34 = arith.cmpf oge, %32, %33 : vector<2x32xf32>
    %cst_25 = arith.constant 0.00999999977 : f32
    %35 = vector.broadcast %cst_25 : f32 to vector<2x32xf32>
    %36 = arith.mulf %35, %32 : vector<2x32xf32>
    %37 = arith.select %34, %32, %36 : vector<2x32xi1>, vector<2x32xf32>
    %c0_26 = arith.constant 0 : index
    %c0_27 = arith.constant 0 : index
    %38 = vector.load %arg3[%c0_26, %c0_27] : memref<33x512xf32, #tpu.memory_space<vmem>>, vector<32x512xf32>
    %cst_28 = arith.constant dense<0.000000e+00> : vector<2x512xf32>
    %39 = tpu.matmul %37, %38, %cst_28 {dimension_numbers = #tpu.dot_dimension_numbers<[1], [0], [0], [1], [0, 0, 1, 1], [], []>} : vector<2x32xf32>, vector<32x512xf32>, vector<2x512xf32> -> vector<2x512xf32>
    %c32_29 = arith.constant 32 : index
    %c0_30 = arith.constant 0 : index
    %40 = vector.load %arg3[%c32_29, %c0_30] : memref<33x512xf32, #tpu.memory_space<vmem>>, vector<1x512xf32>
    %41 = vector.broadcast %40 : vector<1x512xf32> to vector<2x512xf32>
    %42 = arith.addf %39, %41 : vector<2x512xf32>
    %cst_31 = arith.constant 0.000000e+00 : f32
    %43 = vector.broadcast %cst_31 : f32 to vector<2x1xf32>
    %c0_32 = arith.constant 0 : index
    %c18 = arith.constant 18 : index
    %c0_33 = arith.constant 0 : index
    %44 = vector.load %arg6[%c0_32, %c18, %c0_33] : memref<4x19x16xf32, #tpu.memory_space<vmem>>, vector<1x1x1xf32>
    %45 = vector.shape_cast %44 : vector<1x1x1xf32> to vector<1x1xf32>
    %46 = vector.broadcast %45 : vector<1x1xf32> to vector<2x1xf32>
    %47 = arith.addf %43, %46 : vector<2x1xf32>
    %c0_34 = arith.constant 0 : index
    %c16 = arith.constant 16 : index
    %c0_35 = arith.constant 0 : index
    %48 = vector.load %arg6[%c0_34, %c16, %c0_35] : memref<4x19x16xf32, #tpu.memory_space<vmem>>, vector<1x1x16xf32>
    %49 = vector.shape_cast %48 : vector<1x1x16xf32> to vector<1x16xf32>
    %c0_36 = arith.constant 0 : index
    %c17 = arith.constant 17 : index
    %c0_37 = arith.constant 0 : index
    %50 = vector.load %arg6[%c0_36, %c17, %c0_37] : memref<4x19x16xf32, #tpu.memory_space<vmem>>, vector<1x1x16xf32>
    %51 = vector.shape_cast %50 : vector<1x1x16xf32> to vector<1x16xf32>
    %52 = vector.broadcast %49 : vector<1x16xf32> to vector<2x16xf32>
    %53 = arith.addf %0, %52 : vector<2x16xf32>
    %54 = vector.broadcast %51 : vector<1x16xf32> to vector<2x16xf32>
    %55 = arith.mulf %54, %53 : vector<2x16xf32>
    %56 = vector.extract_strided_slice %55 {offsets = [0, 0], sizes = [2, 8], strides = [1, 1]} : vector<2x16xf32> to vector<2x8xf32>
    %57 = vector.extract_strided_slice %55 {offsets = [0, 8], sizes = [2, 8], strides = [1, 1]} : vector<2x16xf32> to vector<2x8xf32>
    %c0_38 = arith.constant 0 : index
    %c0_39 = arith.constant 0 : index
    %c0_40 = arith.constant 0 : index
    %58 = vector.load %arg4[%c0_38, %c0_39, %c0_40] : memref<8x200x64xf32, #tpu.memory_space<vmem>>, vector<1x8x64xf32>
    %59 = vector.shape_cast %58 : vector<1x8x64xf32> to vector<8x64xf32>
    %cst_41 = arith.constant dense<0.000000e+00> : vector<2x64xf32>
    %60 = tpu.matmul %56, %59, %cst_41 {dimension_numbers = #tpu.dot_dimension_numbers<[1], [0], [0], [1], [0, 0, 1, 1], [], []>} : vector<2x8xf32>, vector<8x64xf32>, vector<2x64xf32> -> vector<2x64xf32>
    %61 = vector.extract_strided_slice %42 {offsets = [0, 0], sizes = [2, 64], strides = [1, 1]} : vector<2x512xf32> to vector<2x64xf32>
    %62 = arith.addf %60, %61 : vector<2x64xf32>
    %cst_42 = arith.constant 0.000000e+00 : f32
    %63 = vector.broadcast %cst_42 : f32 to vector<2x64xf32>
    %64 = arith.cmpf oge, %62, %63 : vector<2x64xf32>
    %cst_43 = arith.constant 0.00999999977 : f32
    %65 = vector.broadcast %cst_43 : f32 to vector<2x64xf32>
    %66 = arith.mulf %65, %62 : vector<2x64xf32>
    %67 = arith.select %64, %62, %66 : vector<2x64xi1>, vector<2x64xf32>
    %c0_44 = arith.constant 0 : index
    %c8 = arith.constant 8 : index
    %c0_45 = arith.constant 0 : index
    %68 = vector.load %arg4[%c0_44, %c8, %c0_45] : memref<8x200x64xf32, #tpu.memory_space<vmem>>, vector<1x64x64xf32>
    %69 = vector.shape_cast %68 : vector<1x64x64xf32> to vector<64x64xf32>
    %cst_46 = arith.constant dense<0.000000e+00> : vector<2x64xf32>
    %70 = tpu.matmul %67, %69, %cst_46 {dimension_numbers = #tpu.dot_dimension_numbers<[1], [0], [0], [1], [0, 0, 1, 1], [], []>} : vector<2x64xf32>, vector<64x64xf32>, vector<2x64xf32> -> vector<2x64xf32>
    %c0_47 = arith.constant 0 : index
    %c0_48 = arith.constant 0 : index
    %c0_49 = arith.constant 0 : index
    %71 = vector.load %arg5[%c0_47, %c0_48, %c0_49] : memref<8x1x144xf32, #tpu.memory_space<vmem>>, vector<1x1x64xf32>
    %72 = vector.shape_cast %71 : vector<1x1x64xf32> to vector<1x64xf32>
    %73 = vector.broadcast %72 : vector<1x64xf32> to vector<2x64xf32>
    %74 = arith.addf %70, %73 : vector<2x64xf32>
    %cst_50 = arith.constant 0.000000e+00 : f32
    %75 = vector.broadcast %cst_50 : f32 to vector<2x64xf32>
    %76 = arith.cmpf oge, %74, %75 : vector<2x64xf32>
    %cst_51 = arith.constant 0.00999999977 : f32
    %77 = vector.broadcast %cst_51 : f32 to vector<2x64xf32>
    %78 = arith.mulf %77, %74 : vector<2x64xf32>
    %79 = arith.select %76, %74, %78 : vector<2x64xi1>, vector<2x64xf32>
    %c0_52 = arith.constant 0 : index
    %c72 = arith.constant 72 : index
    %c0_53 = arith.constant 0 : index
    %80 = vector.load %arg4[%c0_52, %c72, %c0_53] : memref<8x200x64xf32, #tpu.memory_space<vmem>>, vector<1x64x64xf32>
    %81 = vector.shape_cast %80 : vector<1x64x64xf32> to vector<64x64xf32>
    %cst_54 = arith.constant dense<0.000000e+00> : vector<2x64xf32>
    %82 = tpu.matmul %79, %81, %cst_54 {dimension_numbers = #tpu.dot_dimension_numbers<[1], [0], [0], [1], [0, 0, 1, 1], [], []>} : vector<2x64xf32>, vector<64x64xf32>, vector<2x64xf32> -> vector<2x64xf32>
    %c0_55 = arith.constant 0 : index
    %c0_56 = arith.constant 0 : index
    %c64 = arith.constant 64 : index
    %83 = vector.load %arg5[%c0_55, %c0_56, %c64] : memref<8x1x144xf32, #tpu.memory_space<vmem>>, vector<1x1x64xf32>
    %84 = vector.shape_cast %83 : vector<1x1x64xf32> to vector<1x64xf32>
    %85 = vector.broadcast %84 : vector<1x64xf32> to vector<2x64xf32>
    %86 = arith.addf %82, %85 : vector<2x64xf32>
    %cst_57 = arith.constant 0.000000e+00 : f32
    %87 = vector.broadcast %cst_57 : f32 to vector<2x64xf32>
    %88 = arith.cmpf oge, %86, %87 : vector<2x64xf32>
    %cst_58 = arith.constant 0.00999999977 : f32
    %89 = vector.broadcast %cst_58 : f32 to vector<2x64xf32>
    %90 = arith.mulf %89, %86 : vector<2x64xf32>
    %91 = arith.select %88, %86, %90 : vector<2x64xi1>, vector<2x64xf32>
    %c0_59 = arith.constant 0 : index
    %c136 = arith.constant 136 : index
    %c0_60 = arith.constant 0 : index
    %92 = vector.load %arg4[%c0_59, %c136, %c0_60] : memref<8x200x64xf32, #tpu.memory_space<vmem>>, vector<1x64x16xf32>
    %93 = vector.shape_cast %92 : vector<1x64x16xf32> to vector<64x16xf32>
    %cst_61 = arith.constant dense<0.000000e+00> : vector<2x16xf32>
    %94 = tpu.matmul %91, %93, %cst_61 {dimension_numbers = #tpu.dot_dimension_numbers<[1], [0], [0], [1], [0, 0, 1, 1], [], []>} : vector<2x64xf32>, vector<64x16xf32>, vector<2x16xf32> -> vector<2x16xf32>
    %c0_62 = arith.constant 0 : index
    %c0_63 = arith.constant 0 : index
    %c128 = arith.constant 128 : index
    %95 = vector.load %arg5[%c0_62, %c0_63, %c128] : memref<8x1x144xf32, #tpu.memory_space<vmem>>, vector<1x1x16xf32>
    %96 = vector.shape_cast %95 : vector<1x1x16xf32> to vector<1x16xf32>
    %97 = vector.broadcast %96 : vector<1x16xf32> to vector<2x16xf32>
    %98 = arith.addf %94, %97 : vector<2x16xf32>
    %99 = vector.extract_strided_slice %98 {offsets = [0, 0], sizes = [2, 8], strides = [1, 1]} : vector<2x16xf32> to vector<2x8xf32>
    %100 = math.tanh %99 : vector<2x8xf32>
    %101 = vector.extract_strided_slice %98 {offsets = [0, 8], sizes = [2, 8], strides = [1, 1]} : vector<2x16xf32> to vector<2x8xf32>
    %102 = math.exp %100 : vector<2x8xf32>
    %103 = arith.mulf %57, %102 : vector<2x8xf32>
    %104 = arith.addf %103, %101 : vector<2x8xf32>
    %cst_64 = arith.constant dense<0.000000e+00> : vector<2xf32>
    %105 = vector.multi_reduction <add>, %100, %cst_64 [1] : vector<2x8xf32> to vector<2xf32>
    %106 = vector.shape_cast %105 : vector<2xf32> to vector<2x1xf32>
    %107 = arith.addf %47, %106 : vector<2x1xf32>
    %c1_65 = arith.constant 1 : index
    %c0_66 = arith.constant 0 : index
    %c0_67 = arith.constant 0 : index
    %108 = vector.load %arg4[%c1_65, %c0_66, %c0_67] : memref<8x200x64xf32, #tpu.memory_space<vmem>>, vector<1x8x64xf32>
    %109 = vector.shape_cast %108 : vector<1x8x64xf32> to vector<8x64xf32>
    %cst_68 = arith.constant dense<0.000000e+00> : vector<2x64xf32>
    %110 = tpu.matmul %104, %109, %cst_68 {dimension_numbers = #tpu.dot_dimension_numbers<[1], [0], [0], [1], [0, 0, 1, 1], [], []>} : vector<2x8xf32>, vector<8x64xf32>, vector<2x64xf32> -> vector<2x64xf32>
    %111 = vector.extract_strided_slice %42 {offsets = [0, 64], sizes = [2, 64], strides = [1, 1]} : vector<2x512xf32> to vector<2x64xf32>
    %112 = arith.addf %110, %111 : vector<2x64xf32>
    %cst_69 = arith.constant 0.000000e+00 : f32
    %113 = vector.broadcast %cst_69 : f32 to vector<2x64xf32>
    %114 = arith.cmpf oge, %112, %113 : vector<2x64xf32>
    %cst_70 = arith.constant 0.00999999977 : f32
    %115 = vector.broadcast %cst_70 : f32 to vector<2x64xf32>
    %116 = arith.mulf %115, %112 : vector<2x64xf32>
    %117 = arith.select %114, %112, %116 : vector<2x64xi1>, vector<2x64xf32>
    %c1_71 = arith.constant 1 : index
    %c8_72 = arith.constant 8 : index
    %c0_73 = arith.constant 0 : index
    %118 = vector.load %arg4[%c1_71, %c8_72, %c0_73] : memref<8x200x64xf32, #tpu.memory_space<vmem>>, vector<1x64x64xf32>
    %119 = vector.shape_cast %118 : vector<1x64x64xf32> to vector<64x64xf32>
    %cst_74 = arith.constant dense<0.000000e+00> : vector<2x64xf32>
    %120 = tpu.matmul %117, %119, %cst_74 {dimension_numbers = #tpu.dot_dimension_numbers<[1], [0], [0], [1], [0, 0, 1, 1], [], []>} : vector<2x64xf32>, vector<64x64xf32>, vector<2x64xf32> -> vector<2x64xf32>
    %c1_75 = arith.constant 1 : index
    %c0_76 = arith.constant 0 : index
    %c0_77 = arith.constant 0 : index
    %121 = vector.load %arg5[%c1_75, %c0_76, %c0_77] : memref<8x1x144xf32, #tpu.memory_space<vmem>>, vector<1x1x64xf32>
    %122 = vector.shape_cast %121 : vector<1x1x64xf32> to vector<1x64xf32>
    %123 = vector.broadcast %122 : vector<1x64xf32> to vector<2x64xf32>
    %124 = arith.addf %120, %123 : vector<2x64xf32>
    %cst_78 = arith.constant 0.000000e+00 : f32
    %125 = vector.broadcast %cst_78 : f32 to vector<2x64xf32>
    %126 = arith.cmpf oge, %124, %125 : vector<2x64xf32>
    %cst_79 = arith.constant 0.00999999977 : f32
    %127 = vector.broadcast %cst_79 : f32 to vector<2x64xf32>
    %128 = arith.mulf %127, %124 : vector<2x64xf32>
    %129 = arith.select %126, %124, %128 : vector<2x64xi1>, vector<2x64xf32>
    %c1_80 = arith.constant 1 : index
    %c72_81 = arith.constant 72 : index
    %c0_82 = arith.constant 0 : index
    %130 = vector.load %arg4[%c1_80, %c72_81, %c0_82] : memref<8x200x64xf32, #tpu.memory_space<vmem>>, vector<1x64x64xf32>
    %131 = vector.shape_cast %130 : vector<1x64x64xf32> to vector<64x64xf32>
    %cst_83 = arith.constant dense<0.000000e+00> : vector<2x64xf32>
    %132 = tpu.matmul %129, %131, %cst_83 {dimension_numbers = #tpu.dot_dimension_numbers<[1], [0], [0], [1], [0, 0, 1, 1], [], []>} : vector<2x64xf32>, vector<64x64xf32>, vector<2x64xf32> -> vector<2x64xf32>
    %c1_84 = arith.constant 1 : index
    %c0_85 = arith.constant 0 : index
    %c64_86 = arith.constant 64 : index
    %133 = vector.load %arg5[%c1_84, %c0_85, %c64_86] : memref<8x1x144xf32, #tpu.memory_space<vmem>>, vector<1x1x64xf32>
    %134 = vector.shape_cast %133 : vector<1x1x64xf32> to vector<1x64xf32>
    %135 = vector.broadcast %134 : vector<1x64xf32> to vector<2x64xf32>
    %136 = arith.addf %132, %135 : vector<2x64xf32>
    %cst_87 = arith.constant 0.000000e+00 : f32
    %137 = vector.broadcast %cst_87 : f32 to vector<2x64xf32>
    %138 = arith.cmpf oge, %136, %137 : vector<2x64xf32>
    %cst_88 = arith.constant 0.00999999977 : f32
    %139 = vector.broadcast %cst_88 : f32 to vector<2x64xf32>
    %140 = arith.mulf %139, %136 : vector<2x64xf32>
    %141 = arith.select %138, %136, %140 : vector<2x64xi1>, vector<2x64xf32>
    %c1_89 = arith.constant 1 : index
    %c136_90 = arith.constant 136 : index
    %c0_91 = arith.constant 0 : index
    %142 = vector.load %arg4[%c1_89, %c136_90, %c0_91] : memref<8x200x64xf32, #tpu.memory_space<vmem>>, vector<1x64x16xf32>
    %143 = vector.shape_cast %142 : vector<1x64x16xf32> to vector<64x16xf32>
    %cst_92 = arith.constant dense<0.000000e+00> : vector<2x16xf32>
    %144 = tpu.matmul %141, %143, %cst_92 {dimension_numbers = #tpu.dot_dimension_numbers<[1], [0], [0], [1], [0, 0, 1, 1], [], []>} : vector<2x64xf32>, vector<64x16xf32>, vector<2x16xf32> -> vector<2x16xf32>
    %c1_93 = arith.constant 1 : index
    %c0_94 = arith.constant 0 : index
    %c128_95 = arith.constant 128 : index
    %145 = vector.load %arg5[%c1_93, %c0_94, %c128_95] : memref<8x1x144xf32, #tpu.memory_space<vmem>>, vector<1x1x16xf32>
    %146 = vector.shape_cast %145 : vector<1x1x16xf32> to vector<1x16xf32>
    %147 = vector.broadcast %146 : vector<1x16xf32> to vector<2x16xf32>
    %148 = arith.addf %144, %147 : vector<2x16xf32>
    %149 = vector.extract_strided_slice %148 {offsets = [0, 0], sizes = [2, 8], strides = [1, 1]} : vector<2x16xf32> to vector<2x8xf32>
    %150 = math.tanh %149 : vector<2x8xf32>
    %151 = vector.extract_strided_slice %148 {offsets = [0, 8], sizes = [2, 8], strides = [1, 1]} : vector<2x16xf32> to vector<2x8xf32>
    %152 = math.exp %150 : vector<2x8xf32>
    %153 = arith.mulf %56, %152 : vector<2x8xf32>
    %154 = arith.addf %153, %151 : vector<2x8xf32>
    %cst_96 = arith.constant dense<0.000000e+00> : vector<2xf32>
    %155 = vector.multi_reduction <add>, %150, %cst_96 [1] : vector<2x8xf32> to vector<2xf32>
    %156 = vector.shape_cast %155 : vector<2xf32> to vector<2x1xf32>
    %157 = arith.addf %107, %156 : vector<2x1xf32>
    %158 = tpu.concatenate %104, %154 in 1 : vector<2x8xf32>, vector<2x8xf32> -> vector<2x16xf32>
    %c0_97 = arith.constant 0 : index
    %c0_98 = arith.constant 0 : index
    %c0_99 = arith.constant 0 : index
    %159 = vector.load %arg6[%c0_97, %c0_98, %c0_99] : memref<4x19x16xf32, #tpu.memory_space<vmem>>, vector<1x16x16xf32>
    %160 = vector.shape_cast %159 : vector<1x16x16xf32> to vector<16x16xf32>
    %cst_100 = arith.constant dense<0.000000e+00> : vector<2x16xf32>
    %161 = tpu.matmul %158, %160, %cst_100 {dimension_numbers = #tpu.dot_dimension_numbers<[1], [0], [0], [1], [0, 0, 1, 1], [], []>} : vector<2x16xf32>, vector<16x16xf32>, vector<2x16xf32> -> vector<2x16xf32>
    %c1_101 = arith.constant 1 : index
    %c16_102 = arith.constant 16 : index
    %c0_103 = arith.constant 0 : index
    %162 = vector.load %arg6[%c1_101, %c16_102, %c0_103] : memref<4x19x16xf32, #tpu.memory_space<vmem>>, vector<1x1x16xf32>
    %163 = vector.shape_cast %162 : vector<1x1x16xf32> to vector<1x16xf32>
    %c1_104 = arith.constant 1 : index
    %c17_105 = arith.constant 17 : index
    %c0_106 = arith.constant 0 : index
    %164 = vector.load %arg6[%c1_104, %c17_105, %c0_106] : memref<4x19x16xf32, #tpu.memory_space<vmem>>, vector<1x1x16xf32>
    %165 = vector.shape_cast %164 : vector<1x1x16xf32> to vector<1x16xf32>
    %166 = vector.broadcast %163 : vector<1x16xf32> to vector<2x16xf32>
    %167 = arith.addf %161, %166 : vector<2x16xf32>
    %168 = vector.broadcast %165 : vector<1x16xf32> to vector<2x16xf32>
    %169 = arith.mulf %168, %167 : vector<2x16xf32>
    %170 = vector.extract_strided_slice %169 {offsets = [0, 0], sizes = [2, 8], strides = [1, 1]} : vector<2x16xf32> to vector<2x8xf32>
    %171 = vector.extract_strided_slice %169 {offsets = [0, 8], sizes = [2, 8], strides = [1, 1]} : vector<2x16xf32> to vector<2x8xf32>
    %c2_107 = arith.constant 2 : index
    %c0_108 = arith.constant 0 : index
    %c0_109 = arith.constant 0 : index
    %172 = vector.load %arg4[%c2_107, %c0_108, %c0_109] : memref<8x200x64xf32, #tpu.memory_space<vmem>>, vector<1x8x64xf32>
    %173 = vector.shape_cast %172 : vector<1x8x64xf32> to vector<8x64xf32>
    %cst_110 = arith.constant dense<0.000000e+00> : vector<2x64xf32>
    %174 = tpu.matmul %170, %173, %cst_110 {dimension_numbers = #tpu.dot_dimension_numbers<[1], [0], [0], [1], [0, 0, 1, 1], [], []>} : vector<2x8xf32>, vector<8x64xf32>, vector<2x64xf32> -> vector<2x64xf32>
    %175 = vector.extract_strided_slice %42 {offsets = [0, 128], sizes = [2, 64], strides = [1, 1]} : vector<2x512xf32> to vector<2x64xf32>
    %176 = arith.addf %174, %175 : vector<2x64xf32>
    %cst_111 = arith.constant 0.000000e+00 : f32
    %177 = vector.broadcast %cst_111 : f32 to vector<2x64xf32>
    %178 = arith.cmpf oge, %176, %177 : vector<2x64xf32>
    %cst_112 = arith.constant 0.00999999977 : f32
    %179 = vector.broadcast %cst_112 : f32 to vector<2x64xf32>
    %180 = arith.mulf %179, %176 : vector<2x64xf32>
    %181 = arith.select %178, %176, %180 : vector<2x64xi1>, vector<2x64xf32>
    %c2_113 = arith.constant 2 : index
    %c8_114 = arith.constant 8 : index
    %c0_115 = arith.constant 0 : index
    %182 = vector.load %arg4[%c2_113, %c8_114, %c0_115] : memref<8x200x64xf32, #tpu.memory_space<vmem>>, vector<1x64x64xf32>
    %183 = vector.shape_cast %182 : vector<1x64x64xf32> to vector<64x64xf32>
    %cst_116 = arith.constant dense<0.000000e+00> : vector<2x64xf32>
    %184 = tpu.matmul %181, %183, %cst_116 {dimension_numbers = #tpu.dot_dimension_numbers<[1], [0], [0], [1], [0, 0, 1, 1], [], []>} : vector<2x64xf32>, vector<64x64xf32>, vector<2x64xf32> -> vector<2x64xf32>
    %c2_117 = arith.constant 2 : index
    %c0_118 = arith.constant 0 : index
    %c0_119 = arith.constant 0 : index
    %185 = vector.load %arg5[%c2_117, %c0_118, %c0_119] : memref<8x1x144xf32, #tpu.memory_space<vmem>>, vector<1x1x64xf32>
    %186 = vector.shape_cast %185 : vector<1x1x64xf32> to vector<1x64xf32>
    %187 = vector.broadcast %186 : vector<1x64xf32> to vector<2x64xf32>
    %188 = arith.addf %184, %187 : vector<2x64xf32>
    %cst_120 = arith.constant 0.000000e+00 : f32
    %189 = vector.broadcast %cst_120 : f32 to vector<2x64xf32>
    %190 = arith.cmpf oge, %188, %189 : vector<2x64xf32>
    %cst_121 = arith.constant 0.00999999977 : f32
    %191 = vector.broadcast %cst_121 : f32 to vector<2x64xf32>
    %192 = arith.mulf %191, %188 : vector<2x64xf32>
    %193 = arith.select %190, %188, %192 : vector<2x64xi1>, vector<2x64xf32>
    %c2_122 = arith.constant 2 : index
    %c72_123 = arith.constant 72 : index
    %c0_124 = arith.constant 0 : index
    %194 = vector.load %arg4[%c2_122, %c72_123, %c0_124] : memref<8x200x64xf32, #tpu.memory_space<vmem>>, vector<1x64x64xf32>
    %195 = vector.shape_cast %194 : vector<1x64x64xf32> to vector<64x64xf32>
    %cst_125 = arith.constant dense<0.000000e+00> : vector<2x64xf32>
    %196 = tpu.matmul %193, %195, %cst_125 {dimension_numbers = #tpu.dot_dimension_numbers<[1], [0], [0], [1], [0, 0, 1, 1], [], []>} : vector<2x64xf32>, vector<64x64xf32>, vector<2x64xf32> -> vector<2x64xf32>
    %c2_126 = arith.constant 2 : index
    %c0_127 = arith.constant 0 : index
    %c64_128 = arith.constant 64 : index
    %197 = vector.load %arg5[%c2_126, %c0_127, %c64_128] : memref<8x1x144xf32, #tpu.memory_space<vmem>>, vector<1x1x64xf32>
    %198 = vector.shape_cast %197 : vector<1x1x64xf32> to vector<1x64xf32>
    %199 = vector.broadcast %198 : vector<1x64xf32> to vector<2x64xf32>
    %200 = arith.addf %196, %199 : vector<2x64xf32>
    %cst_129 = arith.constant 0.000000e+00 : f32
    %201 = vector.broadcast %cst_129 : f32 to vector<2x64xf32>
    %202 = arith.cmpf oge, %200, %201 : vector<2x64xf32>
    %cst_130 = arith.constant 0.00999999977 : f32
    %203 = vector.broadcast %cst_130 : f32 to vector<2x64xf32>
    %204 = arith.mulf %203, %200 : vector<2x64xf32>
    %205 = arith.select %202, %200, %204 : vector<2x64xi1>, vector<2x64xf32>
    %c2_131 = arith.constant 2 : index
    %c136_132 = arith.constant 136 : index
    %c0_133 = arith.constant 0 : index
    %206 = vector.load %arg4[%c2_131, %c136_132, %c0_133] : memref<8x200x64xf32, #tpu.memory_space<vmem>>, vector<1x64x16xf32>
    %207 = vector.shape_cast %206 : vector<1x64x16xf32> to vector<64x16xf32>
    %cst_134 = arith.constant dense<0.000000e+00> : vector<2x16xf32>
    %208 = tpu.matmul %205, %207, %cst_134 {dimension_numbers = #tpu.dot_dimension_numbers<[1], [0], [0], [1], [0, 0, 1, 1], [], []>} : vector<2x64xf32>, vector<64x16xf32>, vector<2x16xf32> -> vector<2x16xf32>
    %c2_135 = arith.constant 2 : index
    %c0_136 = arith.constant 0 : index
    %c128_137 = arith.constant 128 : index
    %209 = vector.load %arg5[%c2_135, %c0_136, %c128_137] : memref<8x1x144xf32, #tpu.memory_space<vmem>>, vector<1x1x16xf32>
    %210 = vector.shape_cast %209 : vector<1x1x16xf32> to vector<1x16xf32>
    %211 = vector.broadcast %210 : vector<1x16xf32> to vector<2x16xf32>
    %212 = arith.addf %208, %211 : vector<2x16xf32>
    %213 = vector.extract_strided_slice %212 {offsets = [0, 0], sizes = [2, 8], strides = [1, 1]} : vector<2x16xf32> to vector<2x8xf32>
    %214 = math.tanh %213 : vector<2x8xf32>
    %215 = vector.extract_strided_slice %212 {offsets = [0, 8], sizes = [2, 8], strides = [1, 1]} : vector<2x16xf32> to vector<2x8xf32>
    %216 = math.exp %214 : vector<2x8xf32>
    %217 = arith.mulf %171, %216 : vector<2x8xf32>
    %218 = arith.addf %217, %215 : vector<2x8xf32>
    %cst_138 = arith.constant dense<0.000000e+00> : vector<2xf32>
    %219 = vector.multi_reduction <add>, %214, %cst_138 [1] : vector<2x8xf32> to vector<2xf32>
    %220 = vector.shape_cast %219 : vector<2xf32> to vector<2x1xf32>
    %221 = arith.addf %157, %220 : vector<2x1xf32>
    %c3 = arith.constant 3 : index
    %c0_139 = arith.constant 0 : index
    %c0_140 = arith.constant 0 : index
    %222 = vector.load %arg4[%c3, %c0_139, %c0_140] : memref<8x200x64xf32, #tpu.memory_space<vmem>>, vector<1x8x64xf32>
    %223 = vector.shape_cast %222 : vector<1x8x64xf32> to vector<8x64xf32>
    %cst_141 = arith.constant dense<0.000000e+00> : vector<2x64xf32>
    %224 = tpu.matmul %218, %223, %cst_141 {dimension_numbers = #tpu.dot_dimension_numbers<[1], [0], [0], [1], [0, 0, 1, 1], [], []>} : vector<2x8xf32>, vector<8x64xf32>, vector<2x64xf32> -> vector<2x64xf32>
    %225 = vector.extract_strided_slice %42 {offsets = [0, 192], sizes = [2, 64], strides = [1, 1]} : vector<2x512xf32> to vector<2x64xf32>
    %226 = arith.addf %224, %225 : vector<2x64xf32>
    %cst_142 = arith.constant 0.000000e+00 : f32
    %227 = vector.broadcast %cst_142 : f32 to vector<2x64xf32>
    %228 = arith.cmpf oge, %226, %227 : vector<2x64xf32>
    %cst_143 = arith.constant 0.00999999977 : f32
    %229 = vector.broadcast %cst_143 : f32 to vector<2x64xf32>
    %230 = arith.mulf %229, %226 : vector<2x64xf32>
    %231 = arith.select %228, %226, %230 : vector<2x64xi1>, vector<2x64xf32>
    %c3_144 = arith.constant 3 : index
    %c8_145 = arith.constant 8 : index
    %c0_146 = arith.constant 0 : index
    %232 = vector.load %arg4[%c3_144, %c8_145, %c0_146] : memref<8x200x64xf32, #tpu.memory_space<vmem>>, vector<1x64x64xf32>
    %233 = vector.shape_cast %232 : vector<1x64x64xf32> to vector<64x64xf32>
    %cst_147 = arith.constant dense<0.000000e+00> : vector<2x64xf32>
    %234 = tpu.matmul %231, %233, %cst_147 {dimension_numbers = #tpu.dot_dimension_numbers<[1], [0], [0], [1], [0, 0, 1, 1], [], []>} : vector<2x64xf32>, vector<64x64xf32>, vector<2x64xf32> -> vector<2x64xf32>
    %c3_148 = arith.constant 3 : index
    %c0_149 = arith.constant 0 : index
    %c0_150 = arith.constant 0 : index
    %235 = vector.load %arg5[%c3_148, %c0_149, %c0_150] : memref<8x1x144xf32, #tpu.memory_space<vmem>>, vector<1x1x64xf32>
    %236 = vector.shape_cast %235 : vector<1x1x64xf32> to vector<1x64xf32>
    %237 = vector.broadcast %236 : vector<1x64xf32> to vector<2x64xf32>
    %238 = arith.addf %234, %237 : vector<2x64xf32>
    %cst_151 = arith.constant 0.000000e+00 : f32
    %239 = vector.broadcast %cst_151 : f32 to vector<2x64xf32>
    %240 = arith.cmpf oge, %238, %239 : vector<2x64xf32>
    %cst_152 = arith.constant 0.00999999977 : f32
    %241 = vector.broadcast %cst_152 : f32 to vector<2x64xf32>
    %242 = arith.mulf %241, %238 : vector<2x64xf32>
    %243 = arith.select %240, %238, %242 : vector<2x64xi1>, vector<2x64xf32>
    %c3_153 = arith.constant 3 : index
    %c72_154 = arith.constant 72 : index
    %c0_155 = arith.constant 0 : index
    %244 = vector.load %arg4[%c3_153, %c72_154, %c0_155] : memref<8x200x64xf32, #tpu.memory_space<vmem>>, vector<1x64x64xf32>
    %245 = vector.shape_cast %244 : vector<1x64x64xf32> to vector<64x64xf32>
    %cst_156 = arith.constant dense<0.000000e+00> : vector<2x64xf32>
    %246 = tpu.matmul %243, %245, %cst_156 {dimension_numbers = #tpu.dot_dimension_numbers<[1], [0], [0], [1], [0, 0, 1, 1], [], []>} : vector<2x64xf32>, vector<64x64xf32>, vector<2x64xf32> -> vector<2x64xf32>
    %c3_157 = arith.constant 3 : index
    %c0_158 = arith.constant 0 : index
    %c64_159 = arith.constant 64 : index
    %247 = vector.load %arg5[%c3_157, %c0_158, %c64_159] : memref<8x1x144xf32, #tpu.memory_space<vmem>>, vector<1x1x64xf32>
    %248 = vector.shape_cast %247 : vector<1x1x64xf32> to vector<1x64xf32>
    %249 = vector.broadcast %248 : vector<1x64xf32> to vector<2x64xf32>
    %250 = arith.addf %246, %249 : vector<2x64xf32>
    %cst_160 = arith.constant 0.000000e+00 : f32
    %251 = vector.broadcast %cst_160 : f32 to vector<2x64xf32>
    %252 = arith.cmpf oge, %250, %251 : vector<2x64xf32>
    %cst_161 = arith.constant 0.00999999977 : f32
    %253 = vector.broadcast %cst_161 : f32 to vector<2x64xf32>
    %254 = arith.mulf %253, %250 : vector<2x64xf32>
    %255 = arith.select %252, %250, %254 : vector<2x64xi1>, vector<2x64xf32>
    %c3_162 = arith.constant 3 : index
    %c136_163 = arith.constant 136 : index
    %c0_164 = arith.constant 0 : index
    %256 = vector.load %arg4[%c3_162, %c136_163, %c0_164] : memref<8x200x64xf32, #tpu.memory_space<vmem>>, vector<1x64x16xf32>
    %257 = vector.shape_cast %256 : vector<1x64x16xf32> to vector<64x16xf32>
    %cst_165 = arith.constant dense<0.000000e+00> : vector<2x16xf32>
    %258 = tpu.matmul %255, %257, %cst_165 {dimension_numbers = #tpu.dot_dimension_numbers<[1], [0], [0], [1], [0, 0, 1, 1], [], []>} : vector<2x64xf32>, vector<64x16xf32>, vector<2x16xf32> -> vector<2x16xf32>
    %c3_166 = arith.constant 3 : index
    %c0_167 = arith.constant 0 : index
    %c128_168 = arith.constant 128 : index
    %259 = vector.load %arg5[%c3_166, %c0_167, %c128_168] : memref<8x1x144xf32, #tpu.memory_space<vmem>>, vector<1x1x16xf32>
    %260 = vector.shape_cast %259 : vector<1x1x16xf32> to vector<1x16xf32>
    %261 = vector.broadcast %260 : vector<1x16xf32> to vector<2x16xf32>
    %262 = arith.addf %258, %261 : vector<2x16xf32>
    %263 = vector.extract_strided_slice %262 {offsets = [0, 0], sizes = [2, 8], strides = [1, 1]} : vector<2x16xf32> to vector<2x8xf32>
    %264 = math.tanh %263 : vector<2x8xf32>
    %265 = vector.extract_strided_slice %262 {offsets = [0, 8], sizes = [2, 8], strides = [1, 1]} : vector<2x16xf32> to vector<2x8xf32>
    %266 = math.exp %264 : vector<2x8xf32>
    %267 = arith.mulf %170, %266 : vector<2x8xf32>
    %268 = arith.addf %267, %265 : vector<2x8xf32>
    %cst_169 = arith.constant dense<0.000000e+00> : vector<2xf32>
    %269 = vector.multi_reduction <add>, %264, %cst_169 [1] : vector<2x8xf32> to vector<2xf32>
    %270 = vector.shape_cast %269 : vector<2xf32> to vector<2x1xf32>
    %271 = arith.addf %221, %270 : vector<2x1xf32>
    %272 = tpu.concatenate %218, %268 in 1 : vector<2x8xf32>, vector<2x8xf32> -> vector<2x16xf32>
    %c1_170 = arith.constant 1 : index
    %c0_171 = arith.constant 0 : index
    %c0_172 = arith.constant 0 : index
    %273 = vector.load %arg6[%c1_170, %c0_171, %c0_172] : memref<4x19x16xf32, #tpu.memory_space<vmem>>, vector<1x16x16xf32>
    %274 = vector.shape_cast %273 : vector<1x16x16xf32> to vector<16x16xf32>
    %cst_173 = arith.constant dense<0.000000e+00> : vector<2x16xf32>
    %275 = tpu.matmul %272, %274, %cst_173 {dimension_numbers = #tpu.dot_dimension_numbers<[1], [0], [0], [1], [0, 0, 1, 1], [], []>} : vector<2x16xf32>, vector<16x16xf32>, vector<2x16xf32> -> vector<2x16xf32>
    %c2_174 = arith.constant 2 : index
    %c16_175 = arith.constant 16 : index
    %c0_176 = arith.constant 0 : index
    %276 = vector.load %arg6[%c2_174, %c16_175, %c0_176] : memref<4x19x16xf32, #tpu.memory_space<vmem>>, vector<1x1x16xf32>
    %277 = vector.shape_cast %276 : vector<1x1x16xf32> to vector<1x16xf32>
    %c2_177 = arith.constant 2 : index
    %c17_178 = arith.constant 17 : index
    %c0_179 = arith.constant 0 : index
    %278 = vector.load %arg6[%c2_177, %c17_178, %c0_179] : memref<4x19x16xf32, #tpu.memory_space<vmem>>, vector<1x1x16xf32>
    %279 = vector.shape_cast %278 : vector<1x1x16xf32> to vector<1x16xf32>
    %280 = vector.broadcast %277 : vector<1x16xf32> to vector<2x16xf32>
    %281 = arith.addf %275, %280 : vector<2x16xf32>
    %282 = vector.broadcast %279 : vector<1x16xf32> to vector<2x16xf32>
    %283 = arith.mulf %282, %281 : vector<2x16xf32>
    %284 = vector.extract_strided_slice %283 {offsets = [0, 0], sizes = [2, 8], strides = [1, 1]} : vector<2x16xf32> to vector<2x8xf32>
    %285 = vector.extract_strided_slice %283 {offsets = [0, 8], sizes = [2, 8], strides = [1, 1]} : vector<2x16xf32> to vector<2x8xf32>
    %c4 = arith.constant 4 : index
    %c0_180 = arith.constant 0 : index
    %c0_181 = arith.constant 0 : index
    %286 = vector.load %arg4[%c4, %c0_180, %c0_181] : memref<8x200x64xf32, #tpu.memory_space<vmem>>, vector<1x8x64xf32>
    %287 = vector.shape_cast %286 : vector<1x8x64xf32> to vector<8x64xf32>
    %cst_182 = arith.constant dense<0.000000e+00> : vector<2x64xf32>
    %288 = tpu.matmul %284, %287, %cst_182 {dimension_numbers = #tpu.dot_dimension_numbers<[1], [0], [0], [1], [0, 0, 1, 1], [], []>} : vector<2x8xf32>, vector<8x64xf32>, vector<2x64xf32> -> vector<2x64xf32>
    %289 = vector.extract_strided_slice %42 {offsets = [0, 256], sizes = [2, 64], strides = [1, 1]} : vector<2x512xf32> to vector<2x64xf32>
    %290 = arith.addf %288, %289 : vector<2x64xf32>
    %cst_183 = arith.constant 0.000000e+00 : f32
    %291 = vector.broadcast %cst_183 : f32 to vector<2x64xf32>
    %292 = arith.cmpf oge, %290, %291 : vector<2x64xf32>
    %cst_184 = arith.constant 0.00999999977 : f32
    %293 = vector.broadcast %cst_184 : f32 to vector<2x64xf32>
    %294 = arith.mulf %293, %290 : vector<2x64xf32>
    %295 = arith.select %292, %290, %294 : vector<2x64xi1>, vector<2x64xf32>
    %c4_185 = arith.constant 4 : index
    %c8_186 = arith.constant 8 : index
    %c0_187 = arith.constant 0 : index
    %296 = vector.load %arg4[%c4_185, %c8_186, %c0_187] : memref<8x200x64xf32, #tpu.memory_space<vmem>>, vector<1x64x64xf32>
    %297 = vector.shape_cast %296 : vector<1x64x64xf32> to vector<64x64xf32>
    %cst_188 = arith.constant dense<0.000000e+00> : vector<2x64xf32>
    %298 = tpu.matmul %295, %297, %cst_188 {dimension_numbers = #tpu.dot_dimension_numbers<[1], [0], [0], [1], [0, 0, 1, 1], [], []>} : vector<2x64xf32>, vector<64x64xf32>, vector<2x64xf32> -> vector<2x64xf32>
    %c4_189 = arith.constant 4 : index
    %c0_190 = arith.constant 0 : index
    %c0_191 = arith.constant 0 : index
    %299 = vector.load %arg5[%c4_189, %c0_190, %c0_191] : memref<8x1x144xf32, #tpu.memory_space<vmem>>, vector<1x1x64xf32>
    %300 = vector.shape_cast %299 : vector<1x1x64xf32> to vector<1x64xf32>
    %301 = vector.broadcast %300 : vector<1x64xf32> to vector<2x64xf32>
    %302 = arith.addf %298, %301 : vector<2x64xf32>
    %cst_192 = arith.constant 0.000000e+00 : f32
    %303 = vector.broadcast %cst_192 : f32 to vector<2x64xf32>
    %304 = arith.cmpf oge, %302, %303 : vector<2x64xf32>
    %cst_193 = arith.constant 0.00999999977 : f32
    %305 = vector.broadcast %cst_193 : f32 to vector<2x64xf32>
    %306 = arith.mulf %305, %302 : vector<2x64xf32>
    %307 = arith.select %304, %302, %306 : vector<2x64xi1>, vector<2x64xf32>
    %c4_194 = arith.constant 4 : index
    %c72_195 = arith.constant 72 : index
    %c0_196 = arith.constant 0 : index
    %308 = vector.load %arg4[%c4_194, %c72_195, %c0_196] : memref<8x200x64xf32, #tpu.memory_space<vmem>>, vector<1x64x64xf32>
    %309 = vector.shape_cast %308 : vector<1x64x64xf32> to vector<64x64xf32>
    %cst_197 = arith.constant dense<0.000000e+00> : vector<2x64xf32>
    %310 = tpu.matmul %307, %309, %cst_197 {dimension_numbers = #tpu.dot_dimension_numbers<[1], [0], [0], [1], [0, 0, 1, 1], [], []>} : vector<2x64xf32>, vector<64x64xf32>, vector<2x64xf32> -> vector<2x64xf32>
    %c4_198 = arith.constant 4 : index
    %c0_199 = arith.constant 0 : index
    %c64_200 = arith.constant 64 : index
    %311 = vector.load %arg5[%c4_198, %c0_199, %c64_200] : memref<8x1x144xf32, #tpu.memory_space<vmem>>, vector<1x1x64xf32>
    %312 = vector.shape_cast %311 : vector<1x1x64xf32> to vector<1x64xf32>
    %313 = vector.broadcast %312 : vector<1x64xf32> to vector<2x64xf32>
    %314 = arith.addf %310, %313 : vector<2x64xf32>
    %cst_201 = arith.constant 0.000000e+00 : f32
    %315 = vector.broadcast %cst_201 : f32 to vector<2x64xf32>
    %316 = arith.cmpf oge, %314, %315 : vector<2x64xf32>
    %cst_202 = arith.constant 0.00999999977 : f32
    %317 = vector.broadcast %cst_202 : f32 to vector<2x64xf32>
    %318 = arith.mulf %317, %314 : vector<2x64xf32>
    %319 = arith.select %316, %314, %318 : vector<2x64xi1>, vector<2x64xf32>
    %c4_203 = arith.constant 4 : index
    %c136_204 = arith.constant 136 : index
    %c0_205 = arith.constant 0 : index
    %320 = vector.load %arg4[%c4_203, %c136_204, %c0_205] : memref<8x200x64xf32, #tpu.memory_space<vmem>>, vector<1x64x16xf32>
    %321 = vector.shape_cast %320 : vector<1x64x16xf32> to vector<64x16xf32>
    %cst_206 = arith.constant dense<0.000000e+00> : vector<2x16xf32>
    %322 = tpu.matmul %319, %321, %cst_206 {dimension_numbers = #tpu.dot_dimension_numbers<[1], [0], [0], [1], [0, 0, 1, 1], [], []>} : vector<2x64xf32>, vector<64x16xf32>, vector<2x16xf32> -> vector<2x16xf32>
    %c4_207 = arith.constant 4 : index
    %c0_208 = arith.constant 0 : index
    %c128_209 = arith.constant 128 : index
    %323 = vector.load %arg5[%c4_207, %c0_208, %c128_209] : memref<8x1x144xf32, #tpu.memory_space<vmem>>, vector<1x1x16xf32>
    %324 = vector.shape_cast %323 : vector<1x1x16xf32> to vector<1x16xf32>
    %325 = vector.broadcast %324 : vector<1x16xf32> to vector<2x16xf32>
    %326 = arith.addf %322, %325 : vector<2x16xf32>
    %327 = vector.extract_strided_slice %326 {offsets = [0, 0], sizes = [2, 8], strides = [1, 1]} : vector<2x16xf32> to vector<2x8xf32>
    %328 = math.tanh %327 : vector<2x8xf32>
    %329 = vector.extract_strided_slice %326 {offsets = [0, 8], sizes = [2, 8], strides = [1, 1]} : vector<2x16xf32> to vector<2x8xf32>
    %330 = math.exp %328 : vector<2x8xf32>
    %331 = arith.mulf %285, %330 : vector<2x8xf32>
    %332 = arith.addf %331, %329 : vector<2x8xf32>
    %cst_210 = arith.constant dense<0.000000e+00> : vector<2xf32>
    %333 = vector.multi_reduction <add>, %328, %cst_210 [1] : vector<2x8xf32> to vector<2xf32>
    %334 = vector.shape_cast %333 : vector<2xf32> to vector<2x1xf32>
    %335 = arith.addf %271, %334 : vector<2x1xf32>
    %c5 = arith.constant 5 : index
    %c0_211 = arith.constant 0 : index
    %c0_212 = arith.constant 0 : index
    %336 = vector.load %arg4[%c5, %c0_211, %c0_212] : memref<8x200x64xf32, #tpu.memory_space<vmem>>, vector<1x8x64xf32>
    %337 = vector.shape_cast %336 : vector<1x8x64xf32> to vector<8x64xf32>
    %cst_213 = arith.constant dense<0.000000e+00> : vector<2x64xf32>
    %338 = tpu.matmul %332, %337, %cst_213 {dimension_numbers = #tpu.dot_dimension_numbers<[1], [0], [0], [1], [0, 0, 1, 1], [], []>} : vector<2x8xf32>, vector<8x64xf32>, vector<2x64xf32> -> vector<2x64xf32>
    %339 = vector.extract_strided_slice %42 {offsets = [0, 320], sizes = [2, 64], strides = [1, 1]} : vector<2x512xf32> to vector<2x64xf32>
    %340 = arith.addf %338, %339 : vector<2x64xf32>
    %cst_214 = arith.constant 0.000000e+00 : f32
    %341 = vector.broadcast %cst_214 : f32 to vector<2x64xf32>
    %342 = arith.cmpf oge, %340, %341 : vector<2x64xf32>
    %cst_215 = arith.constant 0.00999999977 : f32
    %343 = vector.broadcast %cst_215 : f32 to vector<2x64xf32>
    %344 = arith.mulf %343, %340 : vector<2x64xf32>
    %345 = arith.select %342, %340, %344 : vector<2x64xi1>, vector<2x64xf32>
    %c5_216 = arith.constant 5 : index
    %c8_217 = arith.constant 8 : index
    %c0_218 = arith.constant 0 : index
    %346 = vector.load %arg4[%c5_216, %c8_217, %c0_218] : memref<8x200x64xf32, #tpu.memory_space<vmem>>, vector<1x64x64xf32>
    %347 = vector.shape_cast %346 : vector<1x64x64xf32> to vector<64x64xf32>
    %cst_219 = arith.constant dense<0.000000e+00> : vector<2x64xf32>
    %348 = tpu.matmul %345, %347, %cst_219 {dimension_numbers = #tpu.dot_dimension_numbers<[1], [0], [0], [1], [0, 0, 1, 1], [], []>} : vector<2x64xf32>, vector<64x64xf32>, vector<2x64xf32> -> vector<2x64xf32>
    %c5_220 = arith.constant 5 : index
    %c0_221 = arith.constant 0 : index
    %c0_222 = arith.constant 0 : index
    %349 = vector.load %arg5[%c5_220, %c0_221, %c0_222] : memref<8x1x144xf32, #tpu.memory_space<vmem>>, vector<1x1x64xf32>
    %350 = vector.shape_cast %349 : vector<1x1x64xf32> to vector<1x64xf32>
    %351 = vector.broadcast %350 : vector<1x64xf32> to vector<2x64xf32>
    %352 = arith.addf %348, %351 : vector<2x64xf32>
    %cst_223 = arith.constant 0.000000e+00 : f32
    %353 = vector.broadcast %cst_223 : f32 to vector<2x64xf32>
    %354 = arith.cmpf oge, %352, %353 : vector<2x64xf32>
    %cst_224 = arith.constant 0.00999999977 : f32
    %355 = vector.broadcast %cst_224 : f32 to vector<2x64xf32>
    %356 = arith.mulf %355, %352 : vector<2x64xf32>
    %357 = arith.select %354, %352, %356 : vector<2x64xi1>, vector<2x64xf32>
    %c5_225 = arith.constant 5 : index
    %c72_226 = arith.constant 72 : index
    %c0_227 = arith.constant 0 : index
    %358 = vector.load %arg4[%c5_225, %c72_226, %c0_227] : memref<8x200x64xf32, #tpu.memory_space<vmem>>, vector<1x64x64xf32>
    %359 = vector.shape_cast %358 : vector<1x64x64xf32> to vector<64x64xf32>
    %cst_228 = arith.constant dense<0.000000e+00> : vector<2x64xf32>
    %360 = tpu.matmul %357, %359, %cst_228 {dimension_numbers = #tpu.dot_dimension_numbers<[1], [0], [0], [1], [0, 0, 1, 1], [], []>} : vector<2x64xf32>, vector<64x64xf32>, vector<2x64xf32> -> vector<2x64xf32>
    %c5_229 = arith.constant 5 : index
    %c0_230 = arith.constant 0 : index
    %c64_231 = arith.constant 64 : index
    %361 = vector.load %arg5[%c5_229, %c0_230, %c64_231] : memref<8x1x144xf32, #tpu.memory_space<vmem>>, vector<1x1x64xf32>
    %362 = vector.shape_cast %361 : vector<1x1x64xf32> to vector<1x64xf32>
    %363 = vector.broadcast %362 : vector<1x64xf32> to vector<2x64xf32>
    %364 = arith.addf %360, %363 : vector<2x64xf32>
    %cst_232 = arith.constant 0.000000e+00 : f32
    %365 = vector.broadcast %cst_232 : f32 to vector<2x64xf32>
    %366 = arith.cmpf oge, %364, %365 : vector<2x64xf32>
    %cst_233 = arith.constant 0.00999999977 : f32
    %367 = vector.broadcast %cst_233 : f32 to vector<2x64xf32>
    %368 = arith.mulf %367, %364 : vector<2x64xf32>
    %369 = arith.select %366, %364, %368 : vector<2x64xi1>, vector<2x64xf32>
    %c5_234 = arith.constant 5 : index
    %c136_235 = arith.constant 136 : index
    %c0_236 = arith.constant 0 : index
    %370 = vector.load %arg4[%c5_234, %c136_235, %c0_236] : memref<8x200x64xf32, #tpu.memory_space<vmem>>, vector<1x64x16xf32>
    %371 = vector.shape_cast %370 : vector<1x64x16xf32> to vector<64x16xf32>
    %cst_237 = arith.constant dense<0.000000e+00> : vector<2x16xf32>
    %372 = tpu.matmul %369, %371, %cst_237 {dimension_numbers = #tpu.dot_dimension_numbers<[1], [0], [0], [1], [0, 0, 1, 1], [], []>} : vector<2x64xf32>, vector<64x16xf32>, vector<2x16xf32> -> vector<2x16xf32>
    %c5_238 = arith.constant 5 : index
    %c0_239 = arith.constant 0 : index
    %c128_240 = arith.constant 128 : index
    %373 = vector.load %arg5[%c5_238, %c0_239, %c128_240] : memref<8x1x144xf32, #tpu.memory_space<vmem>>, vector<1x1x16xf32>
    %374 = vector.shape_cast %373 : vector<1x1x16xf32> to vector<1x16xf32>
    %375 = vector.broadcast %374 : vector<1x16xf32> to vector<2x16xf32>
    %376 = arith.addf %372, %375 : vector<2x16xf32>
    %377 = vector.extract_strided_slice %376 {offsets = [0, 0], sizes = [2, 8], strides = [1, 1]} : vector<2x16xf32> to vector<2x8xf32>
    %378 = math.tanh %377 : vector<2x8xf32>
    %379 = vector.extract_strided_slice %376 {offsets = [0, 8], sizes = [2, 8], strides = [1, 1]} : vector<2x16xf32> to vector<2x8xf32>
    %380 = math.exp %378 : vector<2x8xf32>
    %381 = arith.mulf %284, %380 : vector<2x8xf32>
    %382 = arith.addf %381, %379 : vector<2x8xf32>
    %cst_241 = arith.constant dense<0.000000e+00> : vector<2xf32>
    %383 = vector.multi_reduction <add>, %378, %cst_241 [1] : vector<2x8xf32> to vector<2xf32>
    %384 = vector.shape_cast %383 : vector<2xf32> to vector<2x1xf32>
    %385 = arith.addf %335, %384 : vector<2x1xf32>
    %386 = tpu.concatenate %332, %382 in 1 : vector<2x8xf32>, vector<2x8xf32> -> vector<2x16xf32>
    %c2_242 = arith.constant 2 : index
    %c0_243 = arith.constant 0 : index
    %c0_244 = arith.constant 0 : index
    %387 = vector.load %arg6[%c2_242, %c0_243, %c0_244] : memref<4x19x16xf32, #tpu.memory_space<vmem>>, vector<1x16x16xf32>
    %388 = vector.shape_cast %387 : vector<1x16x16xf32> to vector<16x16xf32>
    %cst_245 = arith.constant dense<0.000000e+00> : vector<2x16xf32>
    %389 = tpu.matmul %386, %388, %cst_245 {dimension_numbers = #tpu.dot_dimension_numbers<[1], [0], [0], [1], [0, 0, 1, 1], [], []>} : vector<2x16xf32>, vector<16x16xf32>, vector<2x16xf32> -> vector<2x16xf32>
    %c3_246 = arith.constant 3 : index
    %c16_247 = arith.constant 16 : index
    %c0_248 = arith.constant 0 : index
    %390 = vector.load %arg6[%c3_246, %c16_247, %c0_248] : memref<4x19x16xf32, #tpu.memory_space<vmem>>, vector<1x1x16xf32>
    %391 = vector.shape_cast %390 : vector<1x1x16xf32> to vector<1x16xf32>
    %c3_249 = arith.constant 3 : index
    %c17_250 = arith.constant 17 : index
    %c0_251 = arith.constant 0 : index
    %392 = vector.load %arg6[%c3_249, %c17_250, %c0_251] : memref<4x19x16xf32, #tpu.memory_space<vmem>>, vector<1x1x16xf32>
    %393 = vector.shape_cast %392 : vector<1x1x16xf32> to vector<1x16xf32>
    %394 = vector.broadcast %391 : vector<1x16xf32> to vector<2x16xf32>
    %395 = arith.addf %389, %394 : vector<2x16xf32>
    %396 = vector.broadcast %393 : vector<1x16xf32> to vector<2x16xf32>
    %397 = arith.mulf %396, %395 : vector<2x16xf32>
    %398 = vector.extract_strided_slice %397 {offsets = [0, 0], sizes = [2, 8], strides = [1, 1]} : vector<2x16xf32> to vector<2x8xf32>
    %399 = vector.extract_strided_slice %397 {offsets = [0, 8], sizes = [2, 8], strides = [1, 1]} : vector<2x16xf32> to vector<2x8xf32>
    %c6 = arith.constant 6 : index
    %c0_252 = arith.constant 0 : index
    %c0_253 = arith.constant 0 : index
    %400 = vector.load %arg4[%c6, %c0_252, %c0_253] : memref<8x200x64xf32, #tpu.memory_space<vmem>>, vector<1x8x64xf32>
    %401 = vector.shape_cast %400 : vector<1x8x64xf32> to vector<8x64xf32>
    %cst_254 = arith.constant dense<0.000000e+00> : vector<2x64xf32>
    %402 = tpu.matmul %398, %401, %cst_254 {dimension_numbers = #tpu.dot_dimension_numbers<[1], [0], [0], [1], [0, 0, 1, 1], [], []>} : vector<2x8xf32>, vector<8x64xf32>, vector<2x64xf32> -> vector<2x64xf32>
    %403 = vector.extract_strided_slice %42 {offsets = [0, 384], sizes = [2, 64], strides = [1, 1]} : vector<2x512xf32> to vector<2x64xf32>
    %404 = arith.addf %402, %403 : vector<2x64xf32>
    %cst_255 = arith.constant 0.000000e+00 : f32
    %405 = vector.broadcast %cst_255 : f32 to vector<2x64xf32>
    %406 = arith.cmpf oge, %404, %405 : vector<2x64xf32>
    %cst_256 = arith.constant 0.00999999977 : f32
    %407 = vector.broadcast %cst_256 : f32 to vector<2x64xf32>
    %408 = arith.mulf %407, %404 : vector<2x64xf32>
    %409 = arith.select %406, %404, %408 : vector<2x64xi1>, vector<2x64xf32>
    %c6_257 = arith.constant 6 : index
    %c8_258 = arith.constant 8 : index
    %c0_259 = arith.constant 0 : index
    %410 = vector.load %arg4[%c6_257, %c8_258, %c0_259] : memref<8x200x64xf32, #tpu.memory_space<vmem>>, vector<1x64x64xf32>
    %411 = vector.shape_cast %410 : vector<1x64x64xf32> to vector<64x64xf32>
    %cst_260 = arith.constant dense<0.000000e+00> : vector<2x64xf32>
    %412 = tpu.matmul %409, %411, %cst_260 {dimension_numbers = #tpu.dot_dimension_numbers<[1], [0], [0], [1], [0, 0, 1, 1], [], []>} : vector<2x64xf32>, vector<64x64xf32>, vector<2x64xf32> -> vector<2x64xf32>
    %c6_261 = arith.constant 6 : index
    %c0_262 = arith.constant 0 : index
    %c0_263 = arith.constant 0 : index
    %413 = vector.load %arg5[%c6_261, %c0_262, %c0_263] : memref<8x1x144xf32, #tpu.memory_space<vmem>>, vector<1x1x64xf32>
    %414 = vector.shape_cast %413 : vector<1x1x64xf32> to vector<1x64xf32>
    %415 = vector.broadcast %414 : vector<1x64xf32> to vector<2x64xf32>
    %416 = arith.addf %412, %415 : vector<2x64xf32>
    %cst_264 = arith.constant 0.000000e+00 : f32
    %417 = vector.broadcast %cst_264 : f32 to vector<2x64xf32>
    %418 = arith.cmpf oge, %416, %417 : vector<2x64xf32>
    %cst_265 = arith.constant 0.00999999977 : f32
    %419 = vector.broadcast %cst_265 : f32 to vector<2x64xf32>
    %420 = arith.mulf %419, %416 : vector<2x64xf32>
    %421 = arith.select %418, %416, %420 : vector<2x64xi1>, vector<2x64xf32>
    %c6_266 = arith.constant 6 : index
    %c72_267 = arith.constant 72 : index
    %c0_268 = arith.constant 0 : index
    %422 = vector.load %arg4[%c6_266, %c72_267, %c0_268] : memref<8x200x64xf32, #tpu.memory_space<vmem>>, vector<1x64x64xf32>
    %423 = vector.shape_cast %422 : vector<1x64x64xf32> to vector<64x64xf32>
    %cst_269 = arith.constant dense<0.000000e+00> : vector<2x64xf32>
    %424 = tpu.matmul %421, %423, %cst_269 {dimension_numbers = #tpu.dot_dimension_numbers<[1], [0], [0], [1], [0, 0, 1, 1], [], []>} : vector<2x64xf32>, vector<64x64xf32>, vector<2x64xf32> -> vector<2x64xf32>
    %c6_270 = arith.constant 6 : index
    %c0_271 = arith.constant 0 : index
    %c64_272 = arith.constant 64 : index
    %425 = vector.load %arg5[%c6_270, %c0_271, %c64_272] : memref<8x1x144xf32, #tpu.memory_space<vmem>>, vector<1x1x64xf32>
    %426 = vector.shape_cast %425 : vector<1x1x64xf32> to vector<1x64xf32>
    %427 = vector.broadcast %426 : vector<1x64xf32> to vector<2x64xf32>
    %428 = arith.addf %424, %427 : vector<2x64xf32>
    %cst_273 = arith.constant 0.000000e+00 : f32
    %429 = vector.broadcast %cst_273 : f32 to vector<2x64xf32>
    %430 = arith.cmpf oge, %428, %429 : vector<2x64xf32>
    %cst_274 = arith.constant 0.00999999977 : f32
    %431 = vector.broadcast %cst_274 : f32 to vector<2x64xf32>
    %432 = arith.mulf %431, %428 : vector<2x64xf32>
    %433 = arith.select %430, %428, %432 : vector<2x64xi1>, vector<2x64xf32>
    %c6_275 = arith.constant 6 : index
    %c136_276 = arith.constant 136 : index
    %c0_277 = arith.constant 0 : index
    %434 = vector.load %arg4[%c6_275, %c136_276, %c0_277] : memref<8x200x64xf32, #tpu.memory_space<vmem>>, vector<1x64x16xf32>
    %435 = vector.shape_cast %434 : vector<1x64x16xf32> to vector<64x16xf32>
    %cst_278 = arith.constant dense<0.000000e+00> : vector<2x16xf32>
    %436 = tpu.matmul %433, %435, %cst_278 {dimension_numbers = #tpu.dot_dimension_numbers<[1], [0], [0], [1], [0, 0, 1, 1], [], []>} : vector<2x64xf32>, vector<64x16xf32>, vector<2x16xf32> -> vector<2x16xf32>
    %c6_279 = arith.constant 6 : index
    %c0_280 = arith.constant 0 : index
    %c128_281 = arith.constant 128 : index
    %437 = vector.load %arg5[%c6_279, %c0_280, %c128_281] : memref<8x1x144xf32, #tpu.memory_space<vmem>>, vector<1x1x16xf32>
    %438 = vector.shape_cast %437 : vector<1x1x16xf32> to vector<1x16xf32>
    %439 = vector.broadcast %438 : vector<1x16xf32> to vector<2x16xf32>
    %440 = arith.addf %436, %439 : vector<2x16xf32>
    %441 = vector.extract_strided_slice %440 {offsets = [0, 0], sizes = [2, 8], strides = [1, 1]} : vector<2x16xf32> to vector<2x8xf32>
    %442 = math.tanh %441 : vector<2x8xf32>
    %443 = vector.extract_strided_slice %440 {offsets = [0, 8], sizes = [2, 8], strides = [1, 1]} : vector<2x16xf32> to vector<2x8xf32>
    %444 = math.exp %442 : vector<2x8xf32>
    %445 = arith.mulf %399, %444 : vector<2x8xf32>
    %446 = arith.addf %445, %443 : vector<2x8xf32>
    %cst_282 = arith.constant dense<0.000000e+00> : vector<2xf32>
    %447 = vector.multi_reduction <add>, %442, %cst_282 [1] : vector<2x8xf32> to vector<2xf32>
    %448 = vector.shape_cast %447 : vector<2xf32> to vector<2x1xf32>
    %449 = arith.addf %385, %448 : vector<2x1xf32>
    %c7 = arith.constant 7 : index
    %c0_283 = arith.constant 0 : index
    %c0_284 = arith.constant 0 : index
    %450 = vector.load %arg4[%c7, %c0_283, %c0_284] : memref<8x200x64xf32, #tpu.memory_space<vmem>>, vector<1x8x64xf32>
    %451 = vector.shape_cast %450 : vector<1x8x64xf32> to vector<8x64xf32>
    %cst_285 = arith.constant dense<0.000000e+00> : vector<2x64xf32>
    %452 = tpu.matmul %446, %451, %cst_285 {dimension_numbers = #tpu.dot_dimension_numbers<[1], [0], [0], [1], [0, 0, 1, 1], [], []>} : vector<2x8xf32>, vector<8x64xf32>, vector<2x64xf32> -> vector<2x64xf32>
    %453 = vector.extract_strided_slice %42 {offsets = [0, 448], sizes = [2, 64], strides = [1, 1]} : vector<2x512xf32> to vector<2x64xf32>
    %454 = arith.addf %452, %453 : vector<2x64xf32>
    %cst_286 = arith.constant 0.000000e+00 : f32
    %455 = vector.broadcast %cst_286 : f32 to vector<2x64xf32>
    %456 = arith.cmpf oge, %454, %455 : vector<2x64xf32>
    %cst_287 = arith.constant 0.00999999977 : f32
    %457 = vector.broadcast %cst_287 : f32 to vector<2x64xf32>
    %458 = arith.mulf %457, %454 : vector<2x64xf32>
    %459 = arith.select %456, %454, %458 : vector<2x64xi1>, vector<2x64xf32>
    %c7_288 = arith.constant 7 : index
    %c8_289 = arith.constant 8 : index
    %c0_290 = arith.constant 0 : index
    %460 = vector.load %arg4[%c7_288, %c8_289, %c0_290] : memref<8x200x64xf32, #tpu.memory_space<vmem>>, vector<1x64x64xf32>
    %461 = vector.shape_cast %460 : vector<1x64x64xf32> to vector<64x64xf32>
    %cst_291 = arith.constant dense<0.000000e+00> : vector<2x64xf32>
    %462 = tpu.matmul %459, %461, %cst_291 {dimension_numbers = #tpu.dot_dimension_numbers<[1], [0], [0], [1], [0, 0, 1, 1], [], []>} : vector<2x64xf32>, vector<64x64xf32>, vector<2x64xf32> -> vector<2x64xf32>
    %c7_292 = arith.constant 7 : index
    %c0_293 = arith.constant 0 : index
    %c0_294 = arith.constant 0 : index
    %463 = vector.load %arg5[%c7_292, %c0_293, %c0_294] : memref<8x1x144xf32, #tpu.memory_space<vmem>>, vector<1x1x64xf32>
    %464 = vector.shape_cast %463 : vector<1x1x64xf32> to vector<1x64xf32>
    %465 = vector.broadcast %464 : vector<1x64xf32> to vector<2x64xf32>
    %466 = arith.addf %462, %465 : vector<2x64xf32>
    %cst_295 = arith.constant 0.000000e+00 : f32
    %467 = vector.broadcast %cst_295 : f32 to vector<2x64xf32>
    %468 = arith.cmpf oge, %466, %467 : vector<2x64xf32>
    %cst_296 = arith.constant 0.00999999977 : f32
    %469 = vector.broadcast %cst_296 : f32 to vector<2x64xf32>
    %470 = arith.mulf %469, %466 : vector<2x64xf32>
    %471 = arith.select %468, %466, %470 : vector<2x64xi1>, vector<2x64xf32>
    %c7_297 = arith.constant 7 : index
    %c72_298 = arith.constant 72 : index
    %c0_299 = arith.constant 0 : index
    %472 = vector.load %arg4[%c7_297, %c72_298, %c0_299] : memref<8x200x64xf32, #tpu.memory_space<vmem>>, vector<1x64x64xf32>
    %473 = vector.shape_cast %472 : vector<1x64x64xf32> to vector<64x64xf32>
    %cst_300 = arith.constant dense<0.000000e+00> : vector<2x64xf32>
    %474 = tpu.matmul %471, %473, %cst_300 {dimension_numbers = #tpu.dot_dimension_numbers<[1], [0], [0], [1], [0, 0, 1, 1], [], []>} : vector<2x64xf32>, vector<64x64xf32>, vector<2x64xf32> -> vector<2x64xf32>
    %c7_301 = arith.constant 7 : index
    %c0_302 = arith.constant 0 : index
    %c64_303 = arith.constant 64 : index
    %475 = vector.load %arg5[%c7_301, %c0_302, %c64_303] : memref<8x1x144xf32, #tpu.memory_space<vmem>>, vector<1x1x64xf32>
    %476 = vector.shape_cast %475 : vector<1x1x64xf32> to vector<1x64xf32>
    %477 = vector.broadcast %476 : vector<1x64xf32> to vector<2x64xf32>
    %478 = arith.addf %474, %477 : vector<2x64xf32>
    %cst_304 = arith.constant 0.000000e+00 : f32
    %479 = vector.broadcast %cst_304 : f32 to vector<2x64xf32>
    %480 = arith.cmpf oge, %478, %479 : vector<2x64xf32>
    %cst_305 = arith.constant 0.00999999977 : f32
    %481 = vector.broadcast %cst_305 : f32 to vector<2x64xf32>
    %482 = arith.mulf %481, %478 : vector<2x64xf32>
    %483 = arith.select %480, %478, %482 : vector<2x64xi1>, vector<2x64xf32>
    %c7_306 = arith.constant 7 : index
    %c136_307 = arith.constant 136 : index
    %c0_308 = arith.constant 0 : index
    %484 = vector.load %arg4[%c7_306, %c136_307, %c0_308] : memref<8x200x64xf32, #tpu.memory_space<vmem>>, vector<1x64x16xf32>
    %485 = vector.shape_cast %484 : vector<1x64x16xf32> to vector<64x16xf32>
    %cst_309 = arith.constant dense<0.000000e+00> : vector<2x16xf32>
    %486 = tpu.matmul %483, %485, %cst_309 {dimension_numbers = #tpu.dot_dimension_numbers<[1], [0], [0], [1], [0, 0, 1, 1], [], []>} : vector<2x64xf32>, vector<64x16xf32>, vector<2x16xf32> -> vector<2x16xf32>
    %c7_310 = arith.constant 7 : index
    %c0_311 = arith.constant 0 : index
    %c128_312 = arith.constant 128 : index
    %487 = vector.load %arg5[%c7_310, %c0_311, %c128_312] : memref<8x1x144xf32, #tpu.memory_space<vmem>>, vector<1x1x16xf32>
    %488 = vector.shape_cast %487 : vector<1x1x16xf32> to vector<1x16xf32>
    %489 = vector.broadcast %488 : vector<1x16xf32> to vector<2x16xf32>
    %490 = arith.addf %486, %489 : vector<2x16xf32>
    %491 = vector.extract_strided_slice %490 {offsets = [0, 0], sizes = [2, 8], strides = [1, 1]} : vector<2x16xf32> to vector<2x8xf32>
    %492 = math.tanh %491 : vector<2x8xf32>
    %493 = vector.extract_strided_slice %490 {offsets = [0, 8], sizes = [2, 8], strides = [1, 1]} : vector<2x16xf32> to vector<2x8xf32>
    %494 = math.exp %492 : vector<2x8xf32>
    %495 = arith.mulf %398, %494 : vector<2x8xf32>
    %496 = arith.addf %495, %493 : vector<2x8xf32>
    %cst_313 = arith.constant dense<0.000000e+00> : vector<2xf32>
    %497 = vector.multi_reduction <add>, %492, %cst_313 [1] : vector<2x8xf32> to vector<2xf32>
    %498 = vector.shape_cast %497 : vector<2xf32> to vector<2x1xf32>
    %499 = arith.addf %449, %498 : vector<2x1xf32>
    %500 = tpu.concatenate %446, %496 in 1 : vector<2x8xf32>, vector<2x8xf32> -> vector<2x16xf32>
    %c3_314 = arith.constant 3 : index
    %c0_315 = arith.constant 0 : index
    %c0_316 = arith.constant 0 : index
    %501 = vector.load %arg6[%c3_314, %c0_315, %c0_316] : memref<4x19x16xf32, #tpu.memory_space<vmem>>, vector<1x16x16xf32>
    %502 = vector.shape_cast %501 : vector<1x16x16xf32> to vector<16x16xf32>
    %cst_317 = arith.constant dense<0.000000e+00> : vector<2x16xf32>
    %503 = tpu.matmul %500, %502, %cst_317 {dimension_numbers = #tpu.dot_dimension_numbers<[1], [0], [0], [1], [0, 0, 1, 1], [], []>} : vector<2x16xf32>, vector<16x16xf32>, vector<2x16xf32> -> vector<2x16xf32>
    %504 = tpu.concatenate %503, %499 in 1 : vector<2x16xf32>, vector<2x1xf32> -> vector<2x17xf32>
    %c0_318 = arith.constant 0 : index
    %c0_319 = arith.constant 0 : index
    %505 = vector.load %arg7[%c0_318, %c0_319] : memref<2x17xf32, #tpu.memory_space<vmem>>, vector<2x17xf32>
    tpu.vector_store %arg7[%c0_318, %c0_319], %504 {strides = array<i32>} : memref<2x17xf32, #tpu.memory_space<vmem>>, vector<2x17xf32>,
    return
  }
}

</mosaic_0001>

<bundles_post_ra>
// kernel: flow_forward.1
= control target key start
LH: loop header
LB: loop body
LE: loop exit
PB: predicated region body
PF: predicated region fallthrough
CT: control target
= control target key end

     0   :  { %v5209_v0 = vmov 0.0|0.0   ;;  %vm5210_vm0 = vmmov 0   ;;  %v5211_v3 = vmov 0.0   ;;  %vm35_vm1 = vcmask 130048   ;;  %s5212_s11 = smov 64   ;;  %s5213_s23 = smov 8   ;;  %s6432_s2 = inlined_call_operand.vmem [shape: f32[3,33,32], index: 2, kind: input, shape index: {}]   ;;  %s6433_s1 = inlined_call_operand.vmem [shape: f32[2,16], index: 1, kind: input, shape index: {}]   ;;  %s6434_s3 = inlined_call_operand.vmem [shape: f32[33,512], index: 3, kind: input, shape index: {}]   ;;  %s6435_s0 = inlined_call_operand.vmem [shape: f32[2,16], index: 0, kind: input, shape index: {}]   ;;  %s6436_s6 = inlined_call_operand.vmem [shape: f32[4,19,16], index: 6, kind: input, shape index: {}]   ;;  %s6437_s4 = inlined_call_operand.vmem [shape: f32[8,200,64], index: 4, kind: input, shape index: {}]   ;;  %s6438_s5 = inlined_call_operand.vmem [shape: f32[8,1,144], index: 5, kind: input, shape index: {}]   ;;  %s6439_s7 = inlined_call_operand.vmem [shape: f32[2,17], index: 7, kind: output, shape index: {}]  }
   0x1   :  { %4838 = vmatprep.subr.bf16.mxu0 %v5209_v0  ;;  %v28_v1 = vld [vmem:[%s6432_s2] sm:$0xff]  ;;  %v29_v2 = vld [vmem:[%s6432_s2 + $0x8] sm:$0xff]  ;;  %4289 = vmatprep.mubr.msk.f32.mxu0 %vm5210_vm0, %v5211_v3  ;;  %v3750_v6 = vld [vmem:[%s6432_s2 + $0x30] sm:$0xff]  ;;  %vm122_vm3 = vcmask 261120   ;;  %vm488_vm6 = vcmask 64512   ;;  %vm580_vm8 = vcmask 523264  }
   0x2   :  { %v4839_v4 = vpack.c.bf16 %v29_v2, %v28_v1  ;;  %4841 = vmatprep.subr.bf16.mxu1 %v5209_v0  ;;  %v3749_v5 = vld [vmem:[%s6432_s2 + $0x28] sm:$0xff]  ;;  %4300 = vmatprep.mubr.msk.f32.mxu1 %vm5210_vm0, %v5211_v3  ;;  %v27_v8 = vld [vmem:[%s6433_s1] sm:$0x3]  ;;  %v3751_v9 = vld [vmem:[%s6432_s2 + $0x38] sm:$0xff]  ;;  %s5214_s24 = smov 120   ;;  %s5215_s10 = smov 16  }
   0x3   :  { %v4842_v7 = vpack.c.bf16 %v3750_v6, %v3749_v5  ;;  %v3752_v10 = vld [vmem:[%s6432_s2 + $0x40] sm:$0xff]  ;;  %v3756_v12 = vld [vmem:[%s6432_s2 + $0x50] sm:$0xff]  ;;  %v3757_v13 = vld [vmem:[%s6432_s2 + $0x58] sm:$0xff] }
   0x4   :  { %4840 = vmatpush3.bf16.msra.mxu0 %v4839_v4  ;;  %v4845_v11 = vpack.c.bf16 %v3752_v10, %v3751_v9  ;;  %v4848_v14 = vpack.c.bf16 %v3757_v13, %v3756_v12  ;;  %v3747_v15 = vld [vmem:[%s6432_s2 + $0x20] ss:$0 sm:$0xff]  ;;  %v3759_v22 = vld [vmem:[%s6432_s2 + $0x68] sm:$0xff]  ;;  %v288_v29 = vld [vmem:[%s6434_s3 + $0x18] sm:$0xff] }
   0x5   :  { %4843 = vmatpush3.bf16.msra.mxu1 %v4842_v7  ;;  %4847 = vmatprep.subr.bf16.mxu0 %v5209_v0  ;;  %v3758_v21 = vld [vmem:[%s6432_s2 + $0x60] sm:$0xff]  ;;  %v286_v24 = vld [vmem:[%s6434_s3 + $0x8] sm:$0xff]  ;;  %v292_v30 = vld [vmem:[%s6434_s3 + $0x38] sm:$0xff] }
   0x6   :  { %4844 = vmatprep.subr.bf16.mxu1 %v5209_v0  ;;  %v4851_v23 = vpack.c.bf16 %v3759_v22, %v3758_v21  ;;  %v290_v25 = vld [vmem:[%s6434_s3 + $0x28] sm:$0xff]  ;;  %v285_v26 = vld [vmem:[%s6434_s3] sm:$0xff]  ;;  %v4861_v32 = vpack.c.bf16 %v292_v30, %v288_v29  ;;  %v287_v35 = vld [vmem:[%s6434_s3 + $0x10] sm:$0xff] }
   0x7   :  { %4290 = vmatmul.mubr.msk.f32.vlgmr.msra.gmra.mrb[0].mxu0 %vm35_vm1, %v27_v8  ;;  %v4853_v27 = vpack.c.bf16 %v290_v25, %v286_v24  ;;  %v289_v28 = vld [vmem:[%s6434_s3 + $0x20] sm:$0xff]  ;;  %v3754_v33 = vld [vmem:[%s6432_s2 + $0x48] ss:$0 sm:$0xff]  ;;  %v291_v36 = vld [vmem:[%s6434_s3 + $0x30] sm:$0xff]  ;;  %v304_v25 = vlaneseq }
   0x8   :  { %4311 = vmatprep.mubr.msk.f32.mxu0 %vm5210_vm0, %v5211_v3  ;;  %4849 = vmatpush3.bf16.msra.mxu0 %v4848_v14  ;;  %v4855_v31 = vpack.c.bf16 %v289_v28, %v285_v26  ;;  %v4863_v40 = vpack.c.bf16 %v291_v36, %v287_v35  ;;  %v294_v42 = vld [vmem:[%s6434_s3 + $0x48] sm:$0xff]  ;;  %v296_v44 = vld [vmem:[%s6434_s3 + $0x58] sm:$0xff]  ;;  %v293_v46 = vld [vmem:[%s6434_s3 + $0x40] sm:$0xff] }
   0x9   :  { %4846 = vmatpush3.bf16.msra.mxu1 %v4845_v11  ;;  %4850 = vmatprep.subr.bf16.mxu0 %v5209_v0  ;;  %v298_v43 = vld [vmem:[%s6434_s3 + $0x68] sm:$0xff]  ;;  %v297_v47 = vld [vmem:[%s6434_s3 + $0x60] sm:$0xff]  ;;  %v300_v48 = vld [vmem:[%s6434_s3 + $0x78] sm:$0xff]  ;;  %v5438_v26 = vshrl.u32 %v304_v25, 7 }
   0xa   :  { %4854 = vmatprep.subr.bf16.mxu1 %v4853_v27  ;;  %v4857_v45 = vpack.c.bf16 %v298_v43, %v294_v42  ;;  %v4859_v49 = vpack.c.bf16 %v297_v47, %v293_v46  ;;  %v4865_v50 = vpack.c.bf16 %v300_v48, %v296_v44  ;;  %v295_v51 = vld [vmem:[%s6434_s3 + $0x50] sm:$0xff]  ;;  %v26_v55 = vld [vmem:[%s6435_s0] sm:$0x3]  ;;  %v565_v60 = vld [vmem:[%s6437_s4 + $0x8] sm:$0xff] }
   0xb   :  { %v299_v52 = vld [vmem:[%s6434_s3 + $0x70] sm:$0xff]  ;;  %v487_v2 = vld [vmem:[%s6437_s4] sm:$0xff]  ;;  %v567_v6 = vld [vmem:[%s6437_s4 + $0x18] sm:$0xff]  ;;  %v306_v27 = vsub.s32 0, %v5438_v26 }
   0xc   :  { %4852 = vmatpush3.bf16.msra.mxu0 %v4851_v23  ;;  %v4867_v53 = vpack.c.bf16 %v299_v52, %v295_v51  ;;  %v3761_v54 = vld [vmem:[%s6432_s2 + $0x70] ss:$0 sm:$0xff]  ;;  %v3768_v1 = vld [vmem:[%s6436_s6 + $0x11] ss:$0 sm:$0xff]  ;;  %v568_v7 = vld [vmem:[%s6437_s4 + $0x20] sm:$0xff] }
   0xd   :  { %4862 = vmatprep.subr.bf16.mxu0 %v4861_v32  ;;  %v3767_v56 = vld [vmem:[%s6436_s6 + $0x10] ss:$0 sm:$0xff]  ;;  %v4873_v9 = vpack.c.bf16 %v568_v7, %v567_v6  ;;  %v569_v10 = vld [vmem:[%s6437_s4 + $0x28] sm:$0xff]  ;;  %v571_v13 = vld [vmem:[%s6437_s4 + $0x38] sm:$0xff] }
   0xe   :  { %v566_v61 = vld [vmem:[%s6437_s4 + $0x10] sm:$0xff]  ;;  %v481_v62 = vadd.f32 %v3767_v56, %v26_v55  ;;  %v572_v14 = vld [vmem:[%s6437_s4 + $0x40] sm:$0xff]  ;;  %v661_v22 = vld [vmem:[%s6437_s4 + $0x68] sm:$0xff] }
   0xf   :  { %v4870_v4 = vpack.c.bf16 %v566_v61, %v565_v60  ;;  %v570_v11 = vld [vmem:[%s6437_s4 + $0x30] sm:$0xff]  ;;  %v3770_v43 = vld [vmem:[%s6438_s5] ss:$0 sm:$0xff]  ;;  %v744_v44 = vld [vmem:[%s6437_s4 + $0x88] sm:$0xff] }
  0x10   :  { %v5390_v8 = vmul.f32 %v3768_v1, %v481_v62  ;;  %v4876_v12 = vpack.c.bf16 %v570_v11, %v569_v10  ;;  %v662_v23 = vld [vmem:[%s6437_s4 + $0x70] sm:$0xff]  ;;  %v746_v46 = vld [vmem:[%s6437_s4 + $0x98] sm:$0xff]  ;;  %665 = vrot.lane.b32.xlu0 %v3770_v43, %s5212_s11  ;;  %v747_v48 = vld [vmem:[%s6437_s4 + $0xa0] sm:$0xff] }
  0x11   :  { %v4888_v24 = vpack.c.bf16 %v662_v23, %v661_v22  ;;  %v5444_v28 = vld [vmem:[%s6434_s3 + $0x80] ss:$8 sm:$0xf] }
  0x12   :  { %v307_v29 = vrot.slane %v5444_v28, %v306_v27  ;;  %v749_v51 = vld [vmem:[%s6437_s4 + $0xb0] sm:$0xff]  ;;  %v3782_v25 = vld [vmem:[%s6437_s4 + $0xf8] sm:$0xff] }
  0x82   :  { %v666_v61 = vpop.permute.xlu0 %665 }
  0xda   :  { %v105_v16 = vpop.f32.mrb[0].mxu0 }
  0xdb   :  { %v106_v17 = vadd.f32 %v3747_v15, %v105_v16  ;;  %v4291_v18 = vpop.f32.mrb[1].mxu0  ;;  %v4879_v15 = vpack.c.bf16 %v572_v14, %v571_v13  ;;  %v657_v16 = vld [vmem:[%s6437_s4 + $0x48] sm:$0xff] }
  0xdc   :  { %v659_v18 = vld [vmem:[%s6437_s4 + $0x58] sm:$0xff] }
  0xdd   :  { %vm109_vm2 = vcmp.ge.f32.partialorder %v106_v17, 0.0  ;;  %v110_v19 = vmul.f32 0.01, %v106_v17 }
  0xdf   :  { %v111_v20 = vsel %vm109_vm2, %v106_v17, %v110_v19  ;;  %v658_v17 = vld [vmem:[%s6437_s4 + $0x50] sm:$0xff] }
  0xe0   :  { %4301 = vmatmul.mubr.msk.f32.vlgmr.msra.gmra.mrb[0].mxu1 %vm122_vm3, %v111_v20  ;;  %v4882_v19 = vpack.c.bf16 %v658_v17, %v657_v16  ;;  %v660_v20 = vld [vmem:[%s6437_s4 + $0x60] sm:$0xff]  ;;  %v3777_v17 = vld [vmem:[%s6437_s4 + $0xd0] sm:$0xff] }
  0xe1   :  { %391 = vmatprep.mubr.f32.mxu1 %v5211_v3  ;;  %4856 = vmatpush1.bf16.msra.mxu1 %v4855_v31  ;;  %v4885_v21 = vpack.c.bf16 %v660_v20, %v659_v18  ;;  %v3778_v18 = vld [vmem:[%s6437_s4 + $0xd8] sm:$0xff]  ;;  %v3779_v20 = vld [vmem:[%s6437_s4 + $0xe0] sm:$0xff] }
  0xe2   :  { %4858 = vmatprep.subr.bf16.mxu1 %v4857_v45  ;;  %v745_v45 = vld [vmem:[%s6437_s4 + $0x90] sm:$0xff] }
  0xe3   :  { %v4894_v47 = vpack.c.bf16 %v745_v45, %v744_v44 }
  0xe5   :  { %4860 = vmatpush1.bf16.msra.mxu1 %v4859_v49  ;;  %v4897_v49 = vpack.c.bf16 %v747_v48, %v746_v46 }
  0xe6   :  { %4314 = vmatprep.subr.mxu1 %v5211_v3 }
 0x1b3   :  { %v192_v34 = vpop.f32.mrb[0].mxu1 }
 0x1b4   :  { %v193_v37 = vadd.f32 %v3754_v33, %v192_v34  ;;  %v4302_v38 = vpop.f32.mrb[1].mxu1 }
 0x1b6   :  { %vm196_vm4 = vcmp.ge.f32.partialorder %v193_v37, 0.0  ;;  %v197_v39 = vmul.f32 0.01, %v193_v37 }
 0x1b8   :  { %v198_v41 = vsel %vm196_vm4, %v193_v37, %v197_v39 }
 0x1b9   :  { %4312 = vmatmul.mubr.msk.f32.vlgmr.msra.gmra.mrb[2].mxu0 %vm122_vm3, %v198_v41  ;;  %v664_v41 = vld [vmem:[%s6437_s4 + $0x80] sm:$0xff] }
 0x1ba   :  { %4864 = vmatpush1.bf16.msra.mxu0 %v4863_v40  ;;  %462 = vmatprep.mubr.f32.mxu0 %v5211_v3  ;;  %v663_v40 = vld [vmem:[%s6437_s4 + $0x78] sm:$0xff] }
 0x1bb   :  { %4866 = vmatprep.subr.bf16.mxu0 %v4865_v50  ;;  %v4891_v42 = vpack.c.bf16 %v664_v41, %v663_v40  ;;  %v748_v50 = vld [vmem:[%s6437_s4 + $0xa8] sm:$0xff]  ;;  %v3786_v40 = vld [vmem:[%s6438_s5 + $0x2] ss:$0 sm:$0xff] }
 0x1bc   :  { %v4900_v52 = vpack.c.bf16 %v749_v51, %v748_v50  ;;  %v3794_v51 = vld [vmem:[%s6437_s4 + $0x140] sm:$0xff] }
 0x1be   :  { %4868 = vmatpush1.bf16.msra.mxu0 %v4867_v53 }
 0x1bf   :  { %4869 = vmatprep.subr.bf16.mxu0 %v5209_v0 }
 0x28c   :  { %v278_v57 = vpop.f32.mrb[2].mxu0 }
 0x28d   :  { %v279_v58 = vadd.f32 %v3761_v54, %v278_v57  ;;  %v4313_v59 = vpop.f32.mrb[3].mxu0 }
 0x28e   :  { %v751_v59 = vld [vmem:[%s6437_s4 + $0xc0] sm:$0xff] }
 0x28f   :  { %vm282_vm5 = vcmp.ge.f32.partialorder %v279_v58, 0.0  ;;  %v283_v63 = vmul.f32 0.01, %v279_v58 }
 0x291   :  { %v284_v5 = vsel %vm282_vm5, %v279_v58, %v283_v63  ;;  %v750_v58 = vld [vmem:[%s6437_s4 + $0xb8] sm:$0xff] }
 0x292   :  { %3764 = vmatmul.mubr.msk.f32.vlgmr.msra.gmra.mrb[2].mxu1 %vm122_vm3, %v284_v5  ;;  %3765 = vmatmul.mubr.msk.f32.vlgmr.msra.gmra.mrb[4].mxu0 %vm122_vm3, %v284_v5  ;;  %v4903_v60 = vpack.c.bf16 %v751_v59, %v750_v58  ;;  %v3773_v5 = vld [vmem:[%s6438_s5 + $0x1] ss:$0 sm:$0xff]  ;;  %v3800_v58 = vld [vmem:[%s6437_s4 + $0x168] sm:$0xff] }
 0x293   :  { %4315 = vmatpush3.msra.mxu1 %v487_v2  ;;  %4316 = vmatprep.mubr.msk.f32.mxu1 %vm5210_vm0, %v5211_v3 }
 0x294   :  { %4871 = vmatpush3.bf16.msra.mxu0 %v4870_v4  ;;  %4335 = vmatprep.mubr.msk.f32.mxu0 %vm5210_vm0, %v5211_v3 }
 0x295   :  { %4872 = vmatprep.subr.bf16.mxu0 %v5209_v0  ;;  %4881 = vmatprep.subr.bf16.mxu1 %v5209_v0 }
 0x296   :  { %4317 = vmatmul.mubr.msk.f32.vlgmr.msra.gmra.mrb[4].mxu1 %vm488_vm6, %v5390_v8 }
 0x297   :  { %4354 = vmatprep.mubr.msk.f32.mxu1 %vm5210_vm0, %v5211_v3  ;;  %4883 = vmatpush3.bf16.msra.mxu1 %v4882_v19  ;;  %v4906_v19 = vpack.c.bf16 %v3778_v18, %v3777_v17  ;;  %v1216_v17 = vld [vmem:[%s6436_s6] sm:$0xff]  ;;  %v1217_v18 = vld [vmem:[%s6436_s6 + $0x8] sm:$0xff] }
 0x298   :  { %4874 = vmatpush3.bf16.msra.mxu0 %v4873_v9  ;;  %4884 = vmatprep.subr.bf16.mxu1 %v5209_v0 }
 0x299   :  { %4875 = vmatprep.subr.bf16.mxu0 %v5209_v0 }
 0x29b   :  { %4886 = vmatpush3.bf16.msra.mxu1 %v4885_v21  ;;  %v3780_v21 = vld [vmem:[%s6437_s4 + $0xe8] sm:$0xff] }
 0x29c   :  { %4877 = vmatpush3.bf16.msra.mxu0 %v4876_v12  ;;  %4887 = vmatprep.subr.bf16.mxu1 %v5209_v0  ;;  %v3775_v12 = vld [vmem:[%s6437_s4 + $0xc8] sm:$0xff]  ;;  %v4909_v23 = vpack.c.bf16 %v3780_v21, %v3779_v20  ;;  %v3806_v20 = vld [vmem:[%s6438_s5 + $0x3] ss:$0 sm:$0xff] }
 0x29d   :  { %4878 = vmatprep.subr.bf16.mxu0 %v5209_v0 }
 0x29f   :  { %4889 = vmatpush3.bf16.msra.mxu1 %v4888_v24  ;;  %v3781_v24 = vld [vmem:[%s6437_s4 + $0xf0] sm:$0xff] }
 0x2a0   :  { %4880 = vmatpush3.bf16.msra.mxu0 %v4879_v15  ;;  %4890 = vmatprep.subr.bf16.mxu1 %v5209_v0  ;;  %v4912_v27 = vpack.c.bf16 %v3782_v25, %v3781_v24 }
 0x2a1   :  { %4893 = vmatprep.subr.bf16.mxu0 %v5209_v0 }
 0x2a3   :  { %4892 = vmatpush3.bf16.msra.mxu1 %v4891_v42  ;;  %v3792_v42 = vld [vmem:[%s6437_s4 + $0x130] sm:$0xff] }
 0x2a4   :  { %4376 = vmatprep.subr.mxu1 %v5211_v3 }
 0x365   :  { %v393_v30 = vpop.f32.mrb[2].mxu1  ;;  %v5447_v31 = vpop.f32.mrb[4].mxu0 }
 0x366   :  { %v5449_v32 = vpop.f32.mrb[3].mxu1  ;;  %v5451_v33 = vpop.f32.mrb[5].mxu0  ;;  %v5453_v34 = vadd.f32 %v393_v30, %v307_v29  ;;  %v3783_v29 = vld [vmem:[%s6437_s4 + $0x100] sm:$0xff]  ;;  %v3784_v30 = vld [vmem:[%s6437_s4 + $0x108] sm:$0xff] }
 0x369   :  { %v558_v35 = vpop.f32.mrb[4].mxu1 }
 0x36a   :  { %v559_v36 = vadd.f32 %v558_v35, %v5453_v34  ;;  %v4318_v37 = vpop.f32.mrb[5].mxu1  ;;  %v3788_v35 = vld [vmem:[%s6437_s4 + $0x110] sm:$0xff] }
 0x36b   :  { %v3790_v37 = vld [vmem:[%s6437_s4 + $0x120] sm:$0xff] }
 0x36c   :  { %vm562_vm7 = vcmp.ge.f32.partialorder %v559_v36, 0.0  ;;  %v563_v38 = vmul.f32 0.01, %v559_v36 }
 0x36e   :  { %v564_v39 = vsel %vm562_vm7, %v559_v36, %v563_v38  ;;  %v3789_v36 = vld [vmem:[%s6437_s4 + $0x118] sm:$0xff] }
 0x36f   :  { %4336 = vmatmul.mubr.msk.f32.vlgmr.msra.gmra.mrb[6].mxu0 %vm580_vm8, %v564_v39  ;;  %v4918_v38 = vpack.c.bf16 %v3789_v36, %v3788_v35  ;;  %v3791_v39 = vld [vmem:[%s6437_s4 + $0x128] sm:$0xff] }
 0x370   :  { %4373 = vmatprep.mubr.msk.f32.mxu0 %vm5210_vm0, %v5211_v3  ;;  %4895 = vmatpush3.bf16.msra.mxu0 %v4894_v47  ;;  %v4921_v41 = vpack.c.bf16 %v3791_v39, %v3790_v37  ;;  %v3816_v39 = vld [vmem:[%s6437_s4 + $0x1a0] sm:$0xff] }
 0x371   :  { %4896 = vmatprep.subr.bf16.mxu0 %v5209_v0 }
 0x374   :  { %4898 = vmatpush3.bf16.msra.mxu0 %v4897_v49 }
 0x375   :  { %4899 = vmatprep.subr.bf16.mxu0 %v5209_v0 }
 0x378   :  { %4901 = vmatpush3.bf16.msra.mxu0 %v4900_v52  ;;  %v3795_v52 = vld [vmem:[%s6437_s4 + $0x148] sm:$0xff] }
 0x379   :  { %4902 = vmatprep.subr.bf16.mxu0 %v5209_v0 }
 0x37c   :  { %4904 = vmatpush3.bf16.msra.mxu0 %v4903_v60  ;;  %v3801_v60 = vld [vmem:[%s6437_s4 + $0x170] sm:$0xff] }
 0x37d   :  { %4917 = vmatprep.subr.bf16.mxu0 %v5209_v0 }
 0x442   :  { %v650_v53 = vpop.f32.mrb[6].mxu0 }
 0x443   :  { %v651_v54 = vadd.f32 %v3770_v43, %v650_v53  ;;  %v4337_v55 = vpop.f32.mrb[7].mxu0  ;;  %v3793_v43 = vld [vmem:[%s6437_s4 + $0x138] sm:$0xff]  ;;  %v4927_v53 = vpack.c.bf16 %v3795_v52, %v3794_v51  ;;  %v3821_v52 = vld [vmem:[%s6437_s4 + $0x1c8] sm:$0xff] }
 0x444   :  { %v4924_v44 = vpack.c.bf16 %v3793_v43, %v3792_v42  ;;  %v3798_v55 = vld [vmem:[%s6437_s4 + $0x158] sm:$0xff] }
 0x445   :  { %vm654_vm9 = vcmp.ge.f32.partialorder %v651_v54, 0.0  ;;  %v655_v56 = vmul.f32 0.01, %v651_v54  ;;  %v3819_v43 = vld [vmem:[%s6437_s4 + $0x1b8] sm:$0xff] }
 0x447   :  { %v656_v57 = vsel %vm654_vm9, %v651_v54, %v655_v56  ;;  %v3797_v54 = vld [vmem:[%s6437_s4 + $0x150] sm:$0xff]  ;;  %v3799_v56 = vld [vmem:[%s6437_s4 + $0x160] sm:$0xff] }
 0x448   :  { %4355 = vmatmul.mubr.msk.f32.vlgmr.msra.gmra.mrb[6].mxu1 %vm580_vm8, %v656_v57  ;;  %v4930_v57 = vpack.c.bf16 %v3798_v55, %v3797_v54  ;;  %v4933_v59 = vpack.c.bf16 %v3800_v58, %v3799_v56  ;;  %v3826_v55 = vld [vmem:[%s6437_s4 + $0x1d8] sm:$0xff]  ;;  %v3827_v56 = vld [vmem:[%s6437_s4 + $0x1e0] sm:$0xff] }
 0x449   :  { %4378 = vmatprep.mubr.msk.f32.mxu1 %vm5210_vm0, %v5211_v3  ;;  %4377 = vmatpush3.msra.mxu1 %v3775_v12  ;;  %v4957_v58 = vpack.c.bf16 %v3827_v56, %v3826_v55  ;;  %v3848_v55 = vld [vmem:[%s6437_s4 + $0x260] sm:$0xff]  ;;  %v3849_v56 = vld [vmem:[%s6437_s4 + $0x268] sm:$0xff] }
 0x44a   :  { %4905 = vmatprep.subr.bf16.mxu1 %v5209_v0 }
 0x51b   :  { %v737_v62 = vpop.f32.mrb[6].mxu1 }
 0x51c   :  { %v738_v63 = vadd.f32 %v737_v62, %v666_v61  ;;  %v4356_v1 = vpop.f32.mrb[7].mxu1  ;;  %v3802_v61 = vld [vmem:[%s6437_s4 + $0x178] sm:$0xff] }
 0x51d   :  { %v4936_v62 = vpack.c.bf16 %v3802_v61, %v3801_v60  ;;  %v3824_v60 = vld [vmem:[%s6438_s5 + $0x4] ss:$0 sm:$0xff] }
 0x51e   :  { %vm741_vm10 = vcmp.ge.f32.partialorder %v738_v63, 0.0  ;;  %v742_v2 = vmul.f32 0.01, %v738_v63 }
 0x520   :  { %v743_v4 = vsel %vm741_vm10, %v738_v63, %v742_v2 }
 0x521   :  { %4374 = vmatmul.mubr.msk.f32.vlgmr.msra.gmra.mrb[8].mxu0 %vm580_vm8, %v743_v4 }
 0x522   :  { %4416 = vmatprep.mubr.msk.f32.mxu0 %vm5210_vm0, %v5211_v3  ;;  %4919 = vmatpush3.bf16.msra.mxu0 %v4918_v38  ;;  %v3813_v38 = vld [vmem:[%s6437_s4 + $0x190] sm:$0xff] }
 0x523   :  { %4920 = vmatprep.subr.bf16.mxu0 %v5209_v0 }
 0x526   :  { %4922 = vmatpush3.bf16.msra.mxu0 %v4921_v41  ;;  %v3818_v41 = vld [vmem:[%s6437_s4 + $0x1b0] sm:$0xff] }
 0x527   :  { %4923 = vmatprep.subr.bf16.mxu0 %v5209_v0 }
 0x52a   :  { %4925 = vmatpush3.bf16.msra.mxu0 %v4924_v44  ;;  %v3820_v44 = vld [vmem:[%s6437_s4 + $0x1c0] sm:$0xff] }
 0x52b   :  { %4926 = vmatprep.subr.bf16.mxu0 %v5209_v0 }
 0x52e   :  { %4928 = vmatpush3.bf16.msra.mxu0 %v4927_v53  ;;  %v3822_v53 = vld [vmem:[%s6437_s4 + $0x1d0] sm:$0xff] }
 0x52f   :  { %4941 = vmatprep.subr.bf16.mxu0 %v5209_v0  ;;  %v4954_v54 = vpack.c.bf16 %v3822_v53, %v3821_v52 }
 0x5f4   :  { %v828_v6 = vpop.f32.mrb[8].mxu0 }
 0x5f5   :  { %v829_v7 = vadd.f32 %v3773_v5, %v828_v6  ;;  %v4375_v9 = vpop.f32.mrb[9].mxu0  ;;  %v3803_v6 = vld [vmem:[%s6437_s4 + $0x180] sm:$0xff] }
 0x5f7   :  { %5176 = vtanh.f32 %v829_v7 }
 0x601   :  { %v5507_v10 = vpop.eup %5176 }
 0x602   :  { %v833_v11 = vmul.f32 1.442695, %v5507_v10 }
 0x604   :  { %5178 = vpow2.f32 %v833_v11 }
 0x60e   :  { %v5179_v13 = vpop.eup %5178 }
 0x60f   :  { %836 = vrot.lane.b32.xlu0 %v5179_v13, %s5213_s23 }
 0x613   :  { %1030 = vrot.lane.b32.xlu0 %v3786_v40, %s5212_s11 }
 0x681   :  { %v837_v14 = vpop.permute.xlu0 %836 }
 0x682   :  { %v839_v15 = vmul.f32 %v837_v14, %v5390_v8 }
 0x684   :  { %v840_v16 = vadd.f32 %v839_v15, %v829_v7  ;;  %v3804_v7 = vld [vmem:[%s6437_s4 + $0x188] sm:$0xff] }
 0x685   :  { %v4939_v9 = vpack.c.bf16 %v3804_v7, %v3803_v6  ;;  %v1031_v11 = vpop.permute.xlu0 %1030 }
 0x686   :  { %849 = vrot.lane.b32.xlu1 %v840_v16, %s5214_s24 }
 0x68a   :  { %852 = vrot.lane.b32.xlu1 %v5453_v34, %s5212_s11  ;;  %v4915_v34 = vpack.c.bf16 %v3784_v30, %v3783_v29 }
 0x6f8   :  { %v5531_v22 = vpop.permute.xlu1 %849 }
 0x6f9   :  { %4379 = vmatmul.mubr.msk.f32.vlgmr.msra.gmra.mrb[8].mxu1 %vm488_vm6, %v5531_v22 }
 0x6fa   :  { %4907 = vmatpush3.bf16.msra.mxu1 %v4906_v19  ;;  %4397 = vmatprep.mubr.msk.f32.mxu1 %vm5210_vm0, %v5211_v3  ;;  %v4942_v19 = vpack.c.bf16 %v1217_v18, %v1216_v17  ;;  %v3837_v17 = vld [vmem:[%s6437_s4 + $0x228] sm:$0xff] }
 0x6fb   :  { %4908 = vmatprep.subr.bf16.mxu1 %v5209_v0 }
 0x6fc   :  { %v853_v45 = vpop.permute.xlu1 %852 }
 0x6fe   :  { %4910 = vmatpush3.bf16.msra.mxu1 %v4909_v23 }
 0x6ff   :  { %4911 = vmatprep.subr.bf16.mxu1 %v5209_v0 }
 0x702   :  { %4913 = vmatpush3.bf16.msra.mxu1 %v4912_v27 }
 0x703   :  { %4914 = vmatprep.subr.bf16.mxu1 %v5209_v0 }
 0x706   :  { %4916 = vmatpush3.bf16.msra.mxu1 %v4915_v34 }
 0x707   :  { %4929 = vmatprep.subr.bf16.mxu1 %v5209_v0 }
 0x7cc   :  { %v923_v46 = vpop.f32.mrb[8].mxu1 }
 0x7cd   :  { %v924_v47 = vadd.f32 %v923_v46, %v853_v45  ;;  %v4380_v48 = vpop.f32.mrb[9].mxu1  ;;  %v4951_v45 = vpack.c.bf16 %v3820_v44, %v3819_v43  ;;  %v3810_v46 = vld [vmem:[%s6436_s6 + $0x28] ss:$0 sm:$0xff]  ;;  %v3844_v43 = vld [vmem:[%s6438_s5 + $0x5] ss:$0 sm:$0xff] }
 0x7cf   :  { %vm927_vm11 = vcmp.ge.f32.partialorder %v924_v47, 0.0  ;;  %v928_v49 = vmul.f32 0.01, %v924_v47 }
 0x7d1   :  { %v929_v50 = vsel %vm927_vm11, %v924_v47, %v928_v49  ;;  %v3812_v47 = vld [vmem:[%s6436_s6 + $0x29] ss:$0 sm:$0xff] }
 0x7d2   :  { %4398 = vmatmul.mubr.msk.f32.vlgmr.msra.gmra.mrb[10].mxu1 %vm580_vm8, %v929_v50 }
 0x7d3   :  { %4435 = vmatprep.mubr.msk.f32.mxu1 %vm5210_vm0, %v5211_v3  ;;  %4931 = vmatpush3.bf16.msra.mxu1 %v4930_v57  ;;  %v3828_v57 = vld [vmem:[%s6437_s4 + $0x1e8] sm:$0xff] }
 0x7d4   :  { %4932 = vmatprep.subr.bf16.mxu1 %v5209_v0 }
 0x7d7   :  { %4934 = vmatpush3.bf16.msra.mxu1 %v4933_v59  ;;  %v3829_v59 = vld [vmem:[%s6437_s4 + $0x1f0] sm:$0xff] }
 0x7d8   :  { %4935 = vmatprep.subr.bf16.mxu1 %v5209_v0  ;;  %v4960_v61 = vpack.c.bf16 %v3829_v59, %v3828_v57  ;;  %v4981_v57 = vpack.c.bf16 %v3849_v56, %v3848_v55  ;;  %v3851_v59 = vld [vmem:[%s6437_s4 + $0x278] sm:$0xff] }
 0x7d9   :  { %v3879_v56 = vld [vmem:[%s6436_s6 + $0x18] sm:$0xff] }
 0x7db   :  { %4937 = vmatpush3.bf16.msra.mxu1 %v4936_v62  ;;  %v3830_v62 = vld [vmem:[%s6437_s4 + $0x1f8] sm:$0xff] }
 0x7dc   :  { %4938 = vmatprep.subr.bf16.mxu1 %v5209_v0 }
 0x7df   :  { %4940 = vmatpush3.bf16.msra.mxu1 %v4939_v9 }
 0x7e0   :  { %4944 = vmatprep.subr.bf16.mxu1 %v5209_v0 }
 0x8a5   :  { %v1015_v63 = vpop.f32.mrb[10].mxu1 }
 0x8a6   :  { %v1016_v1 = vadd.f32 %v3786_v40, %v1015_v63  ;;  %v4399_v2 = vpop.f32.mrb[11].mxu1  ;;  %v3831_v63 = vld [vmem:[%s6437_s4 + $0x200] sm:$0xff] }
 0x8a7   :  { %v310_v2 = vsub.s32 1, %v5438_v26 }
 0x8a8   :  { %vm1019_vm12 = vcmp.ge.f32.partialorder %v1016_v1, 0.0  ;;  %v1020_v4 = vmul.f32 0.01, %v1016_v1 }
 0x8aa   :  { %v1021_v5 = vsel %vm1019_vm12, %v1016_v1, %v1020_v4  ;;  %v4963_v1 = vpack.c.bf16 %v3831_v63, %v3830_v62  ;;  %v311_v4 = vrot.slane %v5444_v28, %v310_v2  ;;  %v3852_v62 = vld [vmem:[%s6437_s4 + $0x280] sm:$0xff]  ;;  %v3853_v63 = vld [vmem:[%s6437_s4 + $0x288] sm:$0xff]  ;;  %v3854_v2 = vld [vmem:[%s6437_s4 + $0x290] sm:$0xff] }
 0x8ab   :  { %4417 = vmatmul.mubr.msk.f32.vlgmr.msra.gmra.mrb[10].mxu0 %vm580_vm8, %v1021_v5 }
 0x8ac   :  { %4442 = vmatprep.mubr.msk.f32.mxu0 %vm5210_vm0, %v5211_v3  ;;  %4943 = vmatpush3.bf16.msra.mxu0 %v4942_v19  ;;  %v5715_v5 = vadd.f32 %v5449_v32, %v311_v4  ;;  %v3833_v32 = vld [vmem:[%s6437_s4 + $0x210] sm:$0xff]  ;;  %v3855_v4 = vld [vmem:[%s6437_s4 + $0x298] sm:$0xff] }
 0x8ad   :  { %4445 = vmatprep.subr.mxu0 %v5211_v3  ;;  %v3838_v19 = vld [vmem:[%s6437_s4 + $0x230] sm:$0xff] }
 0x97e   :  { %v1102_v12 = vpop.f32.mrb[10].mxu0 }
 0x97f   :  { %v1103_v13 = vadd.f32 %v1102_v12, %v1031_v11  ;;  %v4418_v14 = vpop.f32.mrb[11].mxu0 }
 0x981   :  { %vm1106_vm13 = vcmp.ge.f32.partialorder %v1103_v13, 0.0  ;;  %v1107_v15 = vmul.f32 0.01, %v1103_v13 }
 0x983   :  { %v1108_v16 = vsel %vm1106_vm13, %v1103_v13, %v1107_v15  ;;  %v3832_v13 = vld [vmem:[%s6437_s4 + $0x208] sm:$0xff]  ;;  %v3835_v15 = vld [vmem:[%s6437_s4 + $0x218] sm:$0xff] }
 0x984   :  { %4436 = vmatmul.mubr.msk.f32.vlgmr.msra.gmra.mrb[12].mxu1 %vm580_vm8, %v1108_v16  ;;  %v4966_v14 = vpack.c.bf16 %v3833_v32, %v3832_v13  ;;  %v3836_v16 = vld [vmem:[%s6437_s4 + $0x220] sm:$0xff] }
 0x985   :  { %4466 = vmatprep.mubr.msk.f32.mxu1 %vm5210_vm0, %v5211_v3  ;;  %v4969_v18 = vpack.c.bf16 %v3836_v16, %v3835_v15  ;;  %v3857_v13 = vld [vmem:[%s6438_s5 + $0x6] ss:$0 sm:$0xff]  ;;  %v3864_v15 = vld [vmem:[%s6437_s4 + $0x2c8] sm:$0xff] }
 0xa57   :  { %v1193_v21 = vpop.f32.mrb[12].mxu1 }
 0xa58   :  { %v1194_v23 = vadd.f32 %v3806_v20, %v1193_v21  ;;  %v4437_v24 = vpop.f32.mrb[13].mxu1  ;;  %v4972_v20 = vpack.c.bf16 %v3838_v19, %v3837_v17  ;;  %v3839_v21 = vld [vmem:[%s6437_s4 + $0x238] sm:$0xff] }
 0xa5a   :  { %1202 = vrot.lane.b32.xlu1 %v1194_v23, %s5214_s24  ;;  %5180 = vtanh.f32 %v1194_v23  ;;  %v3840_v23 = vld [vmem:[%s6437_s4 + $0x240] sm:$0xff] }
 0xa5b   :  { %v4975_v24 = vpack.c.bf16 %v3840_v23, %v3839_v21 }
 0xa5e   :  { %1481 = vrot.lane.b32.xlu1 %v3824_v60, %s5212_s11 }
 0xa64   :  { %v5633_v25 = vpop.eup %5180 }
 0xa65   :  { %v1198_v27 = vmul.f32 1.442695, %v5633_v25 }
 0xa67   :  { %5182 = vpow2.f32 %v1198_v27 }
 0xa71   :  { %v5183_v29 = vpop.eup %5182 }
 0xa72   :  { %v1200_v30 = vmul.f32 %v5183_v29, %v5390_v8  ;;  %v3815_v8 = vld [vmem:[%s6437_s4 + $0x198] sm:$0xff] }
 0xa73   :  { %v4945_v40 = vpack.c.bf16 %v3816_v39, %v3815_v8 }
 0xa75   :  { %4946 = vmatpush3.bf16.msra.mxu1 %v4945_v40 }
 0xa76   :  { %4947 = vmatprep.subr.bf16.mxu1 %v5209_v0 }
 0xacc   :  { %v1203_v34 = vpop.permute.xlu1 %1202 }
 0xacd   :  { %v1205_v35 = vadd.f32 %v1203_v34, %v1200_v30 }
 0xacf   :  { %1212 = vrot.lane.b32.xlu0 %v1205_v35, %s5213_s23 }
 0xad0   :  { %v1482_v8 = vpop.permute.xlu1 %1481 }
 0xb41   :  { %v1213_v36 = vpop.permute.xlu0 %1212 }
 0xb42   :  { %v1215_v37 = vsel %vm488_vm6, %v5531_v22, %v1213_v36  ;;  %v3817_v22 = vld [vmem:[%s6437_s4 + $0x1a8] sm:$0xff] }
 0xb43   :  { %4443 = vmatmul.mubr.msk.f32.vlgmr.msra.gmra.mrb[12].mxu0 %vm35_vm1, %v1215_v37  ;;  %v4948_v42 = vpack.c.bf16 %v3818_v41, %v3817_v22  ;;  %v3841_v36 = vld [vmem:[%s6437_s4 + $0x248] sm:$0xff]  ;;  %v3842_v37 = vld [vmem:[%s6437_s4 + $0x250] sm:$0xff] }
 0xb44   :  { %4447 = vmatprep.mubr.msk.f32.mxu0 %vm5210_vm0, %v5211_v3  ;;  %4446 = vmatpush3.msra.mxu0 %v3813_v38  ;;  %v4978_v38 = vpack.c.bf16 %v3842_v37, %v3841_v36  ;;  %v3871_v37 = vld [vmem:[%s6437_s4 + $0x2f8] sm:$0xff] }
 0xb45   :  { %4956 = vmatprep.subr.bf16.mxu0 %v5209_v0  ;;  %4949 = vmatpush3.bf16.msra.mxu1 %v4948_v42 }
 0xb46   :  { %4950 = vmatprep.subr.bf16.mxu1 %v5209_v0 }
 0xb49   :  { %4952 = vmatpush3.bf16.msra.mxu1 %v4951_v45 }
 0xb4a   :  { %4953 = vmatprep.subr.bf16.mxu1 %v5209_v0 }
 0xb4d   :  { %4955 = vmatpush3.bf16.msra.mxu1 %v4954_v54 }
 0xb4e   :  { %4968 = vmatprep.subr.bf16.mxu1 %v5209_v0 }
 0xc16   :  { %v1294_v48 = vpop.f32.mrb[12].mxu0 }
 0xc17   :  { %v1295_v49 = vadd.f32 %v3810_v46, %v1294_v48  ;;  %v4444_v50 = vpop.f32.mrb[13].mxu0 }
 0xc19   :  { %v5674_v51 = vmul.f32 %v3812_v47, %v1295_v49  ;;  %v3846_v49 = vld [vmem:[%s6437_s4 + $0x258] sm:$0xff] }
 0xc1b   :  { %4448 = vmatmul.mubr.msk.f32.vlgmr.msra.gmra.mrb[14].mxu0 %vm488_vm6, %v5674_v51 }
 0xc1c   :  { %4485 = vmatprep.mubr.msk.f32.mxu0 %vm5210_vm0, %v5211_v3  ;;  %4958 = vmatpush3.bf16.msra.mxu0 %v4957_v58  ;;  %v3850_v58 = vld [vmem:[%s6437_s4 + $0x270] sm:$0xff] }
 0xc1d   :  { %4959 = vmatprep.subr.bf16.mxu0 %v5209_v0 }
 0xc20   :  { %4961 = vmatpush3.bf16.msra.mxu0 %v4960_v61  ;;  %v4984_v61 = vpack.c.bf16 %v3851_v59, %v3850_v58  ;;  %v3877_v59 = vld [vmem:[%s6438_s5 + $0x7] ss:$0 sm:$0xff] }
 0xc21   :  { %4962 = vmatprep.subr.bf16.mxu0 %v5209_v0 }
 0xc24   :  { %4964 = vmatpush3.bf16.msra.mxu0 %v4963_v1  ;;  %v4987_v1 = vpack.c.bf16 %v3853_v63, %v3852_v62 }
 0xc25   :  { %4965 = vmatprep.subr.bf16.mxu0 %v5209_v0 }
 0xc28   :  { %4967 = vmatpush3.bf16.msra.mxu0 %v4966_v14  ;;  %v3863_v14 = vld [vmem:[%s6437_s4 + $0x2c0] sm:$0xff] }
 0xc29   :  { %4507 = vmatprep.subr.mxu0 %v5211_v3  ;;  %v4999_v16 = vpack.c.bf16 %v3864_v15, %v3863_v14  ;;  %v3891_v14 = vld [vmem:[%s6437_s4 + $0x340] sm:$0xff] }
 0xcee   :  { %v1374_v6 = vpop.f32.mrb[14].mxu0 }
 0xcef   :  { %v1375_v7 = vadd.f32 %v1374_v6, %v5715_v5  ;;  %v4449_v9 = vpop.f32.mrb[15].mxu0  ;;  %v3859_v6 = vld [vmem:[%s6437_s4 + $0x2a0] sm:$0xff] }
 0xcf0   :  { %v3861_v9 = vld [vmem:[%s6437_s4 + $0x2b0] sm:$0xff] }
 0xcf1   :  { %vm1378_vm14 = vcmp.ge.f32.partialorder %v1375_v7, 0.0  ;;  %v1379_v11 = vmul.f32 0.01, %v1375_v7 }
 0xcf3   :  { %v1380_v12 = vsel %vm1378_vm14, %v1375_v7, %v1379_v11  ;;  %v3860_v7 = vld [vmem:[%s6437_s4 + $0x2a8] sm:$0xff] }
 0xcf4   :  { %4467 = vmatmul.mubr.msk.f32.vlgmr.msra.gmra.mrb[14].mxu1 %vm580_vm8, %v1380_v12  ;;  %v4993_v11 = vpack.c.bf16 %v3860_v7, %v3859_v6  ;;  %v3862_v12 = vld [vmem:[%s6437_s4 + $0x2b8] sm:$0xff] }
 0xcf5   :  { %4504 = vmatprep.mubr.msk.f32.mxu1 %vm5210_vm0, %v5211_v3  ;;  %4970 = vmatpush3.bf16.msra.mxu1 %v4969_v18  ;;  %v4996_v32 = vpack.c.bf16 %v3862_v12, %v3861_v9  ;;  %v3886_v12 = vld [vmem:[%s6437_s4 + $0x320] sm:$0xff] }
 0xcf6   :  { %4971 = vmatprep.subr.bf16.mxu1 %v5209_v0 }
 0xcf9   :  { %4973 = vmatpush3.bf16.msra.mxu1 %v4972_v20 }
 0xcfa   :  { %4974 = vmatprep.subr.bf16.mxu1 %v5209_v0 }
 0xcfd   :  { %4976 = vmatpush3.bf16.msra.mxu1 %v4975_v24  ;;  %v3865_v24 = vld [vmem:[%s6437_s4 + $0x2d0] sm:$0xff] }
 0xcfe   :  { %4977 = vmatprep.subr.bf16.mxu1 %v5209_v0 }
 0xd01   :  { %4979 = vmatpush3.bf16.msra.mxu1 %v4978_v38 }
 0xd02   :  { %4992 = vmatprep.subr.bf16.mxu1 %v5209_v0 }
 0xdc7   :  { %v1466_v27 = vpop.f32.mrb[14].mxu1 }
 0xdc8   :  { %v1467_v29 = vadd.f32 %v3824_v60, %v1466_v27  ;;  %v4468_v30 = vpop.f32.mrb[15].mxu1  ;;  %v3866_v27 = vld [vmem:[%s6437_s4 + $0x2d8] sm:$0xff] }
 0xdc9   :  { %v3868_v30 = vld [vmem:[%s6437_s4 + $0x2e0] sm:$0xff] }
 0xdca   :  { %vm1470_vm15 = vcmp.ge.f32.partialorder %v1467_v29, 0.0  ;;  %v1471_v34 = vmul.f32 0.01, %v1467_v29 }
 0xdcc   :  { %v1472_v35 = vsel %vm1470_vm15, %v1467_v29, %v1471_v34  ;;  %v5002_v29 = vpack.c.bf16 %v3866_v27, %v3865_v24  ;;  %v3869_v34 = vld [vmem:[%s6437_s4 + $0x2e8] sm:$0xff] }
 0xdcd   :  { %4486 = vmatmul.mubr.msk.f32.vlgmr.msra.gmra.mrb[16].mxu0 %vm580_vm8, %v1472_v35  ;;  %v3870_v35 = vld [vmem:[%s6437_s4 + $0x2f0] sm:$0xff]  ;;  %v5005_v36 = vpack.c.bf16 %v3869_v34, %v3868_v30  ;;  %v3895_v30 = vld [vmem:[%s6437_s4 + $0x360] sm:$0xff] }
 0xdce   :  { %4509 = vmatprep.mubr.msk.f32.mxu0 %vm5210_vm0, %v5211_v3  ;;  %4508 = vmatpush3.msra.mxu0 %v3846_v49  ;;  %v5008_v38 = vpack.c.bf16 %v3871_v37, %v3870_v35  ;;  %v3899_v35 = vld [vmem:[%s6437_s4 + $0x368] sm:$0xff]  ;;  %v3901_v37 = vld [vmem:[%s6437_s4 + $0x378] sm:$0xff] }
 0xdcf   :  { %4980 = vmatprep.subr.bf16.mxu0 %v5209_v0 }
 0xea0   :  { %v1553_v39 = vpop.f32.mrb[16].mxu0 }
 0xea1   :  { %v1554_v22 = vadd.f32 %v1553_v39, %v1482_v8  ;;  %v4487_v40 = vpop.f32.mrb[17].mxu0  ;;  %v3872_v8 = vld [vmem:[%s6437_s4 + $0x300] sm:$0xff]  ;;  %v3873_v39 = vld [vmem:[%s6437_s4 + $0x308] sm:$0xff] }
 0xea3   :  { %vm1557_vm2 = vcmp.ge.f32.partialorder %v1554_v22, 0.0  ;;  %v1558_v41 = vmul.f32 0.01, %v1554_v22 }
 0xea5   :  { %v1559_v42 = vsel %vm1557_vm2, %v1554_v22, %v1558_v41  ;;  %v5011_v22 = vpack.c.bf16 %v3873_v39, %v3872_v8  ;;  %v3902_v8 = vld [vmem:[%s6437_s4 + $0x380] sm:$0xff]  ;;  %v3897_v39 = vld [vmem:[%s6438_s5 + $0x8] ss:$0 sm:$0xff] }
 0xea6   :  { %4505 = vmatmul.mubr.msk.f32.vlgmr.msra.gmra.mrb[16].mxu1 %vm580_vm8, %v1559_v42 }
 0xea7   :  { %4547 = vmatprep.mubr.msk.f32.mxu1 %vm5210_vm0, %v5211_v3  ;;  %4994 = vmatpush3.bf16.msra.mxu1 %v4993_v11 }
 0xea8   :  { %4995 = vmatprep.subr.bf16.mxu1 %v5209_v0 }
 0xeab   :  { %4997 = vmatpush3.bf16.msra.mxu1 %v4996_v32 }
 0xeac   :  { %4998 = vmatprep.subr.bf16.mxu1 %v5209_v0 }
 0xeaf   :  { %5000 = vmatpush3.bf16.msra.mxu1 %v4999_v16  ;;  %v3892_v16 = vld [vmem:[%s6437_s4 + $0x348] sm:$0xff] }
 0xeb0   :  { %5001 = vmatprep.subr.bf16.mxu1 %v5209_v0 }
 0xeb3   :  { %5003 = vmatpush3.bf16.msra.mxu1 %v5002_v29  ;;  %v3894_v29 = vld [vmem:[%s6437_s4 + $0x358] sm:$0xff] }
 0xeb4   :  { %5016 = vmatprep.subr.bf16.mxu1 %v5209_v0  ;;  %v5029_v34 = vpack.c.bf16 %v3895_v30, %v3894_v29 }
 0xf79   :  { %v1644_v44 = vpop.f32.mrb[16].mxu1 }
 0xf7a   :  { %v1645_v45 = vadd.f32 %v3844_v43, %v1644_v44  ;;  %v4506_v46 = vpop.f32.mrb[17].mxu1 }
 0xf7b   :  { %v3875_v46 = vld [vmem:[%s6437_s4 + $0x318] sm:$0xff] }
 0xf7c   :  { %5184 = vtanh.f32 %v1645_v45 }
 0xf86   :  { %v5765_v47 = vpop.eup %5184 }
 0xf87   :  { %v1649_v48 = vmul.f32 1.442695, %v5765_v47 }
 0xf89   :  { %5186 = vpow2.f32 %v1649_v48 }
 0xf93   :  { %v5187_v50 = vpop.eup %5186 }
 0xf94   :  { %1652 = vrot.lane.b32.xlu0 %v5187_v50, %s5213_s23 }
 0xf98   :  { %1667 = vrot.lane.b32.xlu0 %v5715_v5, %s5212_s11  ;;  %v4990_v5 = vpack.c.bf16 %v3855_v4, %v3854_v2 }
0x1006   :  { %v1653_v52 = vpop.permute.xlu0 %1652 }
0x1007   :  { %v1655_v53 = vmul.f32 %v1653_v52, %v5674_v51 }
0x1009   :  { %v1656_v54 = vadd.f32 %v1655_v53, %v1645_v45  ;;  %v3874_v45 = vld [vmem:[%s6437_s4 + $0x310] sm:$0xff] }
0x100a   :  { %v1668_v17 = vpop.permute.xlu0 %1667  ;;  %v5014_v48 = vpack.c.bf16 %v3875_v46, %v3874_v45 }
0x100b   :  { %1664 = vrot.lane.b32.xlu1 %v1656_v54, %s5214_s24 }
0x100f   :  { %1845 = vrot.lane.b32.xlu1 %v3857_v13, %s5212_s11 }
0x107d   :  { %v5789_v60 = vpop.permute.xlu1 %1664 }
0x107e   :  { %4510 = vmatmul.mubr.msk.f32.vlgmr.msra.gmra.mrb[18].mxu0 %vm488_vm6, %v5789_v60 }
0x107f   :  { %4982 = vmatpush3.bf16.msra.mxu0 %v4981_v57  ;;  %4528 = vmatprep.mubr.msk.f32.mxu0 %vm5210_vm0, %v5211_v3  ;;  %v3880_v57 = vld [vmem:[%s6436_s6 + $0x20] sm:$0xff] }
0x1080   :  { %4983 = vmatprep.subr.bf16.mxu0 %v5209_v0  ;;  %v5017_v58 = vpack.c.bf16 %v3880_v57, %v3879_v56  ;;  %v3910_v56 = vld [vmem:[%s6437_s4 + $0x3b8] sm:$0xff] }
0x1081   :  { %v1846_v49 = vpop.permute.xlu1 %1845 }
0x1083   :  { %4985 = vmatpush3.bf16.msra.mxu0 %v4984_v61 }
0x1084   :  { %4986 = vmatprep.subr.bf16.mxu0 %v5209_v0 }
0x1087   :  { %4988 = vmatpush3.bf16.msra.mxu0 %v4987_v1 }
0x1088   :  { %4989 = vmatprep.subr.bf16.mxu0 %v5209_v0 }
0x108b   :  { %4991 = vmatpush3.bf16.msra.mxu0 %v4990_v5 }
0x108c   :  { %5004 = vmatprep.subr.bf16.mxu0 %v5209_v0 }
0x1151   :  { %v1738_v18 = vpop.f32.mrb[18].mxu0 }
0x1152   :  { %v1739_v19 = vadd.f32 %v1738_v18, %v1668_v17  ;;  %v4511_v20 = vpop.f32.mrb[19].mxu0  ;;  %v3893_v17 = vld [vmem:[%s6437_s4 + $0x350] sm:$0xff] }
0x1153   :  { %v5026_v18 = vpack.c.bf16 %v3893_v17, %v3892_v16  ;;  %v3885_v20 = vld [vmem:[%s6436_s6 + $0x41] ss:$0 sm:$0xff]  ;;  %v3917_v16 = vld [vmem:[%s6438_s5 + $0x9] ss:$0 sm:$0xff] }
0x1154   :  { %vm1742_vm3 = vcmp.ge.f32.partialorder %v1739_v19, 0.0  ;;  %v1743_v21 = vmul.f32 0.01, %v1739_v19 }
0x1156   :  { %v1744_v23 = vsel %vm1742_vm3, %v1739_v19, %v1743_v21  ;;  %v3883_v19 = vld [vmem:[%s6436_s6 + $0x40] ss:$0 sm:$0xff] }
0x1157   :  { %4529 = vmatmul.mubr.msk.f32.vlgmr.msra.gmra.mrb[20].mxu0 %vm580_vm8, %v1744_v23 }
0x1158   :  { %4566 = vmatprep.mubr.msk.f32.mxu0 %vm5210_vm0, %v5211_v3  ;;  %5006 = vmatpush3.bf16.msra.mxu0 %v5005_v36  ;;  %v3900_v36 = vld [vmem:[%s6437_s4 + $0x370] sm:$0xff] }
0x1159   :  { %5007 = vmatprep.subr.bf16.mxu0 %v5209_v0 }
0x115c   :  { %5009 = vmatpush3.bf16.msra.mxu0 %v5008_v38  ;;  %v5032_v38 = vpack.c.bf16 %v3900_v36, %v3899_v35  ;;  %v3921_v35 = vld [vmem:[%s6437_s4 + $0x3f0] sm:$0xff]  ;;  %v3922_v36 = vld [vmem:[%s6437_s4 + $0x3f8] sm:$0xff] }
0x115d   :  { %5010 = vmatprep.subr.bf16.mxu0 %v5209_v0 }
0x1160   :  { %5012 = vmatpush3.bf16.msra.mxu0 %v5011_v22  ;;  %v5035_v22 = vpack.c.bf16 %v3902_v8, %v3901_v37  ;;  %v5056_v37 = vpack.c.bf16 %v3922_v36, %v3921_v35  ;;  %v3924_v8 = vld [vmem:[%s6437_s4 + $0x408] sm:$0xff]  ;;  %v3952_v36 = vld [vmem:[%s6436_s6 + $0x30] sm:$0xff] }
0x1161   :  { %5013 = vmatprep.subr.bf16.mxu0 %v5209_v0 }
0x1164   :  { %5015 = vmatpush3.bf16.msra.mxu0 %v5014_v48 }
0x1165   :  { %5019 = vmatprep.subr.bf16.mxu0 %v5209_v0 }
0x122a   :  { %v1830_v40 = vpop.f32.mrb[20].mxu0 }
0x122b   :  { %v1831_v41 = vadd.f32 %v3857_v13, %v1830_v40  ;;  %v4530_v42 = vpop.f32.mrb[21].mxu0  ;;  %v3889_v13 = vld [vmem:[%s6437_s4 + $0x330] sm:$0xff]  ;;  %v3903_v40 = vld [vmem:[%s6437_s4 + $0x388] sm:$0xff] }
0x122d   :  { %vm1834_vm4 = vcmp.ge.f32.partialorder %v1831_v41, 0.0  ;;  %v1835_v43 = vmul.f32 0.01, %v1831_v41 }
0x122f   :  { %v1836_v44 = vsel %vm1834_vm4, %v1831_v41, %v1835_v43  ;;  %v3904_v41 = vld [vmem:[%s6437_s4 + $0x390] sm:$0xff]  ;;  %v314_v43 = vsub.s32 2, %v5438_v26 }
0x1230   :  { %4548 = vmatmul.mubr.msk.f32.vlgmr.msra.gmra.mrb[18].mxu1 %vm580_vm8, %v1836_v44  ;;  %v5038_v42 = vpack.c.bf16 %v3904_v41, %v3903_v40  ;;  %v3925_v40 = vld [vmem:[%s6437_s4 + $0x410] sm:$0xff]  ;;  %v3926_v41 = vld [vmem:[%s6437_s4 + $0x418] sm:$0xff] }
0x1231   :  { %4573 = vmatprep.mubr.msk.f32.mxu1 %vm5210_vm0, %v5211_v3  ;;  %5018 = vmatpush3.bf16.msra.mxu1 %v5017_v58  ;;  %v315_v44 = vrot.slane %v5444_v28, %v314_v43  ;;  %v3906_v28 = vld [vmem:[%s6437_s4 + $0x3a0] sm:$0xff] }
0x1232   :  { %4576 = vmatprep.subr.mxu1 %v5211_v3  ;;  %v3911_v58 = vld [vmem:[%s6437_s4 + $0x3c0] sm:$0xff] }
0x1233   :  { %v5973_v45 = vadd.f32 %v5447_v31, %v315_v44  ;;  %v3927_v43 = vld [vmem:[%s6437_s4 + $0x420] sm:$0xff]  ;;  %v3928_v44 = vld [vmem:[%s6437_s4 + $0x428] sm:$0xff] }
0x1303   :  { %v1917_v50 = vpop.f32.mrb[18].mxu1 }
0x1304   :  { %v1918_v52 = vadd.f32 %v1917_v50, %v1846_v49  ;;  %v4549_v53 = vpop.f32.mrb[19].mxu1 }
0x1305   :  { %v3905_v53 = vld [vmem:[%s6437_s4 + $0x398] sm:$0xff] }
0x1306   :  { %vm1921_vm5 = vcmp.ge.f32.partialorder %v1918_v52, 0.0  ;;  %v1922_v54 = vmul.f32 0.01, %v1918_v52  ;;  %v5041_v31 = vpack.c.bf16 %v3906_v28, %v3905_v53  ;;  %v3930_v53 = vld [vmem:[%s6438_s5 + $0xa] ss:$0 sm:$0xff] }
0x1308   :  { %v1923_v55 = vsel %vm1921_vm5, %v1918_v52, %v1922_v54  ;;  %v3908_v54 = vld [vmem:[%s6437_s4 + $0x3a8] sm:$0xff] }
0x1309   :  { %4567 = vmatmul.mubr.msk.f32.vlgmr.msra.gmra.mrb[22].mxu0 %vm580_vm8, %v1923_v55  ;;  %v3909_v55 = vld [vmem:[%s6437_s4 + $0x3b0] sm:$0xff] }
0x130a   :  { %4597 = vmatprep.mubr.msk.f32.mxu0 %vm5210_vm0, %v5211_v3  ;;  %v5044_v57 = vpack.c.bf16 %v3909_v55, %v3908_v54  ;;  %v3937_v54 = vld [vmem:[%s6437_s4 + $0x458] sm:$0xff] }
0x13dc   :  { %v2008_v61 = vpop.f32.mrb[22].mxu0 }
0x13dd   :  { %v2009_v62 = vadd.f32 %v3877_v59, %v2008_v61  ;;  %v4568_v63 = vpop.f32.mrb[23].mxu0  ;;  %v5047_v59 = vpack.c.bf16 %v3911_v58, %v3910_v56  ;;  %v3912_v61 = vld [vmem:[%s6437_s4 + $0x3c8] sm:$0xff] }
0x13df   :  { %2017 = vrot.lane.b32.xlu0 %v2009_v62, %s5214_s24  ;;  %5188 = vtanh.f32 %v2009_v62  ;;  %v3913_v62 = vld [vmem:[%s6437_s4 + $0x3d0] sm:$0xff] }
0x13e0   :  { %v5050_v63 = vpack.c.bf16 %v3913_v62, %v3912_v61 }
0x13e3   :  { %2296 = vrot.lane.b32.xlu0 %v3897_v39, %s5212_s11 }
0x13e9   :  { %v5891_v1 = vpop.eup %5188 }
0x13ea   :  { %v2013_v2 = vmul.f32 1.442695, %v5891_v1 }
0x13ec   :  { %5190 = vpow2.f32 %v2013_v2 }
0x13f6   :  { %v5191_v4 = vpop.eup %5190 }
0x13f7   :  { %v2015_v5 = vmul.f32 %v5191_v4, %v5674_v51  ;;  %v3888_v51 = vld [vmem:[%s6437_s4 + $0x328] sm:$0xff] }
0x13f8   :  { %v5020_v32 = vpack.c.bf16 %v3889_v13, %v3888_v51 }
0x13fa   :  { %5021 = vmatpush3.bf16.msra.mxu0 %v5020_v32 }
0x13fb   :  { %5022 = vmatprep.subr.bf16.mxu0 %v5209_v0 }
0x1451   :  { %v2018_v6 = vpop.permute.xlu0 %2017 }
0x1452   :  { %v2020_v7 = vadd.f32 %v2018_v6, %v2015_v5 }
0x1454   :  { %2027 = vrot.lane.b32.xlu1 %v2020_v7, %s5213_s23 }
0x1455   :  { %v2297_v51 = vpop.permute.xlu0 %2296 }
0x14c6   :  { %v2028_v9 = vpop.permute.xlu1 %2027 }
0x14c7   :  { %v2030_v11 = vsel %vm488_vm6, %v5789_v60, %v2028_v9  ;;  %v3890_v60 = vld [vmem:[%s6437_s4 + $0x338] sm:$0xff] }
0x14c8   :  { %4574 = vmatmul.mubr.msk.f32.vlgmr.msra.gmra.mrb[20].mxu1 %vm35_vm1, %v2030_v11  ;;  %v5023_v15 = vpack.c.bf16 %v3891_v14, %v3890_v60  ;;  %v3914_v9 = vld [vmem:[%s6437_s4 + $0x3d8] sm:$0xff]  ;;  %v3915_v11 = vld [vmem:[%s6437_s4 + $0x3e0] sm:$0xff] }
0x14c9   :  { %4578 = vmatprep.mubr.msk.f32.mxu1 %vm5210_vm0, %v5211_v3  ;;  %4577 = vmatpush3.msra.mxu1 %v3886_v12  ;;  %v5053_v12 = vpack.c.bf16 %v3915_v11, %v3914_v9  ;;  %v3944_v11 = vld [vmem:[%s6437_s4 + $0x488] sm:$0xff] }
0x14ca   :  { %5031 = vmatprep.subr.bf16.mxu1 %v5209_v0  ;;  %5024 = vmatpush3.bf16.msra.mxu0 %v5023_v15 }
0x14cb   :  { %5025 = vmatprep.subr.bf16.mxu0 %v5209_v0 }
0x14ce   :  { %5027 = vmatpush3.bf16.msra.mxu0 %v5026_v18 }
0x14cf   :  { %5028 = vmatprep.subr.bf16.mxu0 %v5209_v0 }
0x14d2   :  { %5030 = vmatpush3.bf16.msra.mxu0 %v5029_v34 }
0x14d3   :  { %5043 = vmatprep.subr.bf16.mxu0 %v5209_v0 }
0x159b   :  { %v2109_v21 = vpop.f32.mrb[20].mxu1 }
0x159c   :  { %v2110_v23 = vadd.f32 %v3883_v19, %v2109_v21  ;;  %v4575_v24 = vpop.f32.mrb[21].mxu1 }
0x159e   :  { %v5932_v27 = vmul.f32 %v3885_v20, %v2110_v23  ;;  %v3919_v23 = vld [vmem:[%s6437_s4 + $0x3e8] sm:$0xff] }
0x15a0   :  { %4579 = vmatmul.mubr.msk.f32.vlgmr.msra.gmra.mrb[22].mxu1 %vm488_vm6, %v5932_v27 }
0x15a1   :  { %4616 = vmatprep.mubr.msk.f32.mxu1 %vm5210_vm0, %v5211_v3  ;;  %5033 = vmatpush3.bf16.msra.mxu1 %v5032_v38  ;;  %v3923_v38 = vld [vmem:[%s6437_s4 + $0x400] sm:$0xff] }
0x15a2   :  { %5034 = vmatprep.subr.bf16.mxu1 %v5209_v0 }
0x15a5   :  { %5036 = vmatpush3.bf16.msra.mxu1 %v5035_v22  ;;  %v5059_v22 = vpack.c.bf16 %v3924_v8, %v3923_v38  ;;  %v3950_v8 = vld [vmem:[%s6438_s5 + $0xb] ss:$0 sm:$0xff] }
0x15a6   :  { %5037 = vmatprep.subr.bf16.mxu1 %v5209_v0 }
0x15a9   :  { %5039 = vmatpush3.bf16.msra.mxu1 %v5038_v42  ;;  %v5062_v42 = vpack.c.bf16 %v3926_v41, %v3925_v40 }
0x15aa   :  { %5040 = vmatprep.subr.bf16.mxu1 %v5209_v0 }
0x15ad   :  { %5042 = vmatpush3.bf16.msra.mxu1 %v5041_v31  ;;  %v3936_v31 = vld [vmem:[%s6437_s4 + $0x450] sm:$0xff] }
0x15ae   :  { %4638 = vmatprep.subr.mxu1 %v5211_v3  ;;  %v5074_v55 = vpack.c.bf16 %v3937_v54, %v3936_v31  ;;  %v3964_v31 = vld [vmem:[%s6437_s4 + $0x4d0] sm:$0xff] }
0x1673   :  { %v2189_v46 = vpop.f32.mrb[22].mxu1 }
0x1674   :  { %v2190_v48 = vadd.f32 %v2189_v46, %v5973_v45  ;;  %v4580_v49 = vpop.f32.mrb[23].mxu1  ;;  %v3932_v46 = vld [vmem:[%s6437_s4 + $0x430] sm:$0xff] }
0x1675   :  { %v3934_v49 = vld [vmem:[%s6437_s4 + $0x440] sm:$0xff] }
0x1676   :  { %vm2193_vm7 = vcmp.ge.f32.partialorder %v2190_v48, 0.0  ;;  %v2194_v50 = vmul.f32 0.01, %v2190_v48 }
0x1678   :  { %v2195_v52 = vsel %vm2193_vm7, %v2190_v48, %v2194_v50  ;;  %v3933_v48 = vld [vmem:[%s6437_s4 + $0x438] sm:$0xff] }
0x1679   :  { %4598 = vmatmul.mubr.msk.f32.vlgmr.msra.gmra.mrb[24].mxu0 %vm580_vm8, %v2195_v52  ;;  %v5068_v50 = vpack.c.bf16 %v3933_v48, %v3932_v46  ;;  %v3935_v52 = vld [vmem:[%s6437_s4 + $0x448] sm:$0xff] }
0x167a   :  { %4635 = vmatprep.mubr.msk.f32.mxu0 %vm5210_vm0, %v5211_v3  ;;  %5045 = vmatpush3.bf16.msra.mxu0 %v5044_v57  ;;  %v5071_v28 = vpack.c.bf16 %v3935_v52, %v3934_v49  ;;  %v3959_v52 = vld [vmem:[%s6437_s4 + $0x4b0] sm:$0xff] }
0x167b   :  { %5046 = vmatprep.subr.bf16.mxu0 %v5209_v0 }
0x167e   :  { %5048 = vmatpush3.bf16.msra.mxu0 %v5047_v59 }
0x167f   :  { %5049 = vmatprep.subr.bf16.mxu0 %v5209_v0 }
0x1682   :  { %5051 = vmatpush3.bf16.msra.mxu0 %v5050_v63  ;;  %v3938_v63 = vld [vmem:[%s6437_s4 + $0x460] sm:$0xff] }
0x1683   :  { %5052 = vmatprep.subr.bf16.mxu0 %v5209_v0 }
0x1686   :  { %5054 = vmatpush3.bf16.msra.mxu0 %v5053_v12 }
0x1687   :  { %5067 = vmatprep.subr.bf16.mxu0 %v5209_v0 }
0x174c   :  { %v2281_v2 = vpop.f32.mrb[24].mxu0 }
0x174d   :  { %v2282_v4 = vadd.f32 %v3897_v39, %v2281_v2  ;;  %v4599_v5 = vpop.f32.mrb[25].mxu0  ;;  %v3939_v2 = vld [vmem:[%s6437_s4 + $0x468] sm:$0xff] }
0x174e   :  { %v3941_v5 = vld [vmem:[%s6437_s4 + $0x470] sm:$0xff] }
0x174f   :  { %vm2285_vm9 = vcmp.ge.f32.partialorder %v2282_v4, 0.0  ;;  %v2286_v6 = vmul.f32 0.01, %v2282_v4 }
0x1751   :  { %v2287_v7 = vsel %vm2285_vm9, %v2282_v4, %v2286_v6  ;;  %v5077_v4 = vpack.c.bf16 %v3939_v2, %v3938_v63  ;;  %v3942_v6 = vld [vmem:[%s6437_s4 + $0x478] sm:$0xff] }
0x1752   :  { %4617 = vmatmul.mubr.msk.f32.vlgmr.msra.gmra.mrb[24].mxu1 %vm580_vm8, %v2287_v7  ;;  %v3943_v7 = vld [vmem:[%s6437_s4 + $0x480] sm:$0xff]  ;;  %v5080_v9 = vpack.c.bf16 %v3942_v6, %v3941_v5  ;;  %v3968_v5 = vld [vmem:[%s6437_s4 + $0x4f0] sm:$0xff] }
0x1753   :  { %4640 = vmatprep.mubr.msk.f32.mxu1 %vm5210_vm0, %v5211_v3  ;;  %4639 = vmatpush3.msra.mxu1 %v3919_v23  ;;  %v5083_v12 = vpack.c.bf16 %v3944_v11, %v3943_v7  ;;  %v3972_v7 = vld [vmem:[%s6437_s4 + $0x4f8] sm:$0xff]  ;;  %v3974_v11 = vld [vmem:[%s6437_s4 + $0x508] sm:$0xff] }
0x1754   :  { %5055 = vmatprep.subr.bf16.mxu1 %v5209_v0 }
0x1825   :  { %v2368_v13 = vpop.f32.mrb[24].mxu1 }
0x1826   :  { %v2369_v60 = vadd.f32 %v2368_v13, %v2297_v51  ;;  %v4618_v32 = vpop.f32.mrb[25].mxu1  ;;  %v3945_v51 = vld [vmem:[%s6437_s4 + $0x490] sm:$0xff]  ;;  %v3946_v13 = vld [vmem:[%s6437_s4 + $0x498] sm:$0xff] }
0x1828   :  { %vm2372_vm10 = vcmp.ge.f32.partialorder %v2369_v60, 0.0  ;;  %v2373_v14 = vmul.f32 0.01, %v2369_v60 }
0x182a   :  { %v2374_v15 = vsel %vm2372_vm10, %v2369_v60, %v2373_v14  ;;  %v5086_v60 = vpack.c.bf16 %v3946_v13, %v3945_v51  ;;  %v3975_v51 = vld [vmem:[%s6437_s4 + $0x510] sm:$0xff]  ;;  %v3970_v13 = vld [vmem:[%s6438_s5 + $0xc] ss:$0 sm:$0xff] }
0x182b   :  { %4636 = vmatmul.mubr.msk.f32.vlgmr.msra.gmra.mrb[26].mxu0 %vm580_vm8, %v2374_v15 }
0x182c   :  { %4678 = vmatprep.mubr.msk.f32.mxu0 %vm5210_vm0, %v5211_v3  ;;  %5069 = vmatpush3.bf16.msra.mxu0 %v5068_v50 }
0x182d   :  { %5070 = vmatprep.subr.bf16.mxu0 %v5209_v0 }
0x1830   :  { %5072 = vmatpush3.bf16.msra.mxu0 %v5071_v28 }
0x1831   :  { %5073 = vmatprep.subr.bf16.mxu0 %v5209_v0 }
0x1834   :  { %5075 = vmatpush3.bf16.msra.mxu0 %v5074_v55  ;;  %v3965_v55 = vld [vmem:[%s6437_s4 + $0x4d8] sm:$0xff] }
0x1835   :  { %5076 = vmatprep.subr.bf16.mxu0 %v5209_v0 }
0x1838   :  { %5078 = vmatpush3.bf16.msra.mxu0 %v5077_v4  ;;  %v3967_v4 = vld [vmem:[%s6437_s4 + $0x4e8] sm:$0xff] }
0x1839   :  { %5091 = vmatprep.subr.bf16.mxu0 %v5209_v0  ;;  %v5104_v6 = vpack.c.bf16 %v3968_v5, %v3967_v4 }
0x18fe   :  { %v2459_v17 = vpop.f32.mrb[26].mxu0 }
0x18ff   :  { %v2460_v18 = vadd.f32 %v3917_v16, %v2459_v17  ;;  %v4637_v19 = vpop.f32.mrb[27].mxu0 }
0x1900   :  { %v3948_v19 = vld [vmem:[%s6437_s4 + $0x4a8] sm:$0xff] }
0x1901   :  { %5192 = vtanh.f32 %v2460_v18 }
0x190b   :  { %v6023_v20 = vpop.eup %5192 }
0x190c   :  { %v2464_v21 = vmul.f32 1.442695, %v6023_v20 }
0x190e   :  { %5194 = vpow2.f32 %v2464_v21 }
0x1918   :  { %v5195_v24 = vpop.eup %5194 }
0x1919   :  { %2467 = vrot.lane.b32.xlu1 %v5195_v24, %s5213_s23 }
0x191d   :  { %2482 = vrot.lane.b32.xlu1 %v5973_v45, %s5212_s11  ;;  %v5065_v45 = vpack.c.bf16 %v3928_v44, %v3927_v43 }
0x198b   :  { %v2468_v29 = vpop.permute.xlu1 %2467 }
0x198c   :  { %v2470_v30 = vmul.f32 %v2468_v29, %v5932_v27 }
0x198e   :  { %v2471_v34 = vadd.f32 %v2470_v30, %v2460_v18  ;;  %v3947_v18 = vld [vmem:[%s6437_s4 + $0x4a0] sm:$0xff] }
0x198f   :  { %v2483_v56 = vpop.permute.xlu1 %2482  ;;  %v5089_v21 = vpack.c.bf16 %v3948_v19, %v3947_v18 }
0x1990   :  { %2479 = vrot.lane.b32.xlu0 %v2471_v34, %s5214_s24 }
0x1994   :  { %2660 = vrot.lane.b32.xlu0 %v3930_v53, %s5212_s11 }
0x1a02   :  { %v6047_v39 = vpop.permute.xlu0 %2479 }
0x1a03   :  { %4641 = vmatmul.mubr.msk.f32.vlgmr.msra.gmra.mrb[26].mxu1 %vm488_vm6, %v6047_v39 }
0x1a04   :  { %5057 = vmatpush3.bf16.msra.mxu1 %v5056_v37  ;;  %4659 = vmatprep.mubr.msk.f32.mxu1 %vm5210_vm0, %v5211_v3  ;;  %v3953_v37 = vld [vmem:[%s6436_s6 + $0x38] sm:$0xff] }
0x1a05   :  { %5058 = vmatprep.subr.bf16.mxu1 %v5209_v0  ;;  %v5092_v38 = vpack.c.bf16 %v3953_v37, %v3952_v36  ;;  %v3982_v36 = vld [vmem:[%s6437_s4 + $0x540] sm:$0xff]  ;;  %v3983_v37 = vld [vmem:[%s6437_s4 + $0x548] sm:$0xff] }
0x1a06   :  { %v2661_v23 = vpop.permute.xlu0 %2660 }
0x1a08   :  { %5060 = vmatpush3.bf16.msra.mxu1 %v5059_v22 }
0x1a09   :  { %5061 = vmatprep.subr.bf16.mxu1 %v5209_v0 }
0x1a0c   :  { %5063 = vmatpush3.bf16.msra.mxu1 %v5062_v42 }
0x1a0d   :  { %5064 = vmatprep.subr.bf16.mxu1 %v5209_v0 }
0x1a10   :  { %5066 = vmatpush3.bf16.msra.mxu1 %v5065_v45 }
0x1a11   :  { %5079 = vmatprep.subr.bf16.mxu1 %v5209_v0 }
0x1ad6   :  { %v2553_v57 = vpop.f32.mrb[26].mxu1 }
0x1ad7   :  { %v2554_v58 = vadd.f32 %v2553_v57, %v2483_v56  ;;  %v4642_v59 = vpop.f32.mrb[27].mxu1  ;;  %v3966_v56 = vld [vmem:[%s6437_s4 + $0x4e0] sm:$0xff] }
0x1ad8   :  { %v5101_v57 = vpack.c.bf16 %v3966_v56, %v3965_v55  ;;  %v3958_v59 = vld [vmem:[%s6436_s6 + $0x59] ss:$0 sm:$0xff]  ;;  %v3990_v56 = vld [vmem:[%s6438_s5 + $0xd] ss:$0 sm:$0xff] }
0x1ad9   :  { %vm2557_vm11 = vcmp.ge.f32.partialorder %v2554_v58, 0.0  ;;  %v2558_v61 = vmul.f32 0.01, %v2554_v58 }
0x1adb   :  { %v2559_v62 = vsel %vm2557_vm11, %v2554_v58, %v2558_v61  ;;  %v3956_v58 = vld [vmem:[%s6436_s6 + $0x58] ss:$0 sm:$0xff] }
0x1adc   :  { %4660 = vmatmul.mubr.msk.f32.vlgmr.msra.gmra.mrb[28].mxu1 %vm580_vm8, %v2559_v62 }
0x1add   :  { %4697 = vmatprep.mubr.msk.f32.mxu1 %vm5210_vm0, %v5211_v3  ;;  %5081 = vmatpush3.bf16.msra.mxu1 %v5080_v9  ;;  %v3973_v9 = vld [vmem:[%s6437_s4 + $0x500] sm:$0xff] }
0x1ade   :  { %5082 = vmatprep.subr.bf16.mxu1 %v5209_v0 }
0x1ae1   :  { %5084 = vmatpush3.bf16.msra.mxu1 %v5083_v12  ;;  %v5107_v12 = vpack.c.bf16 %v3973_v9, %v3972_v7  ;;  %v3994_v9 = vld [vmem:[%s6437_s4 + $0x580] sm:$0xff] }
0x1ae2   :  { %5085 = vmatprep.subr.bf16.mxu1 %v5209_v0 }
0x1ae5   :  { %5087 = vmatpush3.bf16.msra.mxu1 %v5086_v60  ;;  %v5110_v60 = vpack.c.bf16 %v3975_v51, %v3974_v11  ;;  %v3995_v11 = vld [vmem:[%s6437_s4 + $0x588] sm:$0xff]  ;;  %v3996_v51 = vld [vmem:[%s6437_s4 + $0x590] sm:$0xff] }
0x1ae6   :  { %5088 = vmatprep.subr.bf16.mxu1 %v5209_v0 }
0x1ae9   :  { %5090 = vmatpush3.bf16.msra.mxu1 %v5089_v21 }
0x1aea   :  { %5094 = vmatprep.subr.bf16.mxu1 %v5209_v0 }
0x1baf   :  { %v2645_v32 = vpop.f32.mrb[28].mxu1 }
0x1bb0   :  { %v2646_v14 = vadd.f32 %v3930_v53, %v2645_v32  ;;  %v4661_v15 = vpop.f32.mrb[29].mxu1  ;;  %v3962_v53 = vld [vmem:[%s6437_s4 + $0x4c0] sm:$0xff]  ;;  %v3976_v32 = vld [vmem:[%s6437_s4 + $0x518] sm:$0xff] }
0x1bb2   :  { %vm2649_vm12 = vcmp.ge.f32.partialorder %v2646_v14, 0.0  ;;  %v2650_v16 = vmul.f32 0.01, %v2646_v14 }
0x1bb4   :  { %v2651_v17 = vsel %vm2649_vm12, %v2646_v14, %v2650_v16  ;;  %v3977_v14 = vld [vmem:[%s6437_s4 + $0x520] sm:$0xff]  ;;  %v318_v16 = vsub.s32 3, %v5438_v26  ;;  %v3978_v26 = vld [vmem:[%s6437_s4 + $0x528] sm:$0xff] }
0x1bb5   :  { %4679 = vmatmul.mubr.msk.f32.vlgmr.msra.gmra.mrb[28].mxu0 %vm580_vm8, %v2651_v17  ;;  %v5113_v15 = vpack.c.bf16 %v3977_v14, %v3976_v32  ;;  %v5208_v17 = vld [vmem:[%s6434_s3 + $0x80] ss:$8 sm:$0xf] }
0x1bb6   :  { %4704 = vmatprep.mubr.msk.f32.mxu0 %vm5210_vm0, %v5211_v3  ;;  %5093 = vmatpush3.bf16.msra.mxu0 %v5092_v38  ;;  %v319_v18 = vrot.slane %v5208_v17, %v318_v16  ;;  %v3998_v14 = vld [vmem:[%s6437_s4 + $0x5a0] sm:$0xff]  ;;  %v4000_v17 = vld [vmem:[%s6437_s4 + $0x5b0] sm:$0xff] }
0x1bb7   :  { %4707 = vmatprep.subr.mxu0 %v5211_v3 }
0x1bb8   :  { %v6233_v19 = vadd.f32 %v5451_v33, %v319_v18  ;;  %v3979_v33 = vld [vmem:[%s6437_s4 + $0x530] sm:$0xff]  ;;  %v4001_v18 = vld [vmem:[%s6437_s4 + $0x5b8] sm:$0xff] }
0x1c88   :  { %v2732_v24 = vpop.f32.mrb[28].mxu0 }
0x1c89   :  { %v2733_v29 = vadd.f32 %v2732_v24, %v2661_v23  ;;  %v4680_v30 = vpop.f32.mrb[29].mxu0 }
0x1c8b   :  { %vm2736_vm13 = vcmp.ge.f32.partialorder %v2733_v29, 0.0  ;;  %v2737_v34 = vmul.f32 0.01, %v2733_v29 }
0x1c8d   :  { %v2738_v35 = vsel %vm2736_vm13, %v2733_v29, %v2737_v34  ;;  %v5116_v34 = vpack.c.bf16 %v3979_v33, %v3978_v26  ;;  %v4003_v26 = vld [vmem:[%s6438_s5 + $0xe] ss:$0 sm:$0xff] }
0x1c8e   :  { %4698 = vmatmul.mubr.msk.f32.vlgmr.msra.gmra.mrb[30].mxu1 %vm580_vm8, %v2738_v35  ;;  %v3981_v35 = vld [vmem:[%s6437_s4 + $0x538] sm:$0xff] }
0x1c8f   :  { %4728 = vmatprep.mubr.msk.f32.mxu1 %vm5210_vm0, %v5211_v3  ;;  %v5119_v38 = vpack.c.bf16 %v3982_v36, %v3981_v35  ;;  %v4010_v35 = vld [vmem:[%s6437_s4 + $0x5e8] sm:$0xff] }
0x1d61   :  { %v2823_v22 = vpop.f32.mrb[30].mxu1 }
0x1d62   :  { %v2824_v40 = vadd.f32 %v3950_v8, %v2823_v22  ;;  %v4699_v41 = vpop.f32.mrb[31].mxu1  ;;  %v3984_v8 = vld [vmem:[%s6437_s4 + $0x550] sm:$0xff] }
0x1d63   :  { %v5122_v22 = vpack.c.bf16 %v3984_v8, %v3983_v37  ;;  %v3986_v41 = vld [vmem:[%s6437_s4 + $0x560] sm:$0xff] }
0x1d64   :  { %2832 = vrot.lane.b32.xlu1 %v2824_v40, %s5214_s24  ;;  %5196 = vtanh.f32 %v2824_v40  ;;  %v3985_v40 = vld [vmem:[%s6437_s4 + $0x558] sm:$0xff] }
0x1d68   :  { %3111 = vrot.lane.b32.xlu1 %v3970_v13, %s5212_s11 }
0x1d6e   :  { %v6149_v42 = vpop.eup %5196 }
0x1d6f   :  { %v2828_v43 = vmul.f32 1.442695, %v6149_v42 }
0x1d71   :  { %5198 = vpow2.f32 %v2828_v43  ;;  %v5125_v43 = vpack.c.bf16 %v3986_v41, %v3985_v40 }
0x1d7b   :  { %v5199_v44 = vpop.eup %5198 }
0x1d7c   :  { %v2830_v45 = vmul.f32 %v5199_v44, %v5932_v27  ;;  %v3961_v27 = vld [vmem:[%s6437_s4 + $0x4b8] sm:$0xff] }
0x1d7d   :  { %v5095_v28 = vpack.c.bf16 %v3962_v53, %v3961_v27 }
0x1d7f   :  { %5096 = vmatpush3.bf16.msra.mxu1 %v5095_v28 }
0x1d80   :  { %5097 = vmatprep.subr.bf16.mxu1 %v5209_v0 }
0x1dd6   :  { %v2833_v46 = vpop.permute.xlu1 %2832 }
0x1dd7   :  { %v2835_v48 = vadd.f32 %v2833_v46, %v2830_v45 }
0x1dd9   :  { %2842 = vrot.lane.b32.xlu0 %v2835_v48, %s5213_s23 }
0x1dda   :  { %v3112_v53 = vpop.permute.xlu1 %3111 }
0x1e4b   :  { %v2843_v49 = vpop.permute.xlu0 %2842 }
0x1e4c   :  { %v2845_v50 = vsel %vm488_vm6, %v6047_v39, %v2843_v49  ;;  %v3963_v39 = vld [vmem:[%s6437_s4 + $0x4c8] sm:$0xff] }
0x1e4d   :  { %4705 = vmatmul.mubr.msk.f32.vlgmr.msra.gmra.mrb[30].mxu0 %vm35_vm1, %v2845_v50  ;;  %v5098_v54 = vpack.c.bf16 %v3964_v31, %v3963_v39  ;;  %v3987_v50 = vld [vmem:[%s6437_s4 + $0x568] sm:$0xff] }
0x1e4e   :  { %4709 = vmatprep.mubr.msk.f32.mxu0 %vm5210_vm0, %v5211_v3  ;;  %4708 = vmatpush3.msra.mxu0 %v3959_v52  ;;  %v3988_v52 = vld [vmem:[%s6437_s4 + $0x570] sm:$0xff] }
0x1e4f   :  { %5106 = vmatprep.subr.bf16.mxu0 %v5209_v0  ;;  %5099 = vmatpush3.bf16.msra.mxu1 %v5098_v54  ;;  %v5128_v27 = vpack.c.bf16 %v3988_v52, %v3987_v50  ;;  %v4017_v52 = vld [vmem:[%s6437_s4 + $0x618] sm:$0xff] }
0x1e50   :  { %5100 = vmatprep.subr.bf16.mxu1 %v5209_v0 }
0x1e53   :  { %5102 = vmatpush3.bf16.msra.mxu1 %v5101_v57 }
0x1e54   :  { %5103 = vmatprep.subr.bf16.mxu1 %v5209_v0 }
0x1e57   :  { %5105 = vmatpush3.bf16.msra.mxu1 %v5104_v6 }
0x1e58   :  { %5118 = vmatprep.subr.bf16.mxu1 %v5209_v0 }
0x1f20   :  { %v2924_v61 = vpop.f32.mrb[30].mxu0 }
0x1f21   :  { %v2925_v62 = vadd.f32 %v3956_v58, %v2924_v61  ;;  %v4706_v63 = vpop.f32.mrb[31].mxu0 }
0x1f22   :  { %v3992_v63 = vld [vmem:[%s6437_s4 + $0x578] sm:$0xff] }
0x1f23   :  { %v6190_v2 = vmul.f32 %v3958_v59, %v2925_v62 }
0x1f25   :  { %4710 = vmatmul.mubr.msk.f32.vlgmr.msra.gmra.mrb[32].mxu0 %vm488_vm6, %v6190_v2 }
0x1f26   :  { %4747 = vmatprep.mubr.msk.f32.mxu0 %vm5210_vm0, %v5211_v3  ;;  %5108 = vmatpush3.bf16.msra.mxu0 %v5107_v12  ;;  %v5131_v12 = vpack.c.bf16 %v3995_v11, %v3994_v9 }
0x1f27   :  { %5109 = vmatprep.subr.bf16.mxu0 %v5209_v0 }
0x1f2a   :  { %5111 = vmatpush3.bf16.msra.mxu0 %v5110_v60 }
0x1f2b   :  { %5112 = vmatprep.subr.bf16.mxu0 %v5209_v0 }
0x1f2e   :  { %5114 = vmatpush3.bf16.msra.mxu0 %v5113_v15  ;;  %v3999_v15 = vld [vmem:[%s6437_s4 + $0x5a8] sm:$0xff] }
0x1f2f   :  { %5115 = vmatprep.subr.bf16.mxu0 %v5209_v0  ;;  %v5137_v16 = vpack.c.bf16 %v3999_v15, %v3998_v14 }
0x1f32   :  { %5117 = vmatpush3.bf16.msra.mxu0 %v5116_v34  ;;  %v4009_v34 = vld [vmem:[%s6437_s4 + $0x5e0] sm:$0xff] }
0x1f33   :  { %4769 = vmatprep.subr.mxu0 %v5211_v3  ;;  %v5149_v36 = vpack.c.bf16 %v4010_v35, %v4009_v34 }
0x1ff8   :  { %v3004_v21 = vpop.f32.mrb[32].mxu0 }
0x1ff9   :  { %v3005_v23 = vadd.f32 %v3004_v21, %v6233_v19  ;;  %v4711_v24 = vpop.f32.mrb[33].mxu0  ;;  %v4005_v21 = vld [vmem:[%s6437_s4 + $0x5c0] sm:$0xff] }
0x1ffa   :  { %v4007_v24 = vld [vmem:[%s6437_s4 + $0x5d0] sm:$0xff] }
0x1ffb   :  { %vm3008_vm14 = vcmp.ge.f32.partialorder %v3005_v23, 0.0  ;;  %v3009_v29 = vmul.f32 0.01, %v3005_v23 }
0x1ffd   :  { %v3010_v30 = vsel %vm3008_vm14, %v3005_v23, %v3009_v29  ;;  %v4006_v23 = vld [vmem:[%s6437_s4 + $0x5c8] sm:$0xff] }
0x1ffe   :  { %4729 = vmatmul.mubr.msk.f32.vlgmr.msra.gmra.mrb[32].mxu1 %vm580_vm8, %v3010_v30  ;;  %v5143_v29 = vpack.c.bf16 %v4006_v23, %v4005_v21  ;;  %v4008_v30 = vld [vmem:[%s6437_s4 + $0x5d8] sm:$0xff] }
0x1fff   :  { %4766 = vmatprep.mubr.msk.f32.mxu1 %vm5210_vm0, %v5211_v3  ;;  %5120 = vmatpush3.bf16.msra.mxu1 %v5119_v38  ;;  %v5146_v33 = vpack.c.bf16 %v4008_v30, %v4007_v24 }
0x2000   :  { %5121 = vmatprep.subr.bf16.mxu1 %v5209_v0 }
0x2003   :  { %5123 = vmatpush3.bf16.msra.mxu1 %v5122_v22 }
0x2004   :  { %5124 = vmatprep.subr.bf16.mxu1 %v5209_v0 }
0x2007   :  { %5126 = vmatpush3.bf16.msra.mxu1 %v5125_v43  ;;  %v4011_v43 = vld [vmem:[%s6437_s4 + $0x5f0] sm:$0xff] }
0x2008   :  { %5127 = vmatprep.subr.bf16.mxu1 %v5209_v0 }
0x200b   :  { %5129 = vmatpush3.bf16.msra.mxu1 %v5128_v27 }
0x200c   :  { %5142 = vmatprep.subr.bf16.mxu1 %v5209_v0 }
0x20d1   :  { %v3096_v44 = vpop.f32.mrb[32].mxu1 }
0x20d2   :  { %v3097_v45 = vadd.f32 %v3970_v13, %v3096_v44  ;;  %v4730_v46 = vpop.f32.mrb[33].mxu1  ;;  %v3997_v13 = vld [vmem:[%s6437_s4 + $0x598] sm:$0xff] }
0x20d3   :  { %v5134_v32 = vpack.c.bf16 %v3997_v13, %v3996_v51  ;;  %v4012_v44 = vld [vmem:[%s6437_s4 + $0x5f8] sm:$0xff]  ;;  %v4014_v46 = vld [vmem:[%s6437_s4 + $0x600] sm:$0xff] }
0x20d4   :  { %vm3100_vm15 = vcmp.ge.f32.partialorder %v3097_v45, 0.0  ;;  %v3101_v48 = vmul.f32 0.01, %v3097_v45 }
0x20d6   :  { %v3102_v49 = vsel %vm3100_vm15, %v3097_v45, %v3101_v48  ;;  %v5152_v45 = vpack.c.bf16 %v4012_v44, %v4011_v43  ;;  %v4015_v48 = vld [vmem:[%s6437_s4 + $0x608] sm:$0xff] }
0x20d7   :  { %4748 = vmatmul.mubr.msk.f32.vlgmr.msra.gmra.mrb[34].mxu0 %vm580_vm8, %v3102_v49  ;;  %v4016_v49 = vld [vmem:[%s6437_s4 + $0x610] sm:$0xff]  ;;  %v5155_v50 = vpack.c.bf16 %v4015_v48, %v4014_v46 }
0x20d8   :  { %4771 = vmatprep.mubr.msk.f32.mxu0 %vm5210_vm0, %v5211_v3  ;;  %4770 = vmatpush3.msra.mxu0 %v3992_v63  ;;  %v5158_v27 = vpack.c.bf16 %v4017_v52, %v4016_v49 }
0x20d9   :  { %5130 = vmatprep.subr.bf16.mxu0 %v5209_v0 }
0x21aa   :  { %v3183_v39 = vpop.f32.mrb[34].mxu0 }
0x21ab   :  { %v3184_v28 = vadd.f32 %v3183_v39, %v3112_v53  ;;  %v4749_v31 = vpop.f32.mrb[35].mxu0  ;;  %v4018_v53 = vld [vmem:[%s6437_s4 + $0x620] sm:$0xff]  ;;  %v4019_v39 = vld [vmem:[%s6437_s4 + $0x628] sm:$0xff] }
0x21ad   :  { %vm3187_vm2 = vcmp.ge.f32.partialorder %v3184_v28, 0.0  ;;  %v3188_v54 = vmul.f32 0.01, %v3184_v28 }
0x21af   :  { %v3189_v55 = vsel %vm3187_vm2, %v3184_v28, %v3188_v54  ;;  %v5161_v28 = vpack.c.bf16 %v4019_v39, %v4018_v53 }
0x21b0   :  { %4767 = vmatmul.mubr.msk.f32.vlgmr.msra.gmra.mrb[34].mxu1 %vm580_vm8, %v3189_v55 }
0x21b1   :  { %4809 = vmatprep.mubr.msk.f32.mxu1 %vm5210_vm0, %v5211_v3  ;;  %5144 = vmatpush3.bf16.msra.mxu1 %v5143_v29 }
0x21b2   :  { %5145 = vmatprep.subr.bf16.mxu1 %v5209_v0 }
0x21b5   :  { %5147 = vmatpush3.bf16.msra.mxu1 %v5146_v33 }
0x21b6   :  { %5148 = vmatprep.subr.bf16.mxu1 %v5209_v0 }
0x21b9   :  { %5150 = vmatpush3.bf16.msra.mxu1 %v5149_v36 }
0x21ba   :  { %5151 = vmatprep.subr.bf16.mxu1 %v5209_v0 }
0x21bd   :  { %5153 = vmatpush3.bf16.msra.mxu1 %v5152_v45 }
0x21be   :  { %5166 = vmatprep.subr.bf16.mxu1 %v5209_v0 }
0x2283   :  { %v3274_v57 = vpop.f32.mrb[34].mxu1 }
0x2284   :  { %v3275_v58 = vadd.f32 %v3990_v56, %v3274_v57  ;;  %v4768_v59 = vpop.f32.mrb[35].mxu1 }
0x2285   :  { %v4021_v59 = vld [vmem:[%s6437_s4 + $0x638] sm:$0xff] }
0x2286   :  { %5200 = vtanh.f32 %v3275_v58 }
0x2290   :  { %v6283_v61 = vpop.eup %5200 }
0x2291   :  { %v3279_v62 = vmul.f32 1.442695, %v6283_v61 }
0x2293   :  { %5202 = vpow2.f32 %v3279_v62 }
0x229d   :  { %v5203_v4 = vpop.eup %5202 }
0x229e   :  { %3282 = vrot.lane.b32.xlu0 %v5203_v4, %s5213_s23 }
0x22a2   :  { %3297 = vrot.lane.b32.xlu0 %v6233_v19, %s5212_s11  ;;  %v5140_v19 = vpack.c.bf16 %v4001_v18, %v4000_v17 }
0x2310   :  { %v3283_v5 = vpop.permute.xlu0 %3282 }
0x2311   :  { %v3285_v6 = vmul.f32 %v3283_v5, %v6190_v2 }
0x2313   :  { %v3286_v7 = vadd.f32 %v3285_v6, %v3275_v58  ;;  %v4020_v58 = vld [vmem:[%s6437_s4 + $0x630] sm:$0xff] }
0x2314   :  { %v3298_v37 = vpop.permute.xlu0 %3297 }
0x2315   :  { %3294 = vrot.lane.b32.xlu1 %v3286_v7, %s5214_s24 }
0x2319   :  { %3475 = vrot.lane.b32.xlu1 %v4003_v26, %s5212_s11 }
0x2387   :  { %v6307_v60 = vpop.permute.xlu1 %3294 }
0x2388   :  { %4772 = vmatmul.mubr.msk.f32.vlgmr.msra.gmra.mrb[36].mxu0 %vm488_vm6, %v6307_v60 }
0x2389   :  { %5132 = vmatpush3.bf16.msra.mxu0 %v5131_v12  ;;  %4790 = vmatprep.mubr.msk.f32.mxu0 %vm5210_vm0, %v5211_v3 }
0x238a   :  { %5133 = vmatprep.subr.bf16.mxu0 %v5209_v0 }
0x238b   :  { %v3476_v62 = vpop.permute.xlu1 %3475 }
0x238d   :  { %5135 = vmatpush3.bf16.msra.mxu0 %v5134_v32 }
0x238e   :  { %5136 = vmatprep.subr.bf16.mxu0 %v5209_v0 }
0x2391   :  { %5138 = vmatpush3.bf16.msra.mxu0 %v5137_v16 }
0x2392   :  { %5139 = vmatprep.subr.bf16.mxu0 %v5209_v0 }
0x2395   :  { %5141 = vmatpush3.bf16.msra.mxu0 %v5140_v19 }
0x2396   :  { %5154 = vmatprep.subr.bf16.mxu0 %v5209_v0 }
0x245b   :  { %v3368_v38 = vpop.f32.mrb[36].mxu0 }
0x245c   :  { %v3369_v8 = vadd.f32 %v3368_v38, %v3298_v37  ;;  %v4773_v22 = vpop.f32.mrb[37].mxu0 }
0x245e   :  { %vm3372_vm3 = vcmp.ge.f32.partialorder %v3369_v8, 0.0  ;;  %v3373_v40 = vmul.f32 0.01, %v3369_v8 }
0x2460   :  { %v3374_v41 = vsel %vm3372_vm3, %v3369_v8, %v3373_v40 }
0x2461   :  { %4791 = vmatmul.mubr.msk.f32.vlgmr.msra.gmra.mrb[38].mxu0 %vm580_vm8, %v3374_v41 }
0x2462   :  { %4828 = vmatprep.mubr.msk.f32.mxu0 %vm5210_vm0, %v5211_v3  ;;  %5156 = vmatpush3.bf16.msra.mxu0 %v5155_v50 }
0x2463   :  { %5157 = vmatprep.subr.bf16.mxu0 %v5209_v0 }
0x2466   :  { %5159 = vmatpush3.bf16.msra.mxu0 %v5158_v27 }
0x2467   :  { %5160 = vmatprep.subr.bf16.mxu0 %v5209_v0 }
0x246a   :  { %5162 = vmatpush3.bf16.msra.mxu0 %v5161_v28 }
0x246b   :  { %5163 = vmatprep.subr.bf16.mxu0 %v5209_v0  ;;  %v5164_v0 = vpack.c.bf16 %v4021_v59, %v4020_v58 }
0x246e   :  { %5165 = vmatpush3.bf16.msra.mxu0 %v5164_v0 }
0x2534   :  { %v3460_v31 = vpop.f32.mrb[38].mxu0 }
0x2535   :  { %v3461_v54 = vadd.f32 %v4003_v26, %v3460_v31  ;;  %v4792_v55 = vpop.f32.mrb[39].mxu0 }
0x2537   :  { %vm3464_vm4 = vcmp.ge.f32.partialorder %v3461_v54, 0.0  ;;  %v3465_v56 = vmul.f32 0.01, %v3461_v54 }
0x2539   :  { %v3466_v57 = vsel %vm3464_vm4, %v3461_v54, %v3465_v56 }
0x253a   :  { %4810 = vmatmul.mubr.msk.f32.vlgmr.msra.gmra.mrb[36].mxu1 %vm580_vm8, %v3466_v57 }
0x253b   :  { %4835 = vmatprep.mubr.msk.f32.mxu1 %vm5210_vm0, %v5211_v3  ;;  %v4023_v3 = vld [vmem:[%s6438_s5 + $0xf] ss:$0 sm:$0xff]  ;;  %vm841_vm0 = vcmask 58368  }
0x253c   :  { %v842_v51 = vsel %vm841_vm0, %v5507_v10, 0.0  ;;  %v1657_v13 = vsel %vm841_vm0, %v5765_v47, 0.0  ;;  %v2021_v32 = vsel %vm841_vm0, %v5891_v1, 0.0  ;;  %v2836_v14 = vsel %vm841_vm0, %v6149_v42, 0.0  ;;  %v4025_v10 = vld [vmem:[%s6436_s6 + $0x48] sm:$0xff]  ;;  %v4026_v47 = vld [vmem:[%s6436_s6 + $0x50] sm:$0xff] }
0x253d   :  { %v5167_v17 = vpack.c.bf16 %v4026_v47, %v4025_v10  ;;  %v1206_v23 = vsel %vm841_vm0, %v5633_v25, 0.0  ;;  %v2472_v24 = vsel %vm841_vm0, %v6023_v20, 0.0  ;;  %v3287_v29 = vsel %vm841_vm0, %v6283_v61, 0.0  ;;  %v3766_v25 = vld [vmem:[%s6436_s6 + $0x12] ss:$0 sm:$0xff] }
0x253f   :  { %5168 = vmatpush3.bf16.msra.mxu1 %v5167_v17 }
0x260d   :  { %v3547_v63 = vpop.f32.mrb[36].mxu1 }
0x260e   :  { %v3548_v4 = vadd.f32 %v3547_v63, %v3476_v62  ;;  %v4811_v5 = vpop.f32.mrb[37].mxu1 }
0x2610   :  { %vm3551_vm5 = vcmp.ge.f32.partialorder %v3548_v4, 0.0  ;;  %v3552_v6 = vmul.f32 0.01, %v3548_v4 }
0x2612   :  { %v3553_v7 = vsel %vm3551_vm5, %v3548_v4, %v3552_v6 }
0x2613   :  { %4829 = vmatmul.mubr.msk.f32.vlgmr.msra.gmra.mrb[40].mxu0 %vm580_vm8, %v3553_v7 }
0x26e6   :  { %v3638_v9 = vpop.f32.mrb[40].mxu0 }
0x26e7   :  { %v3639_v11 = vadd.f32 %v4023_v3, %v3638_v9  ;;  %v4830_v12 = vpop.f32.mrb[41].mxu0 }
0x26e9   :  { %3647 = vrot.lane.b32.xlu0 %v3639_v11, %s5214_s24  ;;  %5204 = vtanh.f32 %v3639_v11 }
0x26f3   :  { %v5205_v15 = vpop.eup %5204 }
0x26f4   :  { %v3651_v16 = vsel %vm841_vm0, %v5205_v15, 0.0  ;;  %v3643_v1 = vmul.f32 1.442695, %v5205_v15 }
0x26f6   :  { %5206 = vpow2.f32 %v3643_v1 }
0x2700   :  { %v5207_v18 = vpop.eup %5206 }
0x2701   :  { %v3645_v42 = vmul.f32 %v5207_v18, %v6190_v2 }
0x2708   :  { %843 = vadd.xlane.f32.xlu0 %v842_v51 }
0x270c   :  { %1658 = vadd.xlane.f32.xlu0 %v1657_v13 }
0x2710   :  { %2022 = vadd.xlane.f32.xlu0 %v2021_v32 }
0x2714   :  { %2837 = vadd.xlane.f32.xlu0 %v2836_v14 }
0x2718   :  { %3652 = vadd.xlane.f32.xlu0 %v3651_v16 }
0x275b   :  { %v3648_v19 = vpop.permute.xlu0 %3647 }
0x275c   :  { %v3650_v21 = vadd.f32 %v3648_v19, %v3645_v42 }
0x275e   :  { %3657 = vrot.lane.b32.xlu1 %v3650_v21, %s5213_s23 }
0x2782   :  { %1207 = vadd.xlane.f32.xlu1 %v1206_v23 }
0x2786   :  { %2473 = vadd.xlane.f32.xlu1 %v2472_v24 }
0x278a   :  { %3288 = vadd.xlane.f32.xlu1 %v3287_v29 }
0x2795   :  { %v844_v26 = vpop.xlane.xlu0 %843 }
0x2796   :  { %v845_v34 = vadd.f32 %v3766_v25, %v844_v26 }
0x2799   :  { %v1659_v33 = vpop.xlane.xlu0 %1658 }
0x279d   :  { %v2023_v35 = vpop.xlane.xlu0 %2022 }
0x27a1   :  { %v2838_v8 = vpop.xlane.xlu0 %2837 }
0x27a5   :  { %v3653_v43 = vpop.xlane.xlu0 %3652 }
0x27d0   :  { %v3658_v30 = vpop.permute.xlu1 %3657 }
0x27d1   :  { %v3660_v2 = vsel %vm488_vm6, %v6307_v60, %v3658_v30  ;;  %vm3741_vm6 = vcmask 132096  }
0x27d2   :  { %4836 = vmatmul.mubr.msk.f32.vlgmr.msra.gmra.mrb[38].mxu1 %vm35_vm1, %v3660_v2 }
0x280f   :  { %v1208_v20 = vpop.xlane.xlu1 %1207 }
0x2810   :  { %v1209_v36 = vadd.f32 %v1208_v20, %v845_v34 }
0x2812   :  { %v1660_v37 = vadd.f32 %v1659_v33, %v1209_v36 }
0x2813   :  { %v2474_v38 = vpop.xlane.xlu1 %2473 }
0x2814   :  { %v2024_v61 = vadd.f32 %v2023_v35, %v1660_v37 }
0x2816   :  { %v2475_v22 = vadd.f32 %v2474_v38, %v2024_v61 }
0x2817   :  { %v3289_v41 = vpop.xlane.xlu1 %3288 }
0x2818   :  { %v2839_v40 = vadd.f32 %v2838_v8, %v2475_v22 }
0x281a   :  { %v3290_v60 = vadd.f32 %v3289_v41, %v2839_v40 }
0x281c   :  { %v3654_v44 = vadd.f32 %v3653_v43, %v3290_v60 }
0x281e   :  { %3737 = vrot.lane.b32.xlu1 %v3654_v44, %s5215_s10 }
0x2890   :  { %v3738_v45 = vpop.permute.xlu1 %3737 }
0x28a5   :  { %v3732_v46 = vpop.f32.mrb[38].mxu1 }
0x28a6   :  { %v3740_v48 = vsel %vm35_vm1, %v3732_v46, %v3738_v45  ;;  %v4837_v49 = vpop.f32.mrb[39].mxu1 }
0x28a7   :  { %3742 = vst.msk [vmem:[%s6439_s7] sm:$0x3] %vm3741_vm6, %v3740_v48 }

</bundles_post_ra>
